<compile_context>
chip_gen: v5e
topology: v5e:2x2
jax: 0.10.0
libtpu: 0.0.40
codegen_flags: <defaults>
</compile_context>

<pallas_src>
import functools

import jax
import jax.numpy as jnp
from jax.experimental import pallas as pl
from jax.experimental.pallas import tpu as pltpu


# --------------------------------------------------------------------------------------
# Pallas kernel: Bt windows of multi-head self attention with relative position bias.
# --------------------------------------------------------------------------------------
def _mha_kernel(*refs, num_heads, has_mask):
    if has_mask:
        (x_ref, wqkv_ref, bqkv_ref, bias_ref, mask_ref,
         wproj_ref, bproj_ref, o_ref) = refs
    else:
        (x_ref, wqkv_ref, bqkv_ref, bias_ref,
         wproj_ref, bproj_ref, o_ref) = refs
        mask_ref = None

    Bt, N, Cin = x_ref.shape
    Ci = wqkv_ref.shape[1] // 3            # inner (qkv) dim
    Cout = wproj_ref.shape[1]
    hd = Ci // num_heads

    # ---- fused QKV projection for all Bt windows: (Bt*N, Cin) @ (Cin, 3Ci) on the MXU (bf16)
    x2d = x_ref[...].reshape(Bt * N, Cin)                                  # bf16
    qkv = jnp.dot(x2d, wqkv_ref[...],
                  preferred_element_type=jnp.float32) + bqkv_ref[0]        # (Bt*N, 3Ci) f32
    # (qk scale is already folded into the first Ci columns of W_qkv / b_qkv)
    qkv_bf = qkv.astype(jnp.bfloat16)                                      # single cast

    bias = bias_ref[...]                                                   # (H, N, N) f32
    if has_mask:
        m = mask_ref[...]                                                  # (mb, N, N) f32
        if m.shape[0] != Bt:                                               # Bt % nW == 0 case
            m = jnp.tile(m, (Bt // m.shape[0], 1, 1))                      # (Bt, N, N)

    outs = []
    for h in range(num_heads):                                             # static, unrolled
        q = qkv_bf[:, h * hd:(h + 1) * hd].reshape(Bt, N, hd)
        k = qkv_bf[:, Ci + h * hd:Ci + (h + 1) * hd].reshape(Bt, N, hd)
        v = qkv_bf[:, 2 * Ci + h * hd:2 * Ci + (h + 1) * hd].reshape(Bt, N, hd)

        # window-batched logits, contraction over head_dim (no explicit k transpose)
        attn = jnp.einsum('bnd,bmd->bnm', q, k,
                          preferred_element_type=jnp.float32)              # (Bt, N, N) f32
        attn = attn + bias[h]
        if has_mask:
            attn = attn + m

        # numerically-stable softmax in f32; normalizer via EUP approx reciprocal
        attn = attn - jnp.max(attn, axis=-1, keepdims=True)
        e = jnp.exp(attn)
        p = e * pl.reciprocal(jnp.sum(e, axis=-1, keepdims=True), approx=True)

        oh = jnp.einsum('bnm,bmd->bnd', p.astype(jnp.bfloat16), v,
                        preferred_element_type=jnp.float32)                # (Bt, N, hd)
        outs.append(oh.reshape(Bt * N, hd))

    # ---- single fused output projection: (Bt*N, Ci) @ (Ci, Cout) on the MXU (bf16)
    out = jnp.concatenate(outs, axis=-1).astype(jnp.bfloat16)              # (Bt*N, Ci)
    y = jnp.dot(out, wproj_ref[...],
                preferred_element_type=jnp.float32) + bproj_ref[0]         # (Bt*N, Cout) f32
    o_ref[...] = y.reshape(Bt, N, Cout).astype(o_ref.dtype)


# --------------------------------------------------------------------------------------
# Window-batch (Bt) selection
# --------------------------------------------------------------------------------------
def _pick_window_batch(B_, N, Cin, Ci, Cout, num_heads, nW):
    """Pick Bt windows per grid step.

    Targets: Bt*N >= 128 MXU rows, grid length as long as possible (>=2 keeps both v7x
    TensorCores busy), f32 intermediates well inside the default scoped VMEM limit, and
    a mask layout expressible from a BlockSpec (Bt | nW or nW | Bt).
    """
    def mask_ok(bt):
        return nW is None or nW % bt == 0 or bt % nW == 0

    def vmem_ok(bt):
        logits = bt * num_heads * N * N * 4       # f32 attention logits per head loop
        qkv = bt * N * 3 * Ci * 4                 # f32 qkv intermediate
        io = bt * N * (Cin + Cout) * 4            # x / y tiles (upper bound, f32)
        return (logits + qkv + io) <= (8 << 20)

    best = 1
    for bt in range(1, B_ + 1):
        if B_ % bt or not mask_ok(bt) or not vmem_ok(bt):
            continue
        best = bt
        if bt * N >= 128:       # enough MXU rows; stop growing so the grid stays long
            break
    return best


# --------------------------------------------------------------------------------------
# Generic multi-head attention wrapper (used by both attention modules)
# --------------------------------------------------------------------------------------
def _mha_forward(x, w_qkv, b_qkv, w_proj, b_proj, bias, num_heads, scale, mask=None):
    """x: (B_, N, Cin);  w_qkv: (Cin, 3*Ci);  w_proj: (Ci, Cout);  bias: (H, N, N);
    mask: (nW, N, N) additive (0 / -100) or None."""
    B_, N, Cin = x.shape
    Ci = w_qkv.shape[1] // 3
    Cout = w_proj.shape[1]
    out_dtype = x.dtype

    nW = None if mask is None else mask.shape[0]
    Bt = _pick_window_batch(B_, N, Cin, Ci, Cout, num_heads, nW)
    grid = (B_ // Bt,)

    # parameter prep (host-side, once): fold qk scale into q columns; cast MXU operands to bf16
    w_qkv_s = w_qkv.astype(jnp.float32).at[:, :Ci].multiply(scale).astype(jnp.bfloat16)
    b_qkv_s = b_qkv.astype(jnp.float32).at[:Ci].multiply(scale)[None]      # (1, 3Ci) f32
    w_proj_bf = w_proj.astype(jnp.bfloat16)
    b_proj_f = b_proj.astype(jnp.float32)[None]                            # (1, Cout) f32
    x_bf = x.astype(jnp.bfloat16)
    bias_f = bias.astype(jnp.float32)

    in_specs = [
        pl.BlockSpec((Bt, N, Cin), lambda g: (g, 0, 0)),                   # x (Bt windows, bf16)
        pl.BlockSpec((Cin, 3 * Ci), lambda g: (0, 0)),                     # W_qkv (bf16)
        pl.BlockSpec((1, 3 * Ci), lambda g: (0, 0)),                       # b_qkv (f32, pre-scaled)
        pl.BlockSpec((num_heads, N, N), lambda g: (0, 0, 0)),              # rel-pos bias (f32)
    ]
    inputs = [x_bf, w_qkv_s, b_qkv_s, bias_f]

    if mask is not None:
        mask_f = mask.astype(jnp.float32)
        if nW % Bt == 0:
            stride = nW // Bt
            in_specs.append(pl.BlockSpec((Bt, N, N),
                                         lambda g, s=stride: (g % s, 0, 0)))
        else:  # Bt % nW == 0 (tiled inside the kernel)
            in_specs.append(pl.BlockSpec((nW, N, N), lambda g: (0, 0, 0)))
        inputs.append(mask_f)

    in_specs += [
        pl.BlockSpec((Ci, Cout), lambda g: (0, 0)),                        # W_proj (bf16)
        pl.BlockSpec((1, Cout), lambda g: (0, 0)),                         # b_proj (f32)
    ]
    inputs += [w_proj_bf, b_proj_f]

    kernel = functools.partial(_mha_kernel,
                               num_heads=num_heads, has_mask=mask is not None)

    return pl.pallas_call(
        kernel,
        out_shape=jax.ShapeDtypeStruct((B_, N, Cout), out_dtype),
        grid_spec=pltpu.PrefetchScalarGridSpec(
            num_scalar_prefetch=0,
            grid=grid,
            in_specs=in_specs,
            out_specs=pl.BlockSpec((Bt, N, Cout), lambda g: (g, 0, 0)),
        ),
        compiler_params=pltpu.CompilerParams(dimension_semantics=("parallel",)),
    )(*inputs)


# --------------------------------------------------------------------------------------
# Module-level wrappers
# --------------------------------------------------------------------------------------
def window_attention_3d(x, params, rel_index, num_heads, mask=None, qk_scale=None):
    """WindowAttention3D.forward: x (B_, N, C); mask (nW, N, N) or None."""
    B_, N, C = x.shape
    scale = qk_scale or (C // num_heads) ** (-0.5)
    bias = params["rpb_table"][rel_index[:N, :N].reshape(-1)]
    bias = bias.reshape(N, N, num_heads).transpose(2, 0, 1)
    return _mha_forward(x, params["w_qkv"], params["b_qkv"],
                        params["w_proj"], params["b_proj"],
                        bias, num_heads, scale, mask=mask)


def times_attention_3d(x, params, rel_index, num_heads, qk_scale=None):
    """TimesAttention3D.forward: x (B*H*W, frames, C); qkv maps C -> 3*(C//2),
    proj maps C//2 -> C. PyTorch uses scale = (C // num_heads) ** -0.5."""
    B_, N, C = x.shape
    scale = qk_scale or (C // num_heads) ** (-0.5)
    bias = params["rpb_table"][rel_index[:N, :N].reshape(-1)]
    bias = bias.reshape(N, N, num_heads).transpose(2, 0, 1)
    return _mha_forward(x, params["w_qkv"], params["b_qkv"],
                        params["w_proj"], params["b_proj"],
                        bias, num_heads, scale, mask=None)


# --------------------------------------------------------------------------------------
# Parameter / buffer construction (deterministic, matches module __init__ shapes)
# --------------------------------------------------------------------------------------
def relative_position_index_3d(window_size):
    d, h, w = window_size
    coords = jnp.stack(jnp.meshgrid(jnp.arange(d), jnp.arange(h), jnp.arange(w),
                                    indexing="ij"))                 # (3, d, h, w)
    cf = coords.reshape(3, -1)                                      # (3, N)
    rel = cf[:, :, None] - cf[:, None, :]                           # (3, N, N)
    rel = jnp.transpose(rel, (1, 2, 0))                             # (N, N, 3)
    rel = rel + jnp.array([d - 1, h - 1, w - 1])
    rel = rel * jnp.array([(2 * h - 1) * (2 * w - 1), 2 * w - 1, 1])
    return rel.sum(-1)                                              # (N, N)


def init_attn_params(key, dim_in, dim_inner, dim_out, window_size, num_heads,
                     qkv_bias=False):
    table_len = ((2 * window_size[0] - 1) * (2 * window_size[1] - 1)
                 * (2 * window_size[2] - 1))
    k1, k2, k3, k4 = jax.random.split(key, 4)
    return {
        # trunc_normal_(std=0.02) approximated with plain normal (synthetic weights)
        "rpb_table": 0.02 * jax.random.normal(k1, (table_len, num_heads), jnp.float32),
        "w_qkv": 0.05 * jax.random.normal(k2, (dim_in, 3 * dim_inner), jnp.float32),
        "b_qkv": (0.05 * jax.random.normal(k4, (3 * dim_inner,), jnp.float32) if qkv_bias
                  else jnp.zeros((3 * dim_inner,), jnp.float32)),
        "w_proj": 0.05 * jax.random.normal(k3, (dim_inner, dim_out), jnp.float32),
        "b_proj": 0.01 * jnp.ones((dim_out,), jnp.float32),
    }


# --------------------------------------------------------------------------------------
# Pure-JAX reference (mirrors the PyTorch forwards) for verification
# --------------------------------------------------------------------------------------
def ref_mha(x, params, rel_index, num_heads, scale, mask=None):
    B_, N, Cin = x.shape
    Ci = params["w_qkv"].shape[1] // 3
    hd = Ci // num_heads
    qkv = x @ params["w_qkv"] + params["b_qkv"]
    qkv = qkv.reshape(B_, N, 3, num_heads, hd).transpose(2, 0, 3, 1, 4)
    q, k, v = qkv[0] * scale, qkv[1], qkv[2]
    attn = jnp.einsum("bhnd,bhmd->bhnm", q, k)
    bias = params["rpb_table"][rel_index[:N, :N].reshape(-1)]
    bias = bias.reshape(N, N, num_heads).transpose(2, 0, 1)
    attn = attn + bias[None]
    if mask is not None:
        nW = mask.shape[0]
        attn = attn.reshape(B_ // nW, nW, num_heads, N, N) + mask[None, :, None]
        attn = attn.reshape(-1, num_heads, N, N)
    attn = jax.nn.softmax(attn, axis=-1)
    out = jnp.einsum("bhnm,bhmd->bhnd", attn, v)
    out = out.transpose(0, 2, 1, 3).reshape(B_, N, Ci)
    return out @ params["w_proj"] + params["b_proj"]
    # attn_drop / proj_drop are identity at p=0.0 (eval)


# --------------------------------------------------------------------------------------
if __name__ == "__main__":
    key = jax.random.PRNGKey(0)
    kx, km, kp, kt, kq = jax.random.split(key, 5)

    # ---------- WindowAttention3D: dim=32, window (2,4,4) -> N=32, heads=4 ----------
    dim = 32
    window_size = (2, 4, 4)
    num_heads = 4
    N = window_size[0] * window_size[1] * window_size[2]
    nW = 4                             # windows per image
    B = 2
    B_ = B * nW                        # 8 windows total -> Bt=4, grid=(2,)

    x = jax.random.normal(kx, (B_, N, dim), jnp.float32)
    # 0 / -100 style additive attention mask (as produced by shifted-window masking)
    mask = jnp.where(jax.random.uniform(km, (nW, N, N)) > 0.9, -100.0, 0.0).astype(jnp.float32)

    wparams = init_attn_params(kp, dim, dim, dim, window_size, num_heads, qkv_bias=True)
    wrel = relative_position_index_3d(window_size)
    scale_w = (dim // num_heads) ** (-0.5)

    out_nomask = jax.block_until_ready(
        window_attention_3d(x, wparams, wrel, num_heads, mask=None))
    out_mask = jax.block_until_ready(
        window_attention_3d(x, wparams, wrel, num_heads, mask=mask))
    ref_nomask = ref_mha(x, wparams, wrel, num_heads, scale_w, mask=None)
    ref_mask = ref_mha(x, wparams, wrel, num_heads, scale_w, mask=mask)

    # ---------- TimesAttention3D: dim=32 -> inner 16, heads=4, frames=8, B*H*W=64 ----------
    frames = 8
    x_times = jax.random.normal(kq, (64, frames, dim), jnp.float32)
    tparams = init_attn_params(kt, dim, dim // 2, dim, (frames, 1, 1), num_heads,
                               qkv_bias=True)
    trel = relative_position_index_3d((frames, 1, 1))
    scale_t = (dim // num_heads) ** (-0.5)     # PyTorch uses head_dim from dim, not dim//2

    out_times = jax.block_until_ready(
        times_attention_3d(x_times, tparams, trel, num_heads))
    ref_times = ref_mha(x_times, tparams, trel, num_heads, scale_t, mask=None)

    # ---------- checks ----------
    assert out_nomask.shape == (B_, N, dim)
    assert out_mask.shape == (B_, N, dim)
    assert out_times.shape == (64, frames, dim)
    err_nomask = float(jnp.max(jnp.abs(out_nomask - ref_nomask)))
    err_mask = float(jnp.max(jnp.abs(out_mask - ref_mask)))
    err_times = float(jnp.max(jnp.abs(out_times - ref_times)))
    # bf16 MXU operands + approx reciprocal -> small abs error vs. the f32 reference
    assert err_nomask < 3e-2, err_nomask
    assert err_mask < 3e-2, err_mask
    assert err_times < 3e-2, err_times

    print("KERNEL_OK")
</pallas_src>

<mosaic_0001>
module attributes {stable_mosaic.version = 11 : i64} {
  func.func @_mha_kernel(%arg0: i32, %arg1: memref<4x32x32xbf16, #tpu.memory_space<vmem>>, %arg2: memref<32x96xbf16, #tpu.memory_space<vmem>>, %arg3: memref<1x96xf32, #tpu.memory_space<vmem>>, %arg4: memref<4x32x32xf32, #tpu.memory_space<vmem>>, %arg5: memref<32x32xbf16, #tpu.memory_space<vmem>>, %arg6: memref<1x32xf32, #tpu.memory_space<vmem>>, %arg7: memref<4x32x32xf32, #tpu.memory_space<vmem>>) attributes {dimension_semantics = [#tpu.dimension_semantics<parallel>], iteration_bounds = array<i64: 2>, scalar_prefetch = 0 : i64, scratch_operands = 0 : i64, tpu.core_type = #tpu.core_type<tc>, window_params = [{transform_indices = @transform_0, window_bounds = array<i64: 4, 32, 32>}, {pipeline_mode = #tpu.pipeline_mode<synchronous>, transform_indices = @transform_1, window_bounds = array<i64: 32, 96>}, {pipeline_mode = #tpu.pipeline_mode<synchronous>, transform_indices = @transform_2, window_bounds = array<i64: 1, 96>}, {pipeline_mode = #tpu.pipeline_mode<synchronous>, transform_indices = @transform_3, window_bounds = array<i64: 4, 32, 32>}, {pipeline_mode = #tpu.pipeline_mode<synchronous>, transform_indices = @transform_4, window_bounds = array<i64: 32, 32>}, {pipeline_mode = #tpu.pipeline_mode<synchronous>, transform_indices = @transform_5, window_bounds = array<i64: 1, 32>}, {transform_indices = @transform_6, window_bounds = array<i64: 4, 32, 32>}]} {
    %c0 = arith.constant 0 : index
    %c0_0 = arith.constant 0 : index
    %c0_1 = arith.constant 0 : index
    %0 = vector.load %arg1[%c0, %c0_0, %c0_1] : memref<4x32x32xbf16, #tpu.memory_space<vmem>>, vector<4x32x32xbf16>
    %1 = vector.shape_cast %0 : vector<4x32x32xbf16> to vector<128x32xbf16>
    %c0_2 = arith.constant 0 : index
    %c0_3 = arith.constant 0 : index
    %2 = vector.load %arg2[%c0_2, %c0_3] : memref<32x96xbf16, #tpu.memory_space<vmem>>, vector<32x96xbf16>
    %cst = arith.constant dense<0.000000e+00> : vector<128x96xf32>
    %3 = tpu.matmul %1, %2, %cst {dimension_numbers = #tpu.dot_dimension_numbers<[1], [0], [0], [1], [0, 0, 1, 1], [], []>} : vector<128x32xbf16>, vector<32x96xbf16>, vector<128x96xf32> -> vector<128x96xf32>
    %c0_4 = arith.constant 0 : index
    %c0_5 = arith.constant 0 : index
    %4 = vector.load %arg3[%c0_4, %c0_5] : memref<1x96xf32, #tpu.memory_space<vmem>>, vector<1x96xf32>
    %5 = vector.shape_cast %4 : vector<1x96xf32> to vector<96xf32>
    %6 = vector.shape_cast %5 : vector<96xf32> to vector<1x96xf32>
    %7 = vector.broadcast %6 : vector<1x96xf32> to vector<128x96xf32>
    %8 = arith.addf %3, %7 : vector<128x96xf32>
    %9 = arith.truncf %8 : vector<128x96xf32> to vector<128x96xbf16>
    %c0_6 = arith.constant 0 : index
    %c0_7 = arith.constant 0 : index
    %c0_8 = arith.constant 0 : index
    %10 = vector.load %arg4[%c0_6, %c0_7, %c0_8] : memref<4x32x32xf32, #tpu.memory_space<vmem>>, vector<4x32x32xf32>
    %11 = vector.extract_strided_slice %9 {offsets = [0, 0], sizes = [128, 8], strides = [1, 1]} : vector<128x96xbf16> to vector<128x8xbf16>
    %12 = vector.shape_cast %11 : vector<128x8xbf16> to vector<4x32x8xbf16>
    %13 = vector.extract_strided_slice %9 {offsets = [0, 32], sizes = [128, 8], strides = [1, 1]} : vector<128x96xbf16> to vector<128x8xbf16>
    %14 = vector.shape_cast %13 : vector<128x8xbf16> to vector<4x32x8xbf16>
    %15 = vector.extract_strided_slice %9 {offsets = [0, 64], sizes = [128, 8], strides = [1, 1]} : vector<128x96xbf16> to vector<128x8xbf16>
    %16 = vector.shape_cast %15 : vector<128x8xbf16> to vector<4x32x8xbf16>
    "tpu.trace_start"() <{level = 10 : i32, message = "bnd,bmd->bnm"}> : () -> ()
    %cst_9 = arith.constant dense<0.000000e+00> : vector<4x32x32xf32>
    %17 = tpu.matmul %12, %14, %cst_9 {dimension_numbers = #tpu.dot_dimension_numbers<[2], [2], [1], [1], [0, 0, 0, 1, 1, 1], [0], [0]>} : vector<4x32x8xbf16>, vector<4x32x8xbf16>, vector<4x32x32xf32> -> vector<4x32x32xf32>
    "tpu.trace_stop"() : () -> ()
    %18 = vector.extract_strided_slice %10 {offsets = [0, 0, 0], sizes = [1, 32, 32], strides = [1, 1, 1]} : vector<4x32x32xf32> to vector<1x32x32xf32>
    %19 = vector.shape_cast %18 : vector<1x32x32xf32> to vector<32x32xf32>
    %20 = vector.shape_cast %19 : vector<32x32xf32> to vector<1x32x32xf32>
    %21 = vector.broadcast %20 : vector<1x32x32xf32> to vector<4x32x32xf32>
    %22 = arith.addf %17, %21 : vector<4x32x32xf32>
    %cst_10 = arith.constant dense<0xFF800000> : vector<4x32xf32>
    %23 = vector.multi_reduction <maximumf>, %22, %cst_10 [2] : vector<4x32x32xf32> to vector<4x32xf32>
    %24 = vector.shape_cast %23 : vector<4x32xf32> to vector<4x32x1xf32>
    %25 = vector.broadcast %24 : vector<4x32x1xf32> to vector<4x32x32xf32>
    %26 = arith.subf %22, %25 : vector<4x32x32xf32>
    %27 = math.exp %26 : vector<4x32x32xf32>
    %cst_11 = arith.constant dense<0.000000e+00> : vector<4x32xf32>
    %28 = vector.multi_reduction <add>, %27, %cst_11 [2] : vector<4x32x32xf32> to vector<4x32xf32>
    %29 = vector.shape_cast %28 : vector<4x32xf32> to vector<4x32x1xf32>
    %30 = tpu.reciprocal %29 {approx = true} : vector<4x32x1xf32> -> vector<4x32x1xf32>
    %31 = vector.broadcast %30 : vector<4x32x1xf32> to vector<4x32x32xf32>
    %32 = arith.mulf %27, %31 : vector<4x32x32xf32>
    %33 = arith.truncf %32 : vector<4x32x32xf32> to vector<4x32x32xbf16>
    "tpu.trace_start"() <{level = 10 : i32, message = "bnm,bmd->bnd"}> : () -> ()
    %cst_12 = arith.constant dense<0.000000e+00> : vector<4x32x8xf32>
    %34 = tpu.matmul %33, %16, %cst_12 {dimension_numbers = #tpu.dot_dimension_numbers<[2], [1], [1], [2], [0, 0, 0, 1, 1, 2], [0], [0]>} : vector<4x32x32xbf16>, vector<4x32x8xbf16>, vector<4x32x8xf32> -> vector<4x32x8xf32>
    "tpu.trace_stop"() : () -> ()
    %35 = vector.shape_cast %34 : vector<4x32x8xf32> to vector<128x8xf32>
    %36 = vector.extract_strided_slice %9 {offsets = [0, 8], sizes = [128, 8], strides = [1, 1]} : vector<128x96xbf16> to vector<128x8xbf16>
    %37 = vector.shape_cast %36 : vector<128x8xbf16> to vector<4x32x8xbf16>
    %38 = vector.extract_strided_slice %9 {offsets = [0, 40], sizes = [128, 8], strides = [1, 1]} : vector<128x96xbf16> to vector<128x8xbf16>
    %39 = vector.shape_cast %38 : vector<128x8xbf16> to vector<4x32x8xbf16>
    %40 = vector.extract_strided_slice %9 {offsets = [0, 72], sizes = [128, 8], strides = [1, 1]} : vector<128x96xbf16> to vector<128x8xbf16>
    %41 = vector.shape_cast %40 : vector<128x8xbf16> to vector<4x32x8xbf16>
    "tpu.trace_start"() <{level = 10 : i32, message = "bnd,bmd->bnm"}> : () -> ()
    %cst_13 = arith.constant dense<0.000000e+00> : vector<4x32x32xf32>
    %42 = tpu.matmul %37, %39, %cst_13 {dimension_numbers = #tpu.dot_dimension_numbers<[2], [2], [1], [1], [0, 0, 0, 1, 1, 1], [0], [0]>} : vector<4x32x8xbf16>, vector<4x32x8xbf16>, vector<4x32x32xf32> -> vector<4x32x32xf32>
    "tpu.trace_stop"() : () -> ()
    %43 = vector.extract_strided_slice %10 {offsets = [1, 0, 0], sizes = [1, 32, 32], strides = [1, 1, 1]} : vector<4x32x32xf32> to vector<1x32x32xf32>
    %44 = vector.shape_cast %43 : vector<1x32x32xf32> to vector<32x32xf32>
    %45 = vector.shape_cast %44 : vector<32x32xf32> to vector<1x32x32xf32>
    %46 = vector.broadcast %45 : vector<1x32x32xf32> to vector<4x32x32xf32>
    %47 = arith.addf %42, %46 : vector<4x32x32xf32>
    %cst_14 = arith.constant dense<0xFF800000> : vector<4x32xf32>
    %48 = vector.multi_reduction <maximumf>, %47, %cst_14 [2] : vector<4x32x32xf32> to vector<4x32xf32>
    %49 = vector.shape_cast %48 : vector<4x32xf32> to vector<4x32x1xf32>
    %50 = vector.broadcast %49 : vector<4x32x1xf32> to vector<4x32x32xf32>
    %51 = arith.subf %47, %50 : vector<4x32x32xf32>
    %52 = math.exp %51 : vector<4x32x32xf32>
    %cst_15 = arith.constant dense<0.000000e+00> : vector<4x32xf32>
    %53 = vector.multi_reduction <add>, %52, %cst_15 [2] : vector<4x32x32xf32> to vector<4x32xf32>
    %54 = vector.shape_cast %53 : vector<4x32xf32> to vector<4x32x1xf32>
    %55 = tpu.reciprocal %54 {approx = true} : vector<4x32x1xf32> -> vector<4x32x1xf32>
    %56 = vector.broadcast %55 : vector<4x32x1xf32> to vector<4x32x32xf32>
    %57 = arith.mulf %52, %56 : vector<4x32x32xf32>
    %58 = arith.truncf %57 : vector<4x32x32xf32> to vector<4x32x32xbf16>
    "tpu.trace_start"() <{level = 10 : i32, message = "bnm,bmd->bnd"}> : () -> ()
    %cst_16 = arith.constant dense<0.000000e+00> : vector<4x32x8xf32>
    %59 = tpu.matmul %58, %41, %cst_16 {dimension_numbers = #tpu.dot_dimension_numbers<[2], [1], [1], [2], [0, 0, 0, 1, 1, 2], [0], [0]>} : vector<4x32x32xbf16>, vector<4x32x8xbf16>, vector<4x32x8xf32> -> vector<4x32x8xf32>
    "tpu.trace_stop"() : () -> ()
    %60 = vector.shape_cast %59 : vector<4x32x8xf32> to vector<128x8xf32>
    %61 = vector.extract_strided_slice %9 {offsets = [0, 16], sizes = [128, 8], strides = [1, 1]} : vector<128x96xbf16> to vector<128x8xbf16>
    %62 = vector.shape_cast %61 : vector<128x8xbf16> to vector<4x32x8xbf16>
    %63 = vector.extract_strided_slice %9 {offsets = [0, 48], sizes = [128, 8], strides = [1, 1]} : vector<128x96xbf16> to vector<128x8xbf16>
    %64 = vector.shape_cast %63 : vector<128x8xbf16> to vector<4x32x8xbf16>
    %65 = vector.extract_strided_slice %9 {offsets = [0, 80], sizes = [128, 8], strides = [1, 1]} : vector<128x96xbf16> to vector<128x8xbf16>
    %66 = vector.shape_cast %65 : vector<128x8xbf16> to vector<4x32x8xbf16>
    "tpu.trace_start"() <{level = 10 : i32, message = "bnd,bmd->bnm"}> : () -> ()
    %cst_17 = arith.constant dense<0.000000e+00> : vector<4x32x32xf32>
    %67 = tpu.matmul %62, %64, %cst_17 {dimension_numbers = #tpu.dot_dimension_numbers<[2], [2], [1], [1], [0, 0, 0, 1, 1, 1], [0], [0]>} : vector<4x32x8xbf16>, vector<4x32x8xbf16>, vector<4x32x32xf32> -> vector<4x32x32xf32>
    "tpu.trace_stop"() : () -> ()
    %68 = vector.extract_strided_slice %10 {offsets = [2, 0, 0], sizes = [1, 32, 32], strides = [1, 1, 1]} : vector<4x32x32xf32> to vector<1x32x32xf32>
    %69 = vector.shape_cast %68 : vector<1x32x32xf32> to vector<32x32xf32>
    %70 = vector.shape_cast %69 : vector<32x32xf32> to vector<1x32x32xf32>
    %71 = vector.broadcast %70 : vector<1x32x32xf32> to vector<4x32x32xf32>
    %72 = arith.addf %67, %71 : vector<4x32x32xf32>
    %cst_18 = arith.constant dense<0xFF800000> : vector<4x32xf32>
    %73 = vector.multi_reduction <maximumf>, %72, %cst_18 [2] : vector<4x32x32xf32> to vector<4x32xf32>
    %74 = vector.shape_cast %73 : vector<4x32xf32> to vector<4x32x1xf32>
    %75 = vector.broadcast %74 : vector<4x32x1xf32> to vector<4x32x32xf32>
    %76 = arith.subf %72, %75 : vector<4x32x32xf32>
    %77 = math.exp %76 : vector<4x32x32xf32>
    %cst_19 = arith.constant dense<0.000000e+00> : vector<4x32xf32>
    %78 = vector.multi_reduction <add>, %77, %cst_19 [2] : vector<4x32x32xf32> to vector<4x32xf32>
    %79 = vector.shape_cast %78 : vector<4x32xf32> to vector<4x32x1xf32>
    %80 = tpu.reciprocal %79 {approx = true} : vector<4x32x1xf32> -> vector<4x32x1xf32>
    %81 = vector.broadcast %80 : vector<4x32x1xf32> to vector<4x32x32xf32>
    %82 = arith.mulf %77, %81 : vector<4x32x32xf32>
    %83 = arith.truncf %82 : vector<4x32x32xf32> to vector<4x32x32xbf16>
    "tpu.trace_start"() <{level = 10 : i32, message = "bnm,bmd->bnd"}> : () -> ()
    %cst_20 = arith.constant dense<0.000000e+00> : vector<4x32x8xf32>
    %84 = tpu.matmul %83, %66, %cst_20 {dimension_numbers = #tpu.dot_dimension_numbers<[2], [1], [1], [2], [0, 0, 0, 1, 1, 2], [0], [0]>} : vector<4x32x32xbf16>, vector<4x32x8xbf16>, vector<4x32x8xf32> -> vector<4x32x8xf32>
    "tpu.trace_stop"() : () -> ()
    %85 = vector.shape_cast %84 : vector<4x32x8xf32> to vector<128x8xf32>
    %86 = vector.extract_strided_slice %9 {offsets = [0, 24], sizes = [128, 8], strides = [1, 1]} : vector<128x96xbf16> to vector<128x8xbf16>
    %87 = vector.shape_cast %86 : vector<128x8xbf16> to vector<4x32x8xbf16>
    %88 = vector.extract_strided_slice %9 {offsets = [0, 56], sizes = [128, 8], strides = [1, 1]} : vector<128x96xbf16> to vector<128x8xbf16>
    %89 = vector.shape_cast %88 : vector<128x8xbf16> to vector<4x32x8xbf16>
    %90 = vector.extract_strided_slice %9 {offsets = [0, 88], sizes = [128, 8], strides = [1, 1]} : vector<128x96xbf16> to vector<128x8xbf16>
    %91 = vector.shape_cast %90 : vector<128x8xbf16> to vector<4x32x8xbf16>
    "tpu.trace_start"() <{level = 10 : i32, message = "bnd,bmd->bnm"}> : () -> ()
    %cst_21 = arith.constant dense<0.000000e+00> : vector<4x32x32xf32>
    %92 = tpu.matmul %87, %89, %cst_21 {dimension_numbers = #tpu.dot_dimension_numbers<[2], [2], [1], [1], [0, 0, 0, 1, 1, 1], [0], [0]>} : vector<4x32x8xbf16>, vector<4x32x8xbf16>, vector<4x32x32xf32> -> vector<4x32x32xf32>
    "tpu.trace_stop"() : () -> ()
    %93 = vector.extract_strided_slice %10 {offsets = [3, 0, 0], sizes = [1, 32, 32], strides = [1, 1, 1]} : vector<4x32x32xf32> to vector<1x32x32xf32>
    %94 = vector.shape_cast %93 : vector<1x32x32xf32> to vector<32x32xf32>
    %95 = vector.shape_cast %94 : vector<32x32xf32> to vector<1x32x32xf32>
    %96 = vector.broadcast %95 : vector<1x32x32xf32> to vector<4x32x32xf32>
    %97 = arith.addf %92, %96 : vector<4x32x32xf32>
    %cst_22 = arith.constant dense<0xFF800000> : vector<4x32xf32>
    %98 = vector.multi_reduction <maximumf>, %97, %cst_22 [2] : vector<4x32x32xf32> to vector<4x32xf32>
    %99 = vector.shape_cast %98 : vector<4x32xf32> to vector<4x32x1xf32>
    %100 = vector.broadcast %99 : vector<4x32x1xf32> to vector<4x32x32xf32>
    %101 = arith.subf %97, %100 : vector<4x32x32xf32>
    %102 = math.exp %101 : vector<4x32x32xf32>
    %cst_23 = arith.constant dense<0.000000e+00> : vector<4x32xf32>
    %103 = vector.multi_reduction <add>, %102, %cst_23 [2] : vector<4x32x32xf32> to vector<4x32xf32>
    %104 = vector.shape_cast %103 : vector<4x32xf32> to vector<4x32x1xf32>
    %105 = tpu.reciprocal %104 {approx = true} : vector<4x32x1xf32> -> vector<4x32x1xf32>
    %106 = vector.broadcast %105 : vector<4x32x1xf32> to vector<4x32x32xf32>
    %107 = arith.mulf %102, %106 : vector<4x32x32xf32>
    %108 = arith.truncf %107 : vector<4x32x32xf32> to vector<4x32x32xbf16>
    "tpu.trace_start"() <{level = 10 : i32, message = "bnm,bmd->bnd"}> : () -> ()
    %cst_24 = arith.constant dense<0.000000e+00> : vector<4x32x8xf32>
    %109 = tpu.matmul %108, %91, %cst_24 {dimension_numbers = #tpu.dot_dimension_numbers<[2], [1], [1], [2], [0, 0, 0, 1, 1, 2], [0], [0]>} : vector<4x32x32xbf16>, vector<4x32x8xbf16>, vector<4x32x8xf32> -> vector<4x32x8xf32>
    "tpu.trace_stop"() : () -> ()
    %110 = vector.shape_cast %109 : vector<4x32x8xf32> to vector<128x8xf32>
    %111 = tpu.concatenate %35, %60, %85, %110 in 1 : vector<128x8xf32>, vector<128x8xf32>, vector<128x8xf32>, vector<128x8xf32> -> vector<128x32xf32>
    %112 = arith.truncf %111 : vector<128x32xf32> to vector<128x32xbf16>
    %c0_25 = arith.constant 0 : index
    %c0_26 = arith.constant 0 : index
    %113 = vector.load %arg5[%c0_25, %c0_26] : memref<32x32xbf16, #tpu.memory_space<vmem>>, vector<32x32xbf16>
    %cst_27 = arith.constant dense<0.000000e+00> : vector<128x32xf32>
    %114 = tpu.matmul %112, %113, %cst_27 {dimension_numbers = #tpu.dot_dimension_numbers<[1], [0], [0], [1], [0, 0, 1, 1], [], []>} : vector<128x32xbf16>, vector<32x32xbf16>, vector<128x32xf32> -> vector<128x32xf32>
    %c0_28 = arith.constant 0 : index
    %c0_29 = arith.constant 0 : index
    %115 = vector.load %arg6[%c0_28, %c0_29] : memref<1x32xf32, #tpu.memory_space<vmem>>, vector<1x32xf32>
    %116 = vector.shape_cast %115 : vector<1x32xf32> to vector<32xf32>
    %117 = vector.shape_cast %116 : vector<32xf32> to vector<1x32xf32>
    %118 = vector.broadcast %117 : vector<1x32xf32> to vector<128x32xf32>
    %119 = arith.addf %114, %118 : vector<128x32xf32>
    %120 = vector.shape_cast %119 : vector<128x32xf32> to vector<4x32x32xf32>
    %c0_30 = arith.constant 0 : index
    %c0_31 = arith.constant 0 : index
    %c0_32 = arith.constant 0 : index
    %121 = vector.load %arg7[%c0_30, %c0_31, %c0_32] : memref<4x32x32xf32, #tpu.memory_space<vmem>>, vector<4x32x32xf32>
    tpu.vector_store %arg7[%c0_30, %c0_31, %c0_32], %120 {strides = array<i32>} : memref<4x32x32xf32, #tpu.memory_space<vmem>>, vector<4x32x32xf32>,
    return
  }
  func.func @transform_0(%arg0: i32) -> (i32, i32, i32) {
    %c0_i32 = arith.constant 0 : i32
    %c0_i32_0 = arith.constant 0 : i32
    %c0_i32_1 = arith.constant 0 : i32
    return %arg0, %c0_i32, %c0_i32_0 : i32, i32, i32
  }
  func.func @transform_1(%arg0: i32) -> (i32, i32) {
    %c0_i32 = arith.constant 0 : i32
    %c0_i32_0 = arith.constant 0 : i32
    %c0_i32_1 = arith.constant 0 : i32
    return %c0_i32, %c0_i32_0 : i32, i32
  }
  func.func @transform_2(%arg0: i32) -> (i32, i32) {
    %c0_i32 = arith.constant 0 : i32
    %c0_i32_0 = arith.constant 0 : i32
    %c0_i32_1 = arith.constant 0 : i32
    return %c0_i32, %c0_i32_0 : i32, i32
  }
  func.func @transform_3(%arg0: i32) -> (i32, i32, i32) {
    %c0_i32 = arith.constant 0 : i32
    %c0_i32_0 = arith.constant 0 : i32
    %c0_i32_1 = arith.constant 0 : i32
    %c0_i32_2 = arith.constant 0 : i32
    return %c0_i32, %c0_i32_0, %c0_i32_1 : i32, i32, i32
  }
  func.func @transform_4(%arg0: i32) -> (i32, i32) {
    %c0_i32 = arith.constant 0 : i32
    %c0_i32_0 = arith.constant 0 : i32
    %c0_i32_1 = arith.constant 0 : i32
    return %c0_i32, %c0_i32_0 : i32, i32
  }
  func.func @transform_5(%arg0: i32) -> (i32, i32) {
    %c0_i32 = arith.constant 0 : i32
    %c0_i32_0 = arith.constant 0 : i32
    %c0_i32_1 = arith.constant 0 : i32
    return %c0_i32, %c0_i32_0 : i32, i32
  }
  func.func @transform_6(%arg0: i32) -> (i32, i32, i32) {
    %c0_i32 = arith.constant 0 : i32
    %c0_i32_0 = arith.constant 0 : i32
    %c0_i32_1 = arith.constant 0 : i32
    return %arg0, %c0_i32, %c0_i32_0 : i32, i32, i32
  }
}

</mosaic_0001>

<bundles_post_ra>
// kernel: tpu_custom_call.1
= control target key start
LH: loop header
LB: loop body
LE: loop exit
PB: predicated region body
PF: predicated region fallthrough
CT: control target
= control target key end

     0   :  { %11 = vsyncpa [#allocation3], 0  ;;  %s5455_s0 = inlined_call_operand.hbm [shape: bf16[8,32,32], index: 0, kind: input, shape index: {}]   ;;  %s5456_s1 = inlined_call_operand.hbm [shape: bf16[32,96], index: 1, kind: input, shape index: {}]   ;;  %s5457_s2 = inlined_call_operand.vmem [shape: f32[1,96], index: 2, kind: input, shape index: {}]   ;;  %s5458_s3 = inlined_call_operand.hbm [shape: f32[4,32,32], index: 3, kind: input, shape index: {}]   ;;  %s5459_s4 = inlined_call_operand.hbm [shape: bf16[32,32], index: 4, kind: input, shape index: {}]   ;;  %s5460_s5 = inlined_call_operand.vmem [shape: f32[1,32], index: 5, kind: input, shape index: {}]   ;;  %s5461_s6 = inlined_call_operand.hbm [shape: f32[8,32,32], index: 6, kind: output, shape index: {}]  }
   0x1   :  { %13 = vsyncpa [#allocation3 + $0x1], 0 }
   0x2   :  { %14 = vsyncpa [#allocation6], 0 }
   0x3   :  { %15 = vsyncpa [#allocation9], 0 }
   0x4   :  { %16 = vsyncpa [#allocation4], 0 }
   0x5   :  { %18 = vsyncpa [#allocation4 + $0x1], 0  ;;  %s3958_s21 = smov 0   ;;  %s3960_s22 = smov 0  }
   0x6   :  { %s3962_s23 = smov 0   ;;  %s3964_s24 = smov 0  }
   0x7 LB: > { %s3979_s25 = sadd.s32 4294967295, %s3899_s24   ;;  %s3059_s26 = sadd.s32 4294967294, %s3899_s24   ;;  %s3899_s24 = sphi %s3964_s24, %s5528_s24   ;;  %s3895_s23 = sphi %s3962_s23, %s5527_s23   ;;  %s3891_s22 = sphi %s3960_s22, %s5526_s22   ;;  %s3887_s21 = sphi %s3958_s21, %s5525_s21  }
   0x8   : > { %p44_p0 = scmp.ne.s32.totalorder %s3891_s22, %s3887_s21  ;;  %p45_p1 = scmp.eq.s32.totalorder %s3979_s25, 0 }
   0x9   : > { %p173_p2 = scmp.eq.s32.totalorder %s3979_s25, 1  ;;  %p179_p3 = scmp.eq.s32.totalorder %s3059_s26, 1 }
   0xa   : > { %p3988_p4 = por %p45_p1, %p44_p0  ;;  %p3060_p5 = scmp.ge.s32.totalorder %s3899_s24, 1 }
   0xb   : > { %p3993_p6 = por %p179_p3, %p44_p0  ;;  %p186_p7 = scmp.lt.s32.totalorder %s3899_s24, 3 }
   0xc   : > { %s197_s7 = sshll.u32 %s5456_s1, 4  ;;  %s3901_s9 = smov [#allocation5]   ;;  %s198_s7 = int_to_ptr.hbm [resolvable:$true] %s197_s7 }
   0xd   : > { %p4001_p8 = pnand %p3060_p5, %p186_p7  ;;  %s199_s10 = sshll.u32 %s3901_s9, 4  ;;  %s200_s10 = int_to_ptr.vmem [resolvable:$true] %s199_s10 }
   0xe   : > { %s214_s14 = sshll.u32 %s5458_s3, 4  ;;  %s5462_s15 = smov 64   ;;  %s215_s14 = int_to_ptr.hbm [resolvable:$true] %s214_s14 }
   0xf   : > { %p3247_p9 = pneg %p4001_p8  ;;  %s5463_s16 = smov 4  }
  0x10   : > { %s3904_s17 = smov [#allocation7]   ;;  %s3905_s19 = smov 128  }
  0x11   : > { %p4009_p10 = pnand %p3247_p9, %p45_p1  ;;  %s216_s18 = sshll.u32 %s3904_s17, 4  ;;  %s217_s18 = int_to_ptr.vmem [resolvable:$true] %s216_s18 }
  0x12   : > { %s3906_s20 = smov 8   ;;  %s228_s30 = sshll.u32 %s5459_s4, 4  ;;  %s229_s30 = int_to_ptr.hbm [resolvable:$true] %s228_s30 }
  0x13   : > { %3250 = dma.hbm_to_vmem [thread:$0]  (!%p4009_p10), %s198_s7, 256, %s200_s10, [#allocation6], %s5462_s15, %s5462_s15, %s5463_s16  }
  0x14   : > { %3253 = dma.hbm_to_vmem [thread:$0]  (!%p4009_p10), %s215_s14, 2048, %s217_s18, [#allocation6], %s3905_s19, %s3905_s19, %s3906_s20  }
  0x15   : > { %s3907_s7 = smov [#allocation8]   ;;  %s4033_s10 = sadd.s32 1, %s3899_s24  }
  0x16   : > { %s230_s9 = sshll.u32 %s3907_s7, 4  ;;  %s28_s12 = ssub.s32 %s3899_s24, %s4033_s10  ;;  %s231_s9 = int_to_ptr.vmem [resolvable:$true] %s230_s9 }
  0x17   : > { %3256 = dma.hbm_to_vmem [thread:$0]  (!%p4009_p10), %s229_s30, 256, %s231_s9, [#allocation9], %s5462_s15, %s5462_s15, %s5463_s16  }
  0x18   : > { %s31_s13 = sadd.s32 1, %s3895_s23  ;;  %p29_p12 = scmp.eq.s32.totalorder %s28_s12, 0 }
  0x19   : > { %p38_p13 = scmp.ne.s32.totalorder %s3895_s23, %s3891_s22  ;;  %p39_p0 = scmp.eq.s32.totalorder %s3899_s24, 0 }
  0x1a   : > { %s4042_s14 = scalar_select %p29_p12, %s3895_s23, %s31_s13  }
  0x1b   : > { %p4046_p3 = por %p173_p2, %p38_p13  ;;  %p3268_p5 = scmp.lt.s32.totalorder %s3899_s24, 2 }
  0x1c   : > { %s247_s11 = sand.u32 1, %s3895_s23   ;;  %s3210_s18 = sshll.u32 %s3899_s24, 6 }
  0x1d   : > { %p40_p7 = por %p39_p0, %p38_p13  ;;  %s3065_s19 = sshll.u32 %s247_s11, 6 }
  0x1e   : > { %s257_s29 = scalar_lea.hbm %s5455_s0, %s3210_s18  ;;  %s251_s7 = scalar_lea.vmem [#allocation2], %s3065_s19 }
  0x1f   : > { %s258_s30 = sshll.u32 %s257_s29, 4  ;;  %s260_s9 = sshll.u32 %s251_s7, 4  ;;  %s259_s30 = int_to_ptr.hbm [resolvable:$true] %s258_s30  ;;  %s261_s9 = int_to_ptr.vmem [resolvable:$true] %s260_s9 }
  0x20   : > { %p4056_p9 = pnand %p3268_p5, %p40_p7  ;;  %s248_s13 = scalar_lea.sflag [#allocation3], %s247_s11 }
  0x21   : > { %s3795_s15 = sshra.s32 %s259_s30, 4  ;;  %s3802_s19 = scalar_lea.hbm %s5455_s0, 128  ;;  %s3796_s15 = int_to_ptr.hbm [resolvable:$true] %s3795_s15 }
  0x22   : > { %s3797_s16 = scalar_lea.hbm %s3796_s15, 64  ;;  %p3799_p10 = pneg %p4056_p9 }
  0x23   : > { %p3798_p2 = scmp.ne.s32.totalorder %s3796_s15, %s3797_s16  ;;  %p3803_p0 = scmp.lt.s32.totalorder %s3796_s15, %s5455_s0 }
  0x24   : > { %p3804_p5 = scmp.lt.s32.totalorder %s3802_s19, %s3797_s16 }
  0x25   : > { %p3800_p12 = pnand %p3799_p10, %p3798_p2 }
  0x26   : > { %p3805_p7 = por %p3804_p5, %p3803_p0 }
  0x27   : > { %p3801_p13 = pneg %p3800_p12 }
  0x29   : > { %p3806_p11 = pnand %p3805_p7, %p3801_p13 }
  0x2b   : > { %3809 = shalt.err (!%p3806_p11)
}
  0x2c   : > { %s5474_s11 = smov 4   ;;  %s5475_s7 = smov 64  }
  0x2d   : > { %3260 = dma.hbm_to_vmem [thread:$0]  (!%p4056_p9), %s259_s30, 1024, %s261_s9, %s248_s13, %s5475_s7, %s5475_s7, %s5474_s11  }
  0x2e   : > { %272 = sbr.rel (%p4001_p8) target bundleno = 2787 (0xae3), region = 44 }
  0x33   : > { %s4076_s18 = sand.u32 1, %s3891_s22  }
  0x34   : > { %s3070_s15 = sshll.u32 %s4076_s18, 6  ;;  %s275_s16 = scalar_lea.sflag [#allocation3], %s4076_s18 }
  0x35   : > { %s278_s20 = scalar_lea.vmem [#allocation2], %s3070_s15 }
  0x36   : > { %3870 = dma.done.wait (%p3988_p4), %s275_s16, 1024  }
  0x37   : > { %3872 = vsyncadd (%p3988_p4), %s275_s16, 4294966272 }
  0x38   : > { %3874 = dma.done.wait (%p45_p1), [#allocation6], 2304  }
  0x39   : > { %3876 = vsyncadd (%p45_p1), [#allocation6], 4294964992 }
  0x3a   : > { %3878 = dma.done.wait (%p45_p1), [#allocation9], 256  }
  0x3b   : > { %3880 = vsyncadd (%p45_p1), [#allocation9], 4294967040  ;;  %v3220_v0 = vld [vmem:[#allocation5 + $0x8] sm:$0xff]  ;;  %v3219_v1 = vld [vmem:[#allocation5] sm:$0xff]  ;;  %vm402_vm0 = vcmask 261120   ;;  %s3908_s30 = smov 96  }
  0x3c   : > { %433 = vmatpush.bf16.msra.mxu0 %v3220_v0  ;;  %3225 = vmatpush.bf16.msra.mxu1 %v3220_v0  ;;  %v3211_v2 = vld [vmem:[%s278_s20] sm:$0xff]  ;;  %v3213_v3 = vld [vmem:[%s278_s20 + $0x10] sm:$0xff]  ;;  %v3212_v6 = vld [vmem:[%s278_s20 + $0x8] sm:$0xff]  ;;  %s3909_s9 = smov 64   ;;  %s3910_s12 = smov 88   ;;  %vm522_vm1 = vcmask 64512  }
  0x3d   : > { %3226 = vmatpush.bf16.msra.mxu2 %v3220_v0  ;;  %3227 = vmatpush.bf16.msra.mxu3 %v3220_v0  ;;  %v3215_v4 = vld [vmem:[%s278_s20 + $0x20] sm:$0xff]  ;;  %v3217_v5 = vld [vmem:[%s278_s20 + $0x30] sm:$0xff]  ;;  %v3214_v7 = vld [vmem:[%s278_s20 + $0x18] sm:$0xff]  ;;  %s3911_s13 = smov 120   ;;  %s3912_s19 = smov 56   ;;  %vm2789_vm2 = vcmask 130048  }
  0x3e   : > { %v3216_v8 = vld [vmem:[%s278_s20 + $0x28] sm:$0xff]  ;;  %v3218_v9 = vld [vmem:[%s278_s20 + $0x38] sm:$0xff]  ;;  %v3447_v12 = vld [vmem:[%s5457_s2] ss:$0 sm:$0xff]  ;;  %s3913_s26 = smov 80   ;;  %s3914_s29 = smov 112  }
  0x3f   : > { %s3915_s11 = smov 48   ;;  %s3916_s7 = smov 104   ;;  %vm2806_vm3 = vcmask 195584  }
  0x40   : > { %434 = vmatpush.bf16.msra.mxu0 %v3219_v1  ;;  %3228 = vmatpush.bf16.msra.mxu1 %v3219_v1  ;;  %s3917_s15 = smov 72   ;;  %s3918_s16 = smov 40  }
  0x41   : > { %3229 = vmatpush.bf16.msra.mxu2 %v3219_v1  ;;  %3230 = vmatpush.bf16.msra.mxu3 %v3219_v1  ;;  %s3919_s20 = smov 16   ;;  %s3920_s27 = smov 8  }
  0x42   : > { %s3921_s8 = smov 24  }
  0x43   : > { %3115 = vmatmul.msk.bf16.vlgmr.msra.gmra.mxu0 %vm402_vm0, %v3211_v2  ;;  %3117 = vmatmul.msk.bf16.vlgmr.msra.gmra.mxu1 %vm402_vm0, %v3213_v3 }
  0x44   : > { %3119 = vmatmul.msk.bf16.vlgmr.msra.gmra.mxu2 %vm402_vm0, %v3215_v4  ;;  %3121 = vmatmul.msk.bf16.vlgmr.msra.gmra.mxu3 %vm402_vm0, %v3217_v5 }
  0x53   : > { %3116 = vmatmul.msk.bf16.gmra.mxu0 %vm402_vm0, %v3212_v6  ;;  %3118 = vmatmul.msk.bf16.gmra.mxu1 %vm402_vm0, %v3214_v7 }
  0x54   : > { %3120 = vmatmul.msk.bf16.gmra.mxu2 %vm402_vm0, %v3216_v8  ;;  %3122 = vmatmul.msk.bf16.gmra.mxu3 %vm402_vm0, %v3218_v9 }
  0xc0   : > { %v436_v10 = vpop.f32.mrf.mxu0  ;;  %v446_v11 = vpop.f32.mrf.mxu1 }
  0xc1   : > { %v437_v13 = vadd.f32 %v3447_v12, %v436_v10  ;;  %v447_v44 = vadd.f32 %v3447_v12, %v446_v11 }
  0xc3   : > { %v476_v18 = vpack.c.bf16 %v437_v13, %v437_v13  ;;  %v480_v57 = vpack.c.bf16 %v447_v44, %v447_v44 }
  0xc5   : > { %v512_v21 = vunpack.c.l.b16 %v476_v18  ;;  %v558_v5 = vunpack.c.l.b16 %v480_v57 }
  0xc7   : > { %v456_v14 = vpop.f32.mrf.mxu2  ;;  %v466_v15 = vpop.f32.mrf.mxu3 }
  0xc8   : > { %v438_v16 = vpop.f32.mrf.mxu0  ;;  %v448_v17 = vpop.f32.mrf.mxu1  ;;  %v467_v32 = vadd.f32 %v3447_v12, %v466_v15  ;;  %v457_v63 = vadd.f32 %v3447_v12, %v456_v14 }
  0xc9   : > { %v439_v19 = vadd.f32 %v3447_v12, %v438_v16  ;;  %v449_v41 = vadd.f32 %v3447_v12, %v448_v17 }
  0xca   : > { %v488_v45 = vpack.c.bf16 %v467_v32, %v467_v32  ;;  %v484_v9 = vpack.c.bf16 %v457_v63, %v457_v63 }
  0xcb   : > { %v477_v20 = vpack.c.bf16 %v439_v19, %v439_v19  ;;  %v481_v52 = vpack.c.bf16 %v449_v41, %v449_v41 }
  0xcc   : > { %v648_v59 = vunpack.c.l.b16 %v488_v45  ;;  %v603_v15 = vunpack.c.l.b16 %v484_v9  ;;  %v494_v9 = vld [vmem:[#allocation7 + $0x10] sm:$0xff] }
  0xcd   : > { %v513_v22 = vunpack.c.l.b16 %v477_v20  ;;  %v559_v3 = vunpack.c.l.b16 %v481_v52 }
  0xcf   : > { %v4103_v23 = vpack.c.b16 %v513_v22, %v512_v21  ;;  %v458_v24 = vpop.f32.mrf.mxu2  ;;  %v468_v25 = vpop.f32.mrf.mxu3  ;;  %v4119_v13 = vpack.c.b16 %v559_v3, %v558_v5 }
  0xd0   : > { %v441_v26 = vpop.f32.mrf.mxu0  ;;  %v451_v27 = vpop.f32.mrf.mxu1  ;;  %v469_v35 = vadd.f32 %v3447_v12, %v468_v25  ;;  %v459_v0 = vadd.f32 %v3447_v12, %v458_v24 }
  0xd1   : > { %518 = vrot.lane.b32.xlu1 %v4103_v23, %s3908_s30  ;;  %v442_v28 = vadd.f32 %v3447_v12, %v441_v26  ;;  %v452_v29 = vadd.f32 %v3447_v12, %v451_v27 }
  0xd2   : > { %v489_v46 = vpack.c.bf16 %v469_v35, %v469_v35  ;;  %v485_v10 = vpack.c.bf16 %v459_v0, %v459_v0 }
  0xd3   : > { %v478_v36 = vpack.c.bf16 %v442_v28, %v442_v28  ;;  %v482_v37 = vpack.c.bf16 %v452_v29, %v452_v29 }
  0xd4   : > { %v649_v60 = vunpack.c.l.b16 %v489_v46  ;;  %v604_v16 = vunpack.c.l.b16 %v485_v10 }
  0xd5   : > { %v514_v47 = vunpack.c.l.b16 %v478_v36  ;;  %v560_v48 = vunpack.c.l.b16 %v482_v37 }
  0xd6   : > { %v4115_v6 = vpack.c.b16 %v649_v60, %v648_v59  ;;  %v4129_v18 = vpack.c.b16 %v604_v16, %v603_v15 }
  0xd7   : > { %v461_v30 = vpop.f32.mrf.mxu2  ;;  %v471_v31 = vpop.f32.mrf.mxu3 }
  0xd8   : > { %v443_v33 = vpop.f32.mrf.mxu0  ;;  %v453_v34 = vpop.f32.mrf.mxu1  ;;  %v462_v40 = vadd.f32 %v3447_v12, %v461_v30  ;;  %v472_v61 = vadd.f32 %v3447_v12, %v471_v31 }
  0xd9   : > { %v444_v38 = vadd.f32 %v3447_v12, %v443_v33  ;;  %v454_v39 = vadd.f32 %v3447_v12, %v453_v34 }
  0xda   : > { %v486_v51 = vpack.c.bf16 %v462_v40, %v462_v40  ;;  %v490_v7 = vpack.c.bf16 %v472_v61, %v472_v61 }
  0xdb   : > { %v479_v42 = vpack.c.bf16 %v444_v38, %v444_v38  ;;  %v483_v43 = vpack.c.bf16 %v454_v39, %v454_v39 }
  0xdc   : > { %v605_v1 = vunpack.c.l.b16 %v486_v51  ;;  %v650_v14 = vunpack.c.l.b16 %v490_v7 }
  0xdd   : > { %v515_v49 = vunpack.c.l.b16 %v479_v42  ;;  %v561_v50 = vunpack.c.l.b16 %v483_v43 }
  0xdf   : > { %v4107_v53 = vpack.c.b16 %v515_v49, %v514_v47  ;;  %v4109_v54 = vpack.c.b16 %v561_v50, %v560_v48  ;;  %v463_v55 = vpop.f32.mrf.mxu2  ;;  %v473_v56 = vpop.f32.mrf.mxu3 }
  0xe0   : > { %v464_v58 = vadd.f32 %v3447_v12, %v463_v55  ;;  %v474_v62 = vadd.f32 %v3447_v12, %v473_v56  ;;  %v492_v56 = vld [vmem:[#allocation7] sm:$0xff] }
  0xe1   : > { %566 = vrot.lane.b32.xlu0 %v4109_v54, %s3908_s30  ;;  %520 = vrot.lane.b32.xlu1 %v4107_v53, %s3908_s30 }
  0xe2   : > { %v487_v2 = vpack.c.bf16 %v464_v58, %v464_v58  ;;  %v491_v8 = vpack.c.bf16 %v474_v62, %v474_v62 }
  0xe4   : > { %v606_v4 = vunpack.c.l.b16 %v487_v2  ;;  %v651_v12 = vunpack.c.l.b16 %v491_v8 }
  0xe6   : > { %v4117_v11 = vpack.c.b16 %v606_v4, %v605_v1  ;;  %v4127_v17 = vpack.c.b16 %v651_v12, %v650_v14  ;;  %v493_v4 = vld [vmem:[#allocation7 + $0x8] sm:$0xff] }
  0xe8   : > { %611 = vrot.lane.b32.xlu2 %v4117_v11, %s3908_s30 }
  0xe9   : > { %564 = vrot.lane.b32.xlu0 %v4119_v13, %s3908_s30  ;;  %654 = vrot.lane.b32.xlu1 %v4115_v6, %s3908_s30 }
  0xf0   : > { %609 = vrot.lane.b32.xlu2 %v4129_v18, %s3908_s30 }
  0xf1   : > { %656 = vrot.lane.b32.xlu0 %v4127_v17, %s3908_s30  ;;  %891 = vrot.lane.b32.xlu1 %v4103_v23, %s3909_s9  ;;  %s3074_s30 = sshll.u32 %s4076_s18, 7 }
  0xf8   : > { %934 = vrot.lane.b32.xlu2 %v4109_v54, %s3909_s9 }
  0xf9   : > { %932 = vrot.lane.b32.xlu0 %v4119_v13, %s3909_s9  ;;  %1090 = vrot.lane.b32.xlu1 %v4109_v54, %s3910_s12 }
 0x100   : > { %1051 = vrot.lane.b32.xlu2 %v4107_v53, %s3910_s12 }
 0x101   : > { %893 = vrot.lane.b32.xlu0 %v4107_v53, %s3909_s9  ;;  %975 = vrot.lane.b32.xlu1 %v4117_v11, %s3909_s9 }
 0x108   : > { %1049 = vrot.lane.b32.xlu2 %v4103_v23, %s3910_s12 }
 0x109   : > { %1045 = vrot.lane.b32.xlu0 %v4103_v23, %s3911_s13  ;;  %1129 = vrot.lane.b32.xlu1 %v4117_v11, %s3910_s12 }
 0x110   : > { %1014 = vrot.lane.b32.xlu2 %v4115_v6, %s3909_s9 }
 0x111   : > { %973 = vrot.lane.b32.xlu0 %v4129_v18, %s3909_s9 }
 0x118   : > { %1016 = vrot.lane.b32.xlu2 %v4127_v17, %s3909_s9  ;;  %s3845_s9 = scalar_lea.hbm %s5461_s6, 256 }
 0x119   : > { %1047 = vrot.lane.b32.xlu0 %v4107_v53, %s3911_s13 }
 0x121   : > { %1088 = vrot.lane.b32.xlu0 %v4119_v13, %s3910_s12 }
 0x142   : > { %v612_v19 = vpop.permute.xlu2 %611 }
 0x143   : > { %v623_v20 = vsel %vm522_vm1, %v612_v19, 0  ;;  %v519_v22 = vpop.permute.xlu1 %518 }
 0x144   : > { %631 = vmatpush.bf16.xpose.msrb.mxu3 %v623_v20  ;;  %v530_v33 = vsel %vm522_vm1, %v519_v22, 0 }
 0x14a   : > { %v610_v21 = vpop.permute.xlu2 %609 }
 0x14b   : > { %v620_v24 = vsel %vm522_vm1, %v610_v21, 0 }
 0x14c   : > { %632 = vmatpush.bf16.xpose.msrb.mxu3 %v620_v24 }
 0x152   : > { %v935_v25 = vpop.permute.xlu2 %934 }
 0x153   : > { %3127 = vmatmul.msk.bf16.vlgmr.msrb.gmra.mxu3 %vm522_vm1, %v4129_v18  ;;  %v567_v26 = vpop.permute.xlu0 %566  ;;  %v521_v27 = vpop.permute.xlu1 %520 }
 0x154   : > { %950 = vmatpush.bf16.msra.mxu3 %v935_v25  ;;  %v533_v28 = vsel %vm522_vm1, %v521_v27, 0  ;;  %v578_v29 = vsel %vm522_vm1, %v567_v26, 0 }
 0x155   : > { %541 = vmatpush.bf16.xpose.msrb.mxu1 %v533_v28  ;;  %586 = vmatpush.bf16.xpose.msrb.mxu2 %v578_v29  ;;  %v495_v29 = vld [vmem:[#allocation7 + $0x18] sm:$0xff] }
 0x15a   : > { %v1052_v30 = vpop.permute.xlu2 %1051 }
 0x15b   : > { %v565_v31 = vpop.permute.xlu0 %564  ;;  %v655_v32 = vpop.permute.xlu1 %654  ;;  %v1063_v42 = vsel %vm522_vm1, %v1052_v30, 0 }
 0x15c   : > { %v575_v34 = vsel %vm522_vm1, %v565_v31, 0  ;;  %v665_v39 = vsel %vm522_vm1, %v655_v32, 0 }
 0x15d   : > { %542 = vmatpush.bf16.xpose.msrb.mxu1 %v530_v33  ;;  %587 = vmatpush.bf16.xpose.msrb.mxu2 %v575_v34 }
 0x162   : > { %v1050_v38 = vpop.permute.xlu2 %1049 }
 0x163   : > { %3128 = vmatmul.msk.bf16.gmra.mxu3 %vm522_vm1, %v4117_v11  ;;  %v657_v35 = vpop.permute.xlu0 %656  ;;  %v892_v36 = vpop.permute.xlu1 %891  ;;  %v1060_v46 = vsel %vm522_vm1, %v1050_v38, 0 }
 0x164   : > { %v668_v37 = vsel %vm522_vm1, %v657_v35, 0  ;;  %3123 = vmatmul.msk.bf16.vlgmr.msrb.gmra.mxu1 %vm522_vm1, %v4103_v23  ;;  %3125 = vmatmul.msk.bf16.vlgmr.msrb.gmra.mxu2 %vm522_vm1, %v4119_v13 }
 0x165   : > { %676 = vmatpush.bf16.xpose.msra.mxu1 %v668_v37 }
 0x16a   : > { %v1015_v43 = vpop.permute.xlu2 %1014 }
 0x16b   : > { %v933_v40 = vpop.permute.xlu0 %932  ;;  %v1091_v41 = vpop.permute.xlu1 %1090 }
 0x16c   : > { %951 = vmatpush.bf16.msra.mxu3 %v933_v40  ;;  %v1102_v50 = vsel %vm522_vm1, %v1091_v41, 0 }
 0x16d   : > { %677 = vmatpush.bf16.xpose.msra.mxu1 %v665_v39 }
 0x170   : > { %1071 = vmatpush.bf16.xpose.msrb.mxu3 %v1063_v42 }
 0x172   : > { %v1017_v47 = vpop.permute.xlu2 %1016 }
 0x173   : > { %v894_v44 = vpop.permute.xlu0 %893  ;;  %v976_v45 = vpop.permute.xlu1 %975 }
 0x174   : > { %3124 = vmatmul.msk.bf16.gmra.mxu1 %vm522_vm1, %v4107_v53  ;;  %3126 = vmatmul.msk.bf16.gmra.mxu2 %vm522_vm1, %v4109_v54 }
 0x175   : > { %909 = vmatpush.bf16.msra.mxu2 %v894_v44  ;;  %991 = vmatpush.bf16.msrb.mxu1 %v976_v45 }
 0x178   : > { %1072 = vmatpush.bf16.xpose.msrb.mxu3 %v1060_v46 }
 0x179   : > { %910 = vmatpush.bf16.msra.mxu2 %v892_v36 }
 0x17b   : > { %v4179_v48 = vpop.permute.xlu0 %1045 }
 0x17d   : > { %1032 = vmatpush.bf16.msrb.mxu2 %v1017_v47 }
 0x181   : > { %1033 = vmatpush.bf16.msrb.mxu2 %v1015_v43 }
 0x183   : > { %v974_v49 = vpop.permute.xlu0 %973 }
 0x184   : > { %3129 = vmatmul.msk.bf16.vlgmr.msra.gmra.mxu1 %vm522_vm1, %v4115_v6 }
 0x185   : > { %992 = vmatpush.bf16.msrb.mxu1 %v974_v49 }
 0x189   : > { %1110 = vmatpush.bf16.xpose.msra.mxu1 %v1102_v50 }
 0x18b   : > { %v4184_v51 = vpop.permute.xlu0 %1047 }
 0x193   : > { %v1089_v52 = vpop.permute.xlu0 %1088 }
 0x194   : > { %3130 = vmatmul.msk.bf16.gmra.mxu1 %vm522_vm1, %v4127_v17  ;;  %v1099_v55 = vsel %vm522_vm1, %v1089_v52, 0 }
 0x195   : > { %1111 = vmatpush.bf16.xpose.msra.mxu1 %v1099_v55 }
 0x1d6   : > { %v634_v57 = vpop.f32.mrf.mxu3 }
 0x1d7   : > { %v4189_v58 = vadd.f32 %v634_v57, %v492_v56 }
 0x1d9   : > { %v713_v59 = vsel %vm402_vm0, %v4189_v58, -inf }
 0x1da   : > { %714 = vmax.xlane.f32.xlu0 %v713_v59 }
 0x1de   : > { %v636_v1 = vpop.f32.mrf.mxu3 }
 0x1df   : > { %v4215_v22 = vadd.f32 %v636_v1, %v493_v4 }
 0x1e1   : > { %v544_v60 = vpop.f32.mrf.mxu1  ;;  %v716_v28 = vsel %vm402_vm0, %v4215_v22, -inf }
 0x1e2   : > { %v4193_v61 = vadd.f32 %v544_v60, %v492_v56 }
 0x1e4   : > { %v689_v62 = vsel %vm402_vm0, %v4193_v61, -inf }
 0x1e5   : > { %690 = vmax.xlane.f32.xlu1 %v689_v62 }
 0x1e6   : > { %v639_v16 = vpop.f32.mrf.mxu3 }
 0x1e7   : > { %v589_v63 = vpop.f32.mrf.mxu2  ;;  %v4213_v20 = vadd.f32 %v639_v16, %v494_v9 }
 0x1e8   : > { %v4197_v0 = vadd.f32 %v589_v63, %v492_v56 }
 0x1e9   : > { %v546_v2 = vpop.f32.mrf.mxu1  ;;  %v719_v26 = vsel %vm402_vm0, %v4213_v20, -inf }
 0x1ea   : > { %v701_v3 = vsel %vm402_vm0, %v4197_v0, -inf  ;;  %v4201_v5 = vadd.f32 %v546_v2, %v493_v4 }
 0x1eb   : > { %702 = vmax.xlane.f32.xlu2 %v701_v3 }
 0x1ec   : > { %v692_v15 = vsel %vm402_vm0, %v4201_v5, -inf }
 0x1ee   : > { %v641_v30 = vpop.f32.mrf.mxu3 }
 0x1ef   : > { %v591_v7 = vpop.f32.mrf.mxu2  ;;  %v4227_v33 = vadd.f32 %v641_v30, %v495_v29 }
 0x1f0   : > { %v4203_v8 = vadd.f32 %v591_v7, %v493_v4 }
 0x1f1   : > { %v549_v10 = vpop.f32.mrf.mxu1  ;;  %v722_v38 = vsel %vm402_vm0, %v4227_v33, -inf }
 0x1f2   : > { %v4205_v14 = vadd.f32 %v549_v10, %v494_v9  ;;  %v704_v12 = vsel %vm402_vm0, %v4203_v8, -inf }
 0x1f3   : > { %705 = vmax.xlane.f32.xlu0 %v704_v12  ;;  %693 = vmax.xlane.f32.xlu2 %v692_v15 }
 0x1f4   : > { %v695_v19 = vsel %vm402_vm0, %v4205_v14, -inf }
 0x1f5   : > { %696 = vmax.xlane.f32.xlu1 %v695_v19 }
 0x1f7   : > { %v594_v21 = vpop.f32.mrf.mxu2 }
 0x1f8   : > { %v4217_v24 = vadd.f32 %v594_v21, %v494_v9 }
 0x1f9   : > { %v551_v25 = vpop.f32.mrf.mxu1 }
 0x1fa   : > { %v707_v27 = vsel %vm402_vm0, %v4217_v24, -inf  ;;  %v4225_v31 = vadd.f32 %v551_v25, %v495_v29 }
 0x1fb   : > { %720 = vmax.xlane.f32.xlu0 %v719_v26  ;;  %708 = vmax.xlane.f32.xlu2 %v707_v27 }
 0x1fc   : > { %v698_v37 = vsel %vm402_vm0, %v4225_v31, -inf }
 0x1fd   : > { %717 = vmax.xlane.f32.xlu1 %v716_v28 }
 0x1ff   : > { %v596_v32 = vpop.f32.mrf.mxu2 }
 0x200   : > { %v4229_v34 = vadd.f32 %v596_v32, %v495_v29 }
 0x201   : > { %v679_v35 = vpop.f32.mrf.mxu1 }
 0x202   : > { %v710_v36 = vsel %vm402_vm0, %v4229_v34, -inf  ;;  %v4237_v39 = vadd.f32 %v679_v35, %v492_v56  ;;  %v4258_v56 = vpop.permute.xlu1 %1129 }
 0x203   : > { %711 = vmax.xlane.f32.xlu0 %v710_v36  ;;  %699 = vmax.xlane.f32.xlu2 %v698_v37 }
 0x204   : > { %v725_v42 = vsel %vm402_vm0, %v4237_v39, -inf }
 0x205   : > { %723 = vmax.xlane.f32.xlu1 %v722_v38 }
 0x209   : > { %v681_v40 = vpop.f32.mrf.mxu1 }
 0x20a   : > { %v4239_v41 = vadd.f32 %v681_v40, %v493_v4 }
 0x20b   : > { %726 = vmax.xlane.f32.xlu2 %v725_v42 }
 0x20c   : > { %v728_v43 = vsel %vm402_vm0, %v4239_v41, -inf }
 0x20d   : > { %729 = vmax.xlane.f32.xlu0 %v728_v43 }
 0x211   : > { %v684_v44 = vpop.f32.mrf.mxu1 }
 0x212   : > { %v4245_v45 = vadd.f32 %v684_v44, %v494_v9 }
 0x214   : > { %v731_v46 = vsel %vm402_vm0, %v4245_v45, -inf }
 0x215   : > { %732 = vmax.xlane.f32.xlu0 %v731_v46 }
 0x219   : > { %v686_v47 = vpop.f32.mrf.mxu1 }
 0x21a   : > { %v4253_v49 = vadd.f32 %v686_v47, %v495_v29 }
 0x21c   : > { %v734_v50 = vsel %vm402_vm0, %v4253_v49, -inf }
 0x21e   : > { %1127 = vrot.lane.b32.xlu1 %v4129_v18, %s3910_s12 }
 0x229   : > { %1084 = vrot.lane.b32.xlu0 %v4119_v13, %s3911_s13 }
 0x248   : > { %735 = vmax.xlane.f32.xlu1 %v734_v50 }
 0x24d   : > { %v715_v52 = vpop.xlane.xlu0 %714 }
 0x24e   : > { %v745_v55 = vsub.f32 %v4189_v58, %v715_v52 }
 0x250   : > { %v769_v57 = vmul.f32 1.442695, %v745_v55 }
 0x252   : > { %3449 = vpow2.f32 %v769_v57 }
 0x258   : > { %v4260_v59 = vpop.eup %3449  ;;  %v691_v60 = vpop.xlane.xlu1 %690 }
 0x259   : > { %v737_v62 = vsub.f32 %v4193_v61, %v691_v60  ;;  %v809_v63 = vsel %vm402_vm0, %v4260_v59, 0.0 }
 0x25a   : > { %810 = vadd.xlane.f32.xlu0 %v809_v63 }
 0x25b   : > { %v753_v1 = vmul.f32 1.442695, %v737_v62 }
 0x25d   : > { %3451 = vpow2.f32 %v753_v1 }
 0x25e   : > { %v703_v2 = vpop.xlane.xlu2 %702 }
 0x25f   : > { %v741_v3 = vsub.f32 %v4197_v0, %v703_v2 }
 0x261   : > { %v761_v4 = vmul.f32 1.442695, %v741_v3 }
 0x263   : > { %v4266_v58 = vpop.eup %3451  ;;  %3453 = vpow2.f32 %v761_v4 }
 0x264   : > { %v785_v7 = vsel %vm402_vm0, %v4266_v58, 0.0 }
 0x265   : > { %786 = vadd.xlane.f32.xlu1 %v785_v7 }
 0x266   : > { %v706_v9 = vpop.xlane.xlu0 %705  ;;  %v694_v10 = vpop.xlane.xlu2 %693 }
 0x267   : > { %v742_v61 = vsub.f32 %v4203_v8, %v706_v9  ;;  %v738_v12 = vsub.f32 %v4201_v5, %v694_v10 }
 0x268   : > { %v697_v15 = vpop.xlane.xlu1 %696 }
 0x269   : > { %v4272_v16 = vpop.eup %3453  ;;  %v763_v19 = vmul.f32 1.442695, %v742_v61  ;;  %v755_v21 = vmul.f32 1.442695, %v738_v12  ;;  %v739_v0 = vsub.f32 %v4205_v14, %v697_v15 }
 0x26a   : > { %v797_v26 = vsel %vm402_vm0, %v4272_v16, 0.0 }
 0x26b   : > { %3455 = vpow2.f32 %v763_v19  ;;  %v757_v25 = vmul.f32 1.442695, %v739_v0 }
 0x26c   : > { %3457 = vpow2.f32 %v755_v21 }
 0x26d   : > { %3459 = vpow2.f32 %v757_v25  ;;  %798 = vadd.xlane.f32.xlu1 %v797_v26 }
 0x26e   : > { %v709_v27 = vpop.xlane.xlu2 %708  ;;  %v721_v38 = vpop.xlane.xlu0 %720 }
 0x26f   : > { %v743_v8 = vsub.f32 %v4217_v24, %v709_v27  ;;  %v747_v44 = vsub.f32 %v4213_v20, %v721_v38 }
 0x270   : > { %v718_v28 = vpop.xlane.xlu1 %717 }
 0x271   : > { %v4278_v5 = vpop.eup %3455  ;;  %v765_v29 = vmul.f32 1.442695, %v743_v8  ;;  %v746_v30 = vsub.f32 %v4215_v22, %v718_v28  ;;  %v773_v52 = vmul.f32 1.442695, %v747_v44 }
 0x272   : > { %v4281_v32 = vpop.eup %3457  ;;  %v800_v14 = vsel %vm402_vm0, %v4278_v5, 0.0 }
 0x273   : > { %v4285_v35 = vpop.eup %3459  ;;  %v771_v36 = vmul.f32 1.442695, %v746_v30  ;;  %801 = vadd.xlane.f32.xlu2 %v800_v14  ;;  %3461 = vpow2.f32 %v765_v29  ;;  %v788_v37 = vsel %vm402_vm0, %v4281_v32, 0.0 }
 0x274   : > { %v791_v24 = vsel %vm402_vm0, %v4285_v35, 0.0 }
 0x275   : > { %3463 = vpow2.f32 %v771_v36  ;;  %789 = vadd.xlane.f32.xlu1 %v788_v37  ;;  %792 = vadd.xlane.f32.xlu0 %v791_v24 }
 0x276   : > { %v700_v22 = vpop.xlane.xlu2 %699 }
 0x277   : > { %v740_v40 = vsub.f32 %v4225_v31, %v700_v22  ;;  %v712_v31 = vpop.xlane.xlu0 %711 }
 0x278   : > { %v724_v55 = vpop.xlane.xlu1 %723  ;;  %v744_v1 = vsub.f32 %v4229_v34, %v712_v31 }
 0x279   : > { %v759_v42 = vmul.f32 1.442695, %v740_v40  ;;  %v4292_v43 = vpop.eup %3461  ;;  %v748_v62 = vsub.f32 %v4227_v33, %v724_v55 }
 0x27a   : > { %v803_v47 = vsel %vm402_vm0, %v4292_v43, 0.0  ;;  %v767_v4 = vmul.f32 1.442695, %v744_v1 }
 0x27b   : > { %v4295_v46 = vpop.eup %3463  ;;  %3465 = vpow2.f32 %v759_v42  ;;  %804 = vadd.xlane.f32.xlu2 %v803_v47  ;;  %v775_v3 = vmul.f32 1.442695, %v748_v62 }
 0x27c   : > { %v812_v50 = vsel %vm402_vm0, %v4295_v46, 0.0  ;;  %3467 = vpow2.f32 %v773_v52 }
 0x27d   : > { %813 = vadd.xlane.f32.xlu0 %v812_v50 }
 0x27e   : > { %v727_v57 = vpop.xlane.xlu2 %726 }
 0x27f   : > { %v749_v60 = vsub.f32 %v4237_v39, %v727_v57 }
 0x280   : > { %v730_v15 = vpop.xlane.xlu0 %729 }
 0x281   : > { %v777_v20 = vmul.f32 1.442695, %v749_v60  ;;  %v4303_v63 = vpop.eup %3465  ;;  %v750_v19 = vsub.f32 %v4239_v41, %v730_v15 }
 0x282   : > { %v794_v2 = vsel %vm402_vm0, %v4303_v63, 0.0  ;;  %v4308_v7 = vpop.eup %3467 }
 0x283   : > { %3469 = vpow2.f32 %v777_v20  ;;  %795 = vadd.xlane.f32.xlu1 %v794_v2  ;;  %v815_v39 = vsel %vm402_vm0, %v4308_v7, 0.0  ;;  %v779_v21 = vmul.f32 1.442695, %v750_v19 }
 0x284   : > { %3471 = vpow2.f32 %v775_v3 }
 0x285   : > { %3473 = vpow2.f32 %v767_v4 }
 0x286   : > { %3475 = vpow2.f32 %v779_v21 }
 0x288   : > { %v733_v26 = vpop.xlane.xlu0 %732 }
 0x289   : > { %v4310_v9 = vpop.eup %3469  ;;  %v751_v14 = vsub.f32 %v4245_v45, %v733_v26 }
 0x28a   : > { %v821_v33 = vsel %vm402_vm0, %v4310_v9, 0.0  ;;  %v4316_v34 = vpop.eup %3471 }
 0x28b   : > { %822 = vadd.xlane.f32.xlu0 %v821_v33  ;;  %816 = vadd.xlane.f32.xlu1 %v815_v39  ;;  %v4318_v10 = vpop.eup %3473  ;;  %v818_v61 = vsel %vm402_vm0, %v4316_v34, 0.0  ;;  %v781_v22 = vmul.f32 1.442695, %v751_v14 }
 0x28c   : > { %v806_v12 = vsel %vm402_vm0, %v4318_v10, 0.0  ;;  %v4337_v0 = vpop.eup %3475 }
 0x28d   : > { %v824_v25 = vsel %vm402_vm0, %v4337_v0, 0.0 }
 0x290   : > { %v4349_v41 = vpop.permute.xlu1 %1127 }
 0x293   : > { %819 = vadd.xlane.f32.xlu0 %v818_v61  ;;  %1086 = vrot.lane.b32.xlu2 %v4109_v54, %s3911_s13 }
 0x294   : > { %807 = vadd.xlane.f32.xlu1 %v806_v12 }
 0x29b   : > { %v4357_v8 = vpop.permute.xlu0 %1084 }
 0x2a7   : > { %1123 = vrot.lane.b32.xlu0 %v4129_v18, %s3911_s13 }
 0x2ad   : > { %1125 = vrot.lane.b32.xlu1 %v4117_v11, %s3911_s13 }
 0x2af   : > { %1168 = vrot.lane.b32.xlu0 %v4127_v17, %s3910_s12 }
 0x2b5   : > { %1166 = vrot.lane.b32.xlu1 %v4115_v6, %s3910_s12 }
 0x2b7   : > { %1162 = vrot.lane.b32.xlu0 %v4115_v6, %s3911_s13 }
 0x2bb   : > { %v736_v27 = vpop.xlane.xlu1 %735 }
 0x2bc   : > { %825 = vadd.xlane.f32.xlu2 %v824_v25  ;;  %v752_v44 = vsub.f32 %v4253_v49, %v736_v27 }
 0x2bd   : > { %1164 = vrot.lane.b32.xlu1 %v4127_v17, %s3911_s13  ;;  %s5335_s13 = scalar_lea.vmem [#allocation10], %s3074_s30 }
 0x2be   : > { %v783_v55 = vmul.f32 1.442695, %v752_v44 }
 0x2bf   : > { %1405 = vrot.lane.b32.xlu0 %v4107_v53, %s3912_s19 }
 0x2c5   : > { %1563 = vrot.lane.b32.xlu1 %v4107_v53, %s3913_s26 }
 0x2c7   : > { %1561 = vrot.lane.b32.xlu0 %v4103_v23, %s3913_s26 }
 0x2cd   : > { %1446 = vrot.lane.b32.xlu1 %v4109_v54, %s3912_s19  ;;  %v811_v29 = vpop.xlane.xlu0 %810 }
 0x2cf   : > { %1444 = vrot.lane.b32.xlu0 %v4119_v13, %s3912_s19 }
 0x2d4   : > { %1403 = vrot.lane.b32.xlu2 %v4103_v23, %s3912_s19 }
 0x2d8   : > { %v787_v28 = vpop.xlane.xlu1 %786 }
 0x2e0   : > { %v799_v30 = vpop.xlane.xlu1 %798 }
 0x2e1   : > { %3477 = vrcp.f32 %v799_v30 }
 0x2e2   : > { %3479 = vrcp.f32 %v787_v28 }
 0x2e6   : > { %v802_v36 = vpop.xlane.xlu2 %801 }
 0x2e7   : > { %v3478_v37 = vpop.eup %3477  ;;  %3481 = vrcp.f32 %v802_v36 }
 0x2e8   : > { %v793_v24 = vpop.xlane.xlu0 %792  ;;  %v790_v38 = vpop.xlane.xlu1 %789  ;;  %v853_v42 = vmul.f32 %v3478_v37, %v4272_v16 }
 0x2e9   : > { %v3480_v40 = vpop.eup %3479  ;;  %3483 = vrcp.f32 %v790_v38  ;;  %v1138_v38 = vsel %vm522_vm1, %v4349_v41, 0 }
 0x2ea   : > { %3485 = vrcp.f32 %v811_v29  ;;  %v849_v50 = vmul.f32 %v3480_v40, %v4266_v58  ;;  %v869_v52 = vpack.c.bf16 %v853_v42, %v853_v42 }
 0x2eb   : > { %3487 = vpow2.f32 %v781_v22 }
 0x2ec   : > { %v865_v20 = vpack.c.bf16 %v849_v50, %v849_v50  ;;  %v926_v16 = vunpack.c.l.b16 %v869_v52 }
 0x2ed   : > { %v3482_v47 = vpop.eup %3481 }
 0x2ee   : > { %v854_v45 = vmul.f32 %v3482_v47, %v4278_v5  ;;  %v885_v5 = vunpack.c.l.b16 %v865_v20  ;;  %v805_v37 = vpop.xlane.xlu2 %804 }
 0x2ef   : > { %v3484_v57 = vpop.eup %3483 }
 0x2f0   : > { %v870_v31 = vpack.c.bf16 %v854_v45, %v854_v45  ;;  %v814_v60 = vpop.xlane.xlu0 %813  ;;  %v3486_v62 = vpop.eup %3485  ;;  %v850_v1 = vmul.f32 %v3484_v57, %v4281_v32 }
 0x2f1   : > { %3489 = vrcp.f32 %v814_v60  ;;  %v4365_v49 = vpop.eup %3487  ;;  %v857_v58 = vmul.f32 %v3486_v62, %v4260_v59  ;;  %v1141_v59 = vsel %vm522_vm1, %v4258_v56, 0 }
 0x2f2   : > { %v927_v2 = vunpack.c.l.b16 %v870_v31  ;;  %3491 = vpow2.f32 %v783_v55  ;;  %v866_v3 = vpack.c.bf16 %v850_v1, %v850_v1  ;;  %v827_v39 = vsel %vm402_vm0, %v4365_v49, 0.0 }
 0x2f3   : > { %3493 = vrcp.f32 %v793_v24  ;;  %v873_v15 = vpack.c.bf16 %v857_v58, %v857_v58 }
 0x2f4   : > { %v930_v4 = vpack.c.b16 %v927_v2, %v926_v16  ;;  %v886_v33 = vunpack.c.l.b16 %v866_v3 }
 0x2f5   : > { %v967_v27 = vunpack.c.l.b16 %v873_v15 }
 0x2f6   : > { %3133 = vmatmul.msk.bf16.vlgmr.msra.gmra.mxu3 %vm402_vm0, %v930_v4  ;;  %v889_v32 = vpack.c.b16 %v886_v33, %v885_v5  ;;  %v796_v12 = vpop.xlane.xlu1 %795 }
 0x2f7   : > { %v3490_v61 = vpop.eup %3489  ;;  %828 = vadd.xlane.f32.xlu1 %v827_v39  ;;  %3495 = vrcp.f32 %v796_v12 }
 0x2f8   : > { %v858_v19 = vmul.f32 %v3490_v61, %v4295_v46  ;;  %v4372_v21 = vpop.eup %3491  ;;  %3131 = vmatmul.msk.bf16.vlgmr.msra.gmra.mxu2 %vm402_vm0, %v889_v32  ;;  %v1087_v61 = vpop.permute.xlu2 %1086 }
 0x2f9   : > { %v3494_v25 = vpop.eup %3493  ;;  %1149 = vmatpush.bf16.xpose.msra.mxu2 %v1141_v59  ;;  %v830_v29 = vsel %vm402_vm0, %v4372_v21, 0.0 }
 0x2fa   : > { %v874_v26 = vpack.c.bf16 %v858_v19, %v858_v19  ;;  %v851_v30 = vmul.f32 %v3494_v25, %v4285_v35 }
 0x2fc   : > { %v968_v28 = vunpack.c.l.b16 %v874_v26  ;;  %v867_v22 = vpack.c.bf16 %v851_v30, %v851_v30 }
 0x2fd   : > { %v3496_v14 = vpop.eup %3495  ;;  %831 = vadd.xlane.f32.xlu2 %v830_v29 }
 0x2fe   : > { %v971_v46 = vpack.c.b16 %v968_v28, %v967_v27  ;;  %v823_v36 = vpop.xlane.xlu0 %822  ;;  %v817_v24 = vpop.xlane.xlu1 %816  ;;  %v852_v56 = vmul.f32 %v3496_v14, %v4303_v63  ;;  %v887_v35 = vunpack.c.l.b16 %v867_v22 }
 0x2ff   : > { %3497 = vrcp.f32 %v817_v24 }
 0x300   : > { %3135 = vmatmul.msk.bf16.vlgmr.msrb.gmra.mxu1 %vm402_vm0, %v971_v46  ;;  %v868_v40 = vpack.c.bf16 %v852_v56, %v852_v56  ;;  %3499 = vrcp.f32 %v805_v37 }
 0x301   : > { %1150 = vmatpush.bf16.xpose.msra.mxu2 %v1138_v38 }
 0x302   : > { %v888_v42 = vunpack.c.l.b16 %v868_v40 }
 0x304   : > { %v890_v52 = vpack.c.b16 %v888_v42, %v887_v35 }
 0x305   : > { %v3498_v47 = vpop.eup %3497 }
 0x306   : > { %v820_v44 = vpop.xlane.xlu0 %819  ;;  %v3500_v45 = vpop.eup %3499  ;;  %v859_v63 = vmul.f32 %v3498_v47, %v4308_v7 }
 0x307   : > { %3501 = vrcp.f32 %v820_v44  ;;  %v808_v50 = vpop.xlane.xlu1 %807  ;;  %v855_v55 = vmul.f32 %v3500_v45, %v4292_v43 }
 0x308   : > { %3503 = vrcp.f32 %v808_v50  ;;  %3132 = vmatmul.msk.bf16.gmra.mxu2 %vm402_vm0, %v890_v52  ;;  %v875_v60 = vpack.c.bf16 %v859_v63, %v859_v63 }
 0x309   : > { %v871_v20 = vpack.c.bf16 %v855_v55, %v855_v55  ;;  %3505 = vrcp.f32 %v823_v36 }
 0x30a   : > { %v969_v2 = vunpack.c.l.b16 %v875_v60 }
 0x30b   : > { %v928_v58 = vunpack.c.l.b16 %v871_v20 }
 0x30d   : > { %v3502_v41 = vpop.eup %3501 }
 0x30e   : > { %v3504_v57 = vpop.eup %3503  ;;  %v860_v31 = vmul.f32 %v3502_v41, %v4316_v34 }
 0x30f   : > { %v856_v62 = vmul.f32 %v3504_v57, %v4318_v10  ;;  %v3506_v59 = vpop.eup %3505 }
 0x310   : > { %1487 = vrot.lane.b32.xlu1 %v4117_v11, %s3912_s19  ;;  %v876_v1 = vpack.c.bf16 %v860_v31, %v860_v31  ;;  %v861_v26 = vmul.f32 %v3506_v59, %v4310_v9 }
 0x311   : > { %v872_v16 = vpack.c.bf16 %v856_v62, %v856_v62 }
 0x312   : > { %v970_v3 = vunpack.c.l.b16 %v876_v1  ;;  %v877_v27 = vpack.c.bf16 %v861_v26, %v861_v26  ;;  %v496_v1 = vld [vmem:[#allocation7 + $0x20] sm:$0xff] }
 0x313   : > { %v929_v4 = vunpack.c.l.b16 %v872_v16 }
 0x314   : > { %v972_v7 = vpack.c.b16 %v970_v3, %v969_v2  ;;  %v1008_v36 = vunpack.c.l.b16 %v877_v27 }
 0x315   : > { %v931_v5 = vpack.c.b16 %v929_v4, %v928_v58  ;;  %1557 = vrot.lane.b32.xlu2 %v4103_v23, %s3914_s29  ;;  %v497_v4 = vld [vmem:[#allocation7 + $0x28] sm:$0xff] }
 0x316   : > { %3136 = vmatmul.msk.bf16.gmra.mxu1 %vm402_vm0, %v972_v7 }
 0x317   : > { %3134 = vmatmul.msk.bf16.gmra.mxu3 %vm402_vm0, %v931_v5 }
 0x319   : > { %v4395_v43 = vpop.permute.xlu0 %1123 }
 0x31d   : > { %1485 = vrot.lane.b32.xlu2 %v4129_v18, %s3912_s19 }
 0x31f   : > { %v4399_v34 = vpop.permute.xlu1 %1125 }
 0x321   : > { %v1169_v10 = vpop.permute.xlu0 %1168 }
 0x322   : > { %v1180_v33 = vsel %vm522_vm1, %v1169_v10, 0 }
 0x323   : > { %1188 = vmatpush.bf16.xpose.msra.mxu3 %v1180_v33 }
 0x326   : > { %3141 = vmatmul.msk.bf16.vlgmr.msra.gmra.mxu1 %vm522_vm1, %v4357_v8 }
 0x327   : > { %3139 = vmatmul.msk.bf16.vlgmr.msrb.gmra.mxu3 %vm522_vm1, %v4179_v48  ;;  %v1167_v39 = vpop.permute.xlu1 %1166 }
 0x328   : > { %v1177_v12 = vsel %vm522_vm1, %v1167_v39, 0 }
 0x329   : > { %v1163_v32 = vpop.permute.xlu0 %1162 }
 0x32b   : > { %1189 = vmatpush.bf16.xpose.msra.mxu3 %v1177_v12  ;;  %v498_v12 = vld [vmem:[#allocation7 + $0x30] sm:$0xff] }
 0x32f   : > { %v1165_v15 = vpop.permute.xlu1 %1164  ;;  %v826_v19 = vpop.xlane.xlu2 %825 }
 0x330   : > { %3507 = vrcp.f32 %v826_v19 }
 0x331   : > { %v1406_v25 = vpop.permute.xlu0 %1405 }
 0x332   : > { %1421 = vmatpush.bf16.msrb.mxu0 %v1406_v25 }
 0x336   : > { %3142 = vmatmul.msk.bf16.gmra.mxu1 %vm522_vm1, %v1087_v61  ;;  %v3508_v8 = vpop.eup %3507 }
 0x337   : > { %3140 = vmatmul.msk.bf16.gmra.mxu3 %vm522_vm1, %v4184_v51  ;;  %v1564_v48 = vpop.permute.xlu1 %1563  ;;  %v862_v28 = vmul.f32 %v3508_v8, %v4337_v0  ;;  %v1404_v30 = vpop.permute.xlu2 %1403  ;;  %v499_v8 = vld [vmem:[#allocation7 + $0x38] sm:$0xff] }
 0x338   : > { %v1575_v29 = vsel %vm522_vm1, %v1564_v48, 0  ;;  %1422 = vmatpush.bf16.msrb.mxu0 %v1404_v30 }
 0x339   : > { %v1562_v14 = vpop.permute.xlu0 %1561  ;;  %v878_v46 = vpack.c.bf16 %v862_v28, %v862_v28 }
 0x33a   : > { %v1572_v51 = vsel %vm522_vm1, %v1562_v14, 0 }
 0x33b   : > { %v1009_v37 = vunpack.c.l.b16 %v878_v46 }
 0x33c   : > { %1583 = vmatpush.bf16.xpose.msra.mxu0 %v1575_v29 }
 0x33d   : > { %v1012_v9 = vpack.c.b16 %v1009_v37, %v1008_v36 }
 0x33f   : > { %v1447_v24 = vpop.permute.xlu1 %1446  ;;  %3137 = vmatmul.msk.bf16.vlgmr.msrb.gmra.mxu2 %vm402_vm0, %v1012_v9 }
 0x340   : > { %1462 = vmatpush.bf16.msrb.mxu1 %v1447_v24 }
 0x341   : > { %v1445_v56 = vpop.permute.xlu0 %1444 }
 0x344   : > { %1584 = vmatpush.bf16.xpose.msra.mxu0 %v1572_v51  ;;  %1463 = vmatpush.bf16.msrb.mxu1 %v1445_v56 }
 0x347   : > { %3145 = vmatmul.msk.bf16.vlgmr.msra.gmra.mxu3 %vm522_vm1, %v1163_v32 }
 0x357   : > { %3146 = vmatmul.msk.bf16.gmra.mxu3 %vm522_vm1, %v1165_v15 }
 0x36a   : > { %v829_v0 = vpop.xlane.xlu1 %828 }
 0x36b   : > { %3509 = vrcp.f32 %v829_v0 }
 0x370   : > { %v832_v38 = vpop.xlane.xlu2 %831 }
 0x371   : > { %v3510_v22 = vpop.eup %3509  ;;  %3511 = vrcp.f32 %v832_v38 }
 0x372   : > { %v863_v40 = vmul.f32 %v3510_v22, %v4365_v49 }
 0x374   : > { %v879_v44 = vpack.c.bf16 %v863_v40, %v863_v40 }
 0x376   : > { %v1010_v52 = vunpack.c.l.b16 %v879_v44 }
 0x377   : > { %v3512_v42 = vpop.eup %3511 }
 0x378   : > { %v864_v35 = vmul.f32 %v3512_v42, %v4372_v21  ;;  %v4419_v50 = vpop.permute.xlu2 %1557 }
 0x379   : > { %v4424_v31 = vpop.f32.mrf.mxu3 }
 0x37a   : > { %v880_v47 = vpack.c.bf16 %v864_v35, %v864_v35  ;;  %5477 = vst [vmem:[#allocation16_spill] sm:$0xff] %v4424_v31 }
 0x37b   : > { %v4469_v46 = vpop.f32.mrf.mxu2 }
 0x37c   : > { %v1011_v45 = vunpack.c.l.b16 %v880_v47 }
 0x37d   : > { %v4421_v55 = vpop.f32.mrf.mxu1 }
 0x37e   : > { %v1013_v63 = vpack.c.b16 %v1011_v45, %v1010_v52  ;;  %5476 = vst [vmem:[#allocation15_spill] sm:$0xff] %v4421_v55 }
 0x380   : > { %3138 = vmatmul.msk.bf16.gmra.mxu2 %vm402_vm0, %v1013_v63  ;;  %v1486_v57 = vpop.permute.xlu2 %1485 }
 0x381   : > { %v4430_v21 = vpop.f32.mrf.mxu3 }
 0x382   : > { %v1488_v41 = vpop.permute.xlu1 %1487  ;;  %5479 = vst [vmem:[#allocation18_spill] sm:$0xff] %v4430_v21 }
 0x383   : > { %1503 = vmatpush.bf16.msrb.mxu2 %v1488_v41  ;;  %v4473_v37 = vpop.f32.mrf.mxu2 }
 0x385   : > { %v4426_v49 = vpop.f32.mrf.mxu1 }
 0x386   : > { %5478 = vst [vmem:[#allocation17_spill] sm:$0xff] %v4426_v49 }
 0x387   : > { %1504 = vmatpush.bf16.msrb.mxu2 %v1486_v57 }
 0x38b   : > { %v4477_v9 = vpop.f32.mrf.mxu2 }
 0x38c   : > { %5484 = vst [vmem:[#allocation23_spill] sm:$0xff] %v4477_v9 }
 0x390   : > { %3143 = vmatmul.msk.bf16.vlgmr.msra.gmra.mxu2 %vm522_vm1, %v4395_v43 }
 0x393   : > { %v4432_v60 = vpop.f32.mrf.mxu1  ;;  %v4479_v24 = vpop.f32.mrf.mxu2 }
 0x394   : > { %5480 = vst [vmem:[#allocation19_spill] sm:$0xff] %v4432_v60 }
 0x395   : > { %5485 = vst [vmem:[#allocation24_spill] sm:$0xff] %v4479_v24 }
 0x39a   : > { %v4434_v62 = vpop.f32.mrf.mxu3 }
 0x39b   : > { %5481 = vst [vmem:[#allocation20_spill] sm:$0xff] %v4434_v62  ;;  %v4436_v20 = vpop.f32.mrf.mxu1 }
 0x39c   : > { %5482 = vst [vmem:[#allocation21_spill] sm:$0xff] %v4436_v20 }
 0x3a0   : > { %3144 = vmatmul.msk.bf16.gmra.mxu2 %vm522_vm1, %v4399_v34 }
 0x3a2   : > { %v4440_v16 = vpop.f32.mrf.mxu3 }
 0x3a3   : > { %5483 = vst [vmem:[#allocation22_spill] sm:$0xff] %v4440_v16  ;;  %v1113_v2 = vpop.f32.mrf.mxu1 }
 0x3a4   : > { %v4442_v3 = vadd.f32 %v1113_v2, %v496_v1 }
 0x3a6   : > { %v1213_v58 = vsel %vm402_vm0, %v4442_v3, -inf }
 0x3a7   : > { %1214 = vmax.xlane.f32.xlu2 %v1213_v58 }
 0x3aa   : > { %v1074_v7 = vpop.f32.mrf.mxu3 }
 0x3ab   : > { %v1075_v5 = vadd.f32 %v1074_v7, %v496_v1  ;;  %v1115_v43 = vpop.f32.mrf.mxu1 }
 0x3ac   : > { %v4446_v10 = vadd.f32 %v1115_v43, %v497_v4 }
 0x3ad   : > { %v1201_v33 = vsel %vm402_vm0, %v1075_v5, -inf }
 0x3ae   : > { %1202 = vmax.xlane.f32.xlu0 %v1201_v33  ;;  %v1216_v34 = vsel %vm402_vm0, %v4446_v10, -inf }
 0x3af   : > { %1217 = vmax.xlane.f32.xlu1 %v1216_v34 }
 0x3b2   : > { %v1076_v39 = vpop.f32.mrf.mxu3 }
 0x3b3   : > { %v4451_v61 = vadd.f32 %v1076_v39, %v497_v4  ;;  %v1118_v59 = vpop.f32.mrf.mxu1 }
 0x3b4   : > { %v4459_v26 = vadd.f32 %v1118_v59, %v498_v12 }
 0x3b5   : > { %v1204_v32 = vsel %vm402_vm0, %v4451_v61, -inf }
 0x3b6   : > { %1205 = vmax.xlane.f32.xlu2 %v1204_v32  ;;  %v1219_v28 = vsel %vm402_vm0, %v4459_v26, -inf }
 0x3ba   : > { %v1079_v15 = vpop.f32.mrf.mxu3 }
 0x3bb   : > { %v4455_v19 = vadd.f32 %v1079_v15, %v498_v12  ;;  %v1120_v30 = vpop.f32.mrf.mxu1 }
 0x3bc   : > { %v4467_v14 = vadd.f32 %v1120_v30, %v499_v8 }
 0x3bd   : > { %v1207_v25 = vsel %vm402_vm0, %v4455_v19, -inf }
 0x3be   : > { %1208 = vmax.xlane.f32.xlu1 %v1207_v25  ;;  %v1222_v36 = vsel %vm402_vm0, %v4467_v14, -inf }
 0x3c2   : > { %v1081_v48 = vpop.f32.mrf.mxu3  ;;  %v4481_v56 = vpop.f32.mrf.mxu2 }
 0x3c3   : > { %v4461_v27 = vadd.f32 %v1081_v48, %v499_v8  ;;  %5486 = vst [vmem:[#allocation25_spill] sm:$0xff] %v4481_v56 }
 0x3c5   : > { %v1210_v29 = vsel %vm402_vm0, %v4461_v27, -inf }
 0x3c6   : > { %1220 = vmax.xlane.f32.xlu1 %v1219_v28  ;;  %1211 = vmax.xlane.f32.xlu0 %v1210_v29 }
 0x3ca   : > { %v4483_v51 = vpop.f32.mrf.mxu2  ;;  %v1191_v0 = vpop.f32.mrf.mxu3 }
 0x3cb   : > { %5487 = vst [vmem:[#allocation26_spill] sm:$0xff] %v4483_v51  ;;  %v4485_v38 = vadd.f32 %v1191_v0, %v496_v1 }
 0x3cd   : > { %v1237_v40 = vsel %vm402_vm0, %v4485_v38, -inf }
 0x3ce   : > { %1223 = vmax.xlane.f32.xlu0 %v1222_v36 }
 0x3d2   : > { %v1193_v42 = vpop.f32.mrf.mxu3 }
 0x3d3   : > { %v4491_v35 = vadd.f32 %v1193_v42, %v497_v4 }
 0x3d5   : > { %v1240_v47 = vsel %vm402_vm0, %v4491_v35, -inf }
 0x3da   : > { %v1196_v34 = vpop.f32.mrf.mxu3 }
 0x3db   : > { %v4509_v15 = vadd.f32 %v1196_v34, %v498_v12 }
 0x3dd   : > { %v1243_v29 = vsel %vm402_vm0, %v4509_v15, -inf }
 0x3df   : > { %1602 = vrot.lane.b32.xlu1 %v4109_v54, %s3913_s26 }
 0x403   : > { %v4487_v22 = vpop.f32.mrf.mxu2 }
 0x404   : > { %5488 = vst [vmem:[#allocation27_spill] sm:$0xff] %v4487_v22 }
 0x409   : > { %1238 = vmax.xlane.f32.xlu1 %v1237_v40 }
 0x40b   : > { %v4493_v44 = vpop.f32.mrf.mxu2 }
 0x40c   : > { %5489 = vst [vmem:[#allocation28_spill] sm:$0xff] %v4493_v44 }
 0x411   : > { %1241 = vmax.xlane.f32.xlu1 %v1240_v47 }
 0x413   : > { %v1152_v52 = vpop.f32.mrf.mxu2 }
 0x414   : > { %v4497_v45 = vadd.f32 %v1152_v52, %v496_v1 }
 0x416   : > { %v1225_v63 = vsel %vm402_vm0, %v4497_v45, -inf }
 0x417   : > { %1226 = vmax.xlane.f32.xlu0 %v1225_v63 }
 0x41a   : > { %v1215_v58 = vpop.xlane.xlu2 %1214 }
 0x41b   : > { %v1154_v41 = vpop.f32.mrf.mxu2  ;;  %v1253_v25 = vsub.f32 %v4442_v3, %v1215_v58 }
 0x41c   : > { %v4501_v57 = vadd.f32 %v1154_v41, %v497_v4 }
 0x41d   : > { %v1273_v30 = vmul.f32 1.442695, %v1253_v25 }
 0x41e   : > { %v1228_v2 = vsel %vm402_vm0, %v4501_v57, -inf }
 0x41f   : > { %1229 = vmax.xlane.f32.xlu2 %v1228_v2 }
 0x421   : > { %v1203_v7 = vpop.xlane.xlu0 %1202 }
 0x422   : > { %v1249_v39 = vsub.f32 %v1075_v5, %v1203_v7  ;;  %v1218_v40 = vpop.xlane.xlu1 %1217 }
 0x423   : > { %v1157_v43 = vpop.f32.mrf.mxu2  ;;  %v1254_v42 = vsub.f32 %v4446_v10, %v1218_v40 }
 0x424   : > { %v4505_v33 = vadd.f32 %v1157_v43, %v498_v12  ;;  %v1265_v32 = vmul.f32 1.442695, %v1249_v39  ;;  %v1198_v12 = vpop.f32.mrf.mxu3 }
 0x425   : > { %v4521_v0 = vadd.f32 %v1198_v12, %v499_v8  ;;  %v1275_v52 = vmul.f32 1.442695, %v1254_v42 }
 0x426   : > { %v1231_v1 = vsel %vm402_vm0, %v4505_v33, -inf  ;;  %3513 = vpow2.f32 %v1265_v32 }
 0x427   : > { %1232 = vmax.xlane.f32.xlu2 %v1231_v1  ;;  %3515 = vpow2.f32 %v1273_v30 }
 0x429   : > { %v1206_v4 = vpop.xlane.xlu2 %1205 }
 0x42a   : > { %v1250_v28 = vsub.f32 %v4451_v61, %v1206_v4  ;;  %v1246_v61 = vsel %vm402_vm0, %v4521_v0, -inf }
 0x42b   : > { %v1159_v59 = vpop.f32.mrf.mxu2  ;;  %1559 = vrot.lane.b32.xlu0 %v4107_v53, %s3914_s29 }
 0x42c   : > { %v4514_v48 = vadd.f32 %v1159_v59, %v499_v8  ;;  %v1267_v36 = vmul.f32 1.442695, %v1250_v28  ;;  %v4523_v3 = vpop.eup %3513 }
 0x42d   : > { %v1297_v47 = vsel %vm402_vm0, %v4523_v3, 0.0  ;;  %v4530_v63 = vpop.eup %3515 }
 0x42e   : > { %v1234_v5 = vsel %vm402_vm0, %v4514_v48, -inf  ;;  %3517 = vpow2.f32 %v1267_v36  ;;  %v1309_v58 = vsel %vm402_vm0, %v4530_v63, 0.0 }
 0x42f   : > { %1235 = vmax.xlane.f32.xlu1 %v1234_v5  ;;  %1244 = vmax.xlane.f32.xlu2 %v1243_v29  ;;  %3519 = vpow2.f32 %v1275_v52 }
 0x431   : > { %v1209_v8 = vpop.xlane.xlu1 %1208 }
 0x432   : > { %v1251_v2 = vsub.f32 %v4455_v19, %v1209_v8 }
 0x434   : > { %v4532_v41 = vpop.eup %3517  ;;  %v1269_v43 = vmul.f32 1.442695, %v1251_v2 }
 0x435   : > { %v1300_v10 = vsel %vm402_vm0, %v4532_v41, 0.0  ;;  %v4539_v34 = vpop.eup %3519 }
 0x436   : > { %3521 = vpow2.f32 %v1269_v43  ;;  %v1312_v1 = vsel %vm402_vm0, %v4539_v34, 0.0 }
 0x437   : > { %1247 = vmax.xlane.f32.xlu1 %v1246_v61  ;;  %1298 = vadd.xlane.f32.xlu2 %v1297_v47 }
 0x439   : > { %v1212_v7 = vpop.xlane.xlu0 %1211  ;;  %v1221_v19 = vpop.xlane.xlu1 %1220 }
 0x43a   : > { %v1252_v39 = vsub.f32 %v4461_v27, %v1212_v7  ;;  %v1255_v29 = vsub.f32 %v4459_v26, %v1221_v19 }
 0x43c   : > { %v1271_v32 = vmul.f32 1.442695, %v1252_v39  ;;  %v4544_v4 = vpop.eup %3521  ;;  %v1277_v12 = vmul.f32 1.442695, %v1255_v29 }
 0x43d   : > { %v1303_v59 = vsel %vm402_vm0, %v4544_v4, 0.0 }
 0x43e   : > { %3523 = vpow2.f32 %v1271_v32 }
 0x43f   : > { %1301 = vadd.xlane.f32.xlu1 %v1300_v10  ;;  %1310 = vadd.xlane.f32.xlu2 %v1309_v58  ;;  %3525 = vpow2.f32 %v1277_v12 }
 0x441   : > { %v1224_v30 = vpop.xlane.xlu0 %1223 }
 0x442   : > { %v1256_v36 = vsub.f32 %v4467_v14, %v1224_v30 }
 0x444   : > { %v4548_v28 = vpop.eup %3523  ;;  %v1279_v40 = vmul.f32 1.442695, %v1256_v36 }
 0x445   : > { %v1306_v27 = vsel %vm402_vm0, %v4548_v28, 0.0  ;;  %v4559_v61 = vpop.eup %3525 }
 0x446   : > { %3527 = vpow2.f32 %v1279_v40  ;;  %v1315_v8 = vsel %vm402_vm0, %v4559_v61, 0.0 }
 0x447   : > { %1313 = vadd.xlane.f32.xlu1 %v1312_v1 }
 0x44c   : > { %v4564_v26 = vpop.eup %3527 }
 0x44d   : > { %v1318_v7 = vsel %vm402_vm0, %v4564_v26, 0.0 }
 0x44f   : > { %1304 = vadd.xlane.f32.xlu1 %v1303_v59 }
 0x451   : > { %v1603_v25 = vpop.permute.xlu1 %1602 }
 0x452   : > { %v1614_v5 = vsel %vm522_vm1, %v1603_v25, 0 }
 0x453   : > { %1622 = vmatpush.bf16.xpose.msra.mxu1 %v1614_v5 }
 0x455   : > { %1307 = vadd.xlane.f32.xlu0 %v1306_v27 }
 0x457   : > { %1641 = vrot.lane.b32.xlu2 %v4117_v11, %s3913_s26 }
 0x468   : > { %1600 = vrot.lane.b32.xlu1 %v4119_v13, %s3913_s26 }
 0x47c   : > { %v1239_v42 = vpop.xlane.xlu1 %1238 }
 0x47d   : > { %v1261_v47 = vsub.f32 %v4485_v38, %v1239_v42 }
 0x47f   : > { %v1289_v52 = vmul.f32 1.442695, %v1261_v47 }
 0x480   : > { %1316 = vadd.xlane.f32.xlu2 %v1315_v8 }
 0x481   : > { %3529 = vpow2.f32 %v1289_v52 }
 0x484   : > { %v1242_v2 = vpop.xlane.xlu1 %1241 }
 0x485   : > { %v1262_v10 = vsub.f32 %v4491_v35, %v1242_v2 }
 0x487   : > { %v4567_v58 = vpop.eup %3529  ;;  %v1291_v14 = vmul.f32 1.442695, %v1262_v10 }
 0x488   : > { %v1333_v38 = vsel %vm402_vm0, %v4567_v58, 0.0  ;;  %1319 = vadd.xlane.f32.xlu2 %v1318_v7 }
 0x489   : > { %3531 = vpow2.f32 %v1291_v14  ;;  %1334 = vadd.xlane.f32.xlu0 %v1333_v38 }
 0x48a   : > { %v1227_v43 = vpop.xlane.xlu0 %1226 }
 0x48b   : > { %v1257_v39 = vsub.f32 %v4497_v45, %v1227_v43 }
 0x48d   : > { %v1281_v1 = vmul.f32 1.442695, %v1257_v39 }
 0x48f   : > { %v4574_v32 = vpop.eup %3531  ;;  %3533 = vpow2.f32 %v1281_v1 }
 0x490   : > { %v1336_v35 = vsel %vm402_vm0, %v4574_v32, 0.0 }
 0x492   : > { %v1230_v19 = vpop.xlane.xlu2 %1229  ;;  %1337 = vadd.xlane.f32.xlu1 %v1336_v35 }
 0x493   : > { %v1258_v59 = vsub.f32 %v4501_v57, %v1230_v19 }
 0x495   : > { %v4579_v25 = vpop.eup %3533  ;;  %v1283_v5 = vmul.f32 1.442695, %v1258_v59 }
 0x496   : > { %v1321_v27 = vsel %vm402_vm0, %v4579_v25, 0.0 }
 0x497   : > { %3535 = vpow2.f32 %v1283_v5  ;;  %1322 = vadd.xlane.f32.xlu2 %v1321_v27 }
 0x49a   : > { %v1233_v45 = vpop.xlane.xlu2 %1232 }
 0x49b   : > { %v1259_v29 = vsub.f32 %v4505_v33, %v1233_v45 }
 0x49d   : > { %v4584_v12 = vpop.eup %3535  ;;  %v1285_v30 = vmul.f32 1.442695, %v1259_v29  ;;  %v1560_v45 = vpop.permute.xlu0 %1559 }
 0x49e   : > { %v1324_v36 = vsel %vm402_vm0, %v4584_v12, 0.0 }
 0x49f   : > { %3537 = vpow2.f32 %v1285_v30  ;;  %1325 = vadd.xlane.f32.xlu0 %v1324_v36 }
 0x4a2   : > { %v1245_v57 = vpop.xlane.xlu2 %1244  ;;  %v4588_v40 = vpop.xlane.xlu1 %1235 }
 0x4a5   : > { %v4590_v42 = vpop.eup %3537 }
 0x4a6   : > { %v1327_v47 = vsel %vm402_vm0, %v4590_v42, 0.0 }
 0x4a7   : > { %1328 = vadd.xlane.f32.xlu0 %v1327_v47 }
 0x4aa   : > { %v1299_v52 = vpop.xlane.xlu2 %1298  ;;  %v1248_v8 = vpop.xlane.xlu1 %1247 }
 0x4ab   : > { %1528 = vrot.lane.b32.xlu1 %v4127_v17, %s3912_s19  ;;  %3539 = vrcp.f32 %v1299_v52 }
 0x4af   : > { %1639 = vrot.lane.b32.xlu2 %v4129_v18, %s3913_s26 }
 0x4b1   : > { %v3540_v10 = vpop.eup %3539 }
 0x4b2   : > { %v1311_v33 = vpop.xlane.xlu2 %1310  ;;  %v1302_v2 = vpop.xlane.xlu1 %1301  ;;  %v1361_v14 = vmul.f32 %v3540_v10, %v4523_v3 }
 0x4b3   : > { %1635 = vrot.lane.b32.xlu1 %v4129_v18, %s3914_s29  ;;  %3541 = vrcp.f32 %v1302_v2 }
 0x4b4   : > { %3543 = vrcp.f32 %v1311_v33  ;;  %v1377_v1 = vpack.c.bf16 %v1361_v14, %v1361_v14 }
 0x4b6   : > { %v1397_v27 = vunpack.c.l.b16 %v1377_v1 }
 0x4b7   : > { %1526 = vrot.lane.b32.xlu2 %v4115_v6, %s3912_s19  ;;  %s3224_s19 = sshll.u32 %s3979_s25, 7 }
 0x4b9   : > { %v3542_v7 = vpop.eup %3541 }
 0x4ba   : > { %v1642_v38 = vpop.permute.xlu2 %1641  ;;  %v1314_v43 = vpop.xlane.xlu1 %1313  ;;  %v1362_v35 = vmul.f32 %v3542_v7, %v4532_v41  ;;  %v1263_v7 = vsub.f32 %v4509_v15, %v1245_v57 }
 0x4bb   : > { %v3544_v39 = vpop.eup %3543  ;;  %v1653_v19 = vsel %vm522_vm1, %v1642_v38, 0  ;;  %3545 = vrcp.f32 %v1314_v43  ;;  %1596 = vrot.lane.b32.xlu0 %v4119_v13, %s3914_s29  ;;  %1598 = vrot.lane.b32.xlu1 %v4109_v54, %s3914_s29 }
 0x4bc   : > { %1661 = vmatpush.bf16.xpose.msra.mxu2 %v1653_v19  ;;  %v1378_v3 = vpack.c.bf16 %v1362_v35, %v1362_v35  ;;  %v1365_v59 = vmul.f32 %v3544_v39, %v4530_v63  ;;  %v1293_v1 = vmul.f32 1.442695, %v1263_v7  ;;  %v1264_v19 = vsub.f32 %v4521_v0, %v1248_v8 }
 0x4be   : > { %v1398_v5 = vunpack.c.l.b16 %v1378_v3  ;;  %v1381_v36 = vpack.c.bf16 %v1365_v59, %v1365_v59 }
 0x4c0   : > { %v1401_v30 = vpack.c.b16 %v1398_v5, %v1397_v27  ;;  %v1438_v33 = vunpack.c.l.b16 %v1381_v36  ;;  %v1260_v5 = vsub.f32 %v4514_v48, %v4588_v40  ;;  %v1295_v27 = vmul.f32 1.442695, %v1264_v19 }
 0x4c1   : > { %v3546_v29 = vpop.eup %3545 }
 0x4c2   : > { %v1366_v41 = vmul.f32 %v3546_v29, %v4539_v34  ;;  %v1305_v47 = vpop.xlane.xlu1 %1304  ;;  %3147 = vmatmul.msk.bf16.vlgmr.msrb.gmra.mxu0 %vm402_vm0, %v1401_v30  ;;  %v1287_v15 = vmul.f32 1.442695, %v1260_v5 }
 0x4c3   : > { %3547 = vrcp.f32 %v1305_v47  ;;  %1637 = vrot.lane.b32.xlu1 %v4117_v11, %s3914_s29 }
 0x4c4   : > { %v1382_v52 = vpack.c.bf16 %v1366_v41, %v1366_v41 }
 0x4c6   : > { %v1439_v2 = vunpack.c.l.b16 %v1382_v52 }
 0x4c8   : > { %v1442_v10 = vpack.c.b16 %v1439_v2, %v1438_v33  ;;  %v1308_v63 = vpop.xlane.xlu0 %1307 }
 0x4c9   : > { %v3548_v14 = vpop.eup %3547  ;;  %3549 = vrcp.f32 %v1308_v63 }
 0x4ca   : > { %3149 = vmatmul.msk.bf16.vlgmr.msrb.gmra.mxu1 %vm402_vm0, %v1442_v10  ;;  %v1363_v34 = vmul.f32 %v3548_v14, %v4544_v4  ;;  %3551 = vpow2.f32 %v1293_v1 }
 0x4cb   : > { %1680 = vrot.lane.b32.xlu1 %v4127_v17, %s3913_s26  ;;  %3553 = vpow2.f32 %v1295_v27 }
 0x4cc   : > { %v1379_v39 = vpack.c.bf16 %v1363_v34, %v1363_v34  ;;  %3555 = vpow2.f32 %v1287_v15 }
 0x4ce   : > { %v1399_v3 = vunpack.c.l.b16 %v1379_v39 }
 0x4cf   : > { %v3550_v38 = vpop.eup %3549 }
 0x4d0   : > { %v1364_v43 = vmul.f32 %v3550_v38, %v4548_v28  ;;  %v4629_v0 = vpop.eup %3551 }
 0x4d1   : > { %v1339_v48 = vsel %vm402_vm0, %v4629_v0, 0.0  ;;  %v4633_v40 = vpop.eup %3553 }
 0x4d2   : > { %v1380_v35 = vpack.c.bf16 %v1364_v43, %v1364_v43  ;;  %v4637_v8 = vpop.eup %3555  ;;  %v1342_v29 = vsel %vm402_vm0, %v4633_v40, 0.0 }
 0x4d3   : > { %1674 = vrot.lane.b32.xlu1 %v4115_v6, %s3914_s29  ;;  %v1330_v30 = vsel %vm402_vm0, %v4637_v8, 0.0 }
 0x4d4   : > { %v1400_v59 = vunpack.c.l.b16 %v1380_v35 }
 0x4d6   : > { %v1402_v4 = vpack.c.b16 %v1400_v59, %v1399_v3 }
 0x4d8   : > { %3148 = vmatmul.msk.bf16.gmra.mxu0 %vm402_vm0, %v1402_v4 }
 0x4da   : > { %v1601_v28 = vpop.permute.xlu1 %1600 }
 0x4db   : > { %v1611_v57 = vsel %vm522_vm1, %v1601_v28, 0  ;;  %1915 = vrot.lane.b32.xlu1 %v4103_v23, %s3915_s11 }
 0x4dc   : > { %1623 = vmatpush.bf16.xpose.msra.mxu1 %v1611_v57 }
 0x4e0   : > { %1340 = vadd.xlane.f32.xlu2 %v1339_v48 }
 0x4e3   : > { %1958 = vrot.lane.b32.xlu1 %v4109_v54, %s3915_s11 }
 0x4e5   : > { %1343 = vadd.xlane.f32.xlu0 %v1342_v29 }
 0x4e8   : > { %1331 = vadd.xlane.f32.xlu2 %v1330_v30  ;;  %3155 = vmatmul.msk.bf16.vlgmr.msra.gmra.mxu0 %vm522_vm1, %v4419_v50 }
 0x4eb   : > { %2071 = vrot.lane.b32.xlu1 %v4107_v53, %s3916_s7 }
 0x4f3   : > { %v1317_v36 = vpop.xlane.xlu2 %1316  ;;  %2112 = vrot.lane.b32.xlu1 %v4119_v13, %s3917_s15 }
 0x4f4   : > { %3557 = vrcp.f32 %v1317_v36 }
 0x4f8   : > { %3156 = vmatmul.msk.bf16.gmra.mxu0 %vm522_vm1, %v1560_v45 }
 0x4f9   : > { %1676 = vrot.lane.b32.xlu0 %v4127_v17, %s3914_s29 }
 0x4fa   : > { %v3558_v47 = vpop.eup %3557 }
 0x4fb   : > { %v1320_v41 = vpop.xlane.xlu2 %1319  ;;  %v1367_v50 = vmul.f32 %v3558_v47, %v4559_v61 }
 0x4fc   : > { %3559 = vrcp.f32 %v1320_v41  ;;  %v1335_v14 = vpop.xlane.xlu0 %1334 }
 0x4fd   : > { %v1383_v2 = vpack.c.bf16 %v1367_v50, %v1367_v50 }
 0x4ff   : > { %v1440_v45 = vunpack.c.l.b16 %v1383_v2 }
 0x500   : > { %1678 = vrot.lane.b32.xlu2 %v4115_v6, %s3913_s26 }
 0x501   : > { %1917 = vrot.lane.b32.xlu0 %v4107_v53, %s3915_s11 }
 0x502   : > { %v3560_v52 = vpop.eup %3559 }
 0x503   : > { %v1368_v33 = vmul.f32 %v3560_v52, %v4564_v26 }
 0x505   : > { %v1384_v10 = vpack.c.bf16 %v1368_v33, %v1368_v33  ;;  %v1338_v7 = vpop.xlane.xlu1 %1337 }
 0x507   : > { %v1441_v63 = vunpack.c.l.b16 %v1384_v10 }
 0x508   : > { %2075 = vrot.lane.b32.xlu2 %v4107_v53, %s3917_s15 }
 0x509   : > { %2073 = vrot.lane.b32.xlu0 %v4103_v23, %s3917_s15  ;;  %v1443_v61 = vpack.c.b16 %v1441_v63, %v1440_v45 }
 0x50a   : > { %v1323_v34 = vpop.xlane.xlu2 %1322 }
 0x50b   : > { %3150 = vmatmul.msk.bf16.gmra.mxu1 %vm402_vm0, %v1443_v61  ;;  %3561 = vrcp.f32 %v1323_v34 }
 0x50c   : > { %3563 = vrcp.f32 %v1338_v7 }
 0x50d   : > { %3565 = vrcp.f32 %v1335_v14 }
 0x510   : > { %1956 = vrot.lane.b32.xlu2 %v4119_v13, %s3915_s11 }
 0x511   : > { %1999 = vrot.lane.b32.xlu0 %v4117_v11, %s3915_s11  ;;  %v3562_v43 = vpop.eup %3561 }
 0x512   : > { %v1640_v26 = vpop.permute.xlu2 %1639  ;;  %v1326_v38 = vpop.xlane.xlu0 %1325  ;;  %v1369_v19 = vmul.f32 %v3562_v43, %v4579_v25 }
 0x513   : > { %v1650_v39 = vsel %vm522_vm1, %v1640_v26, 0  ;;  %3567 = vrcp.f32 %v1326_v38  ;;  %v3564_v1 = vpop.eup %3563 }
 0x514   : > { %1662 = vmatpush.bf16.xpose.msra.mxu2 %v1650_v39  ;;  %v3566_v35 = vpop.eup %3565  ;;  %v1374_v3 = vmul.f32 %v3564_v1, %v4574_v32  ;;  %v1385_v4 = vpack.c.bf16 %v1369_v19, %v1369_v19 }
 0x515   : > { %v1373_v5 = vmul.f32 %v3566_v35, %v4567_v58 }
 0x516   : > { %v1390_v15 = vpack.c.bf16 %v1374_v3, %v1374_v3  ;;  %v1479_v29 = vunpack.c.l.b16 %v1385_v4 }
 0x517   : > { %v1389_v57 = vpack.c.bf16 %v1373_v5, %v1373_v5 }
 0x518   : > { %2069 = vrot.lane.b32.xlu2 %v4103_v23, %s3916_s7  ;;  %v1521_v32 = vunpack.c.l.b16 %v1390_v15 }
 0x519   : > { %v3568_v59 = vpop.eup %3567  ;;  %1997 = vrot.lane.b32.xlu0 %v4129_v18, %s3915_s11  ;;  %v1520_v36 = vunpack.c.l.b16 %v1389_v57 }
 0x51a   : > { %v1370_v27 = vmul.f32 %v3568_v59, %v4584_v12  ;;  %v1527_v58 = vpop.permute.xlu2 %1526  ;;  %v1329_v47 = vpop.xlane.xlu0 %1328 }
 0x51b   : > { %v1524_v41 = vpack.c.b16 %v1521_v32, %v1520_v36 }
 0x51c   : > { %v1386_v28 = vpack.c.bf16 %v1370_v27, %v1370_v27 }
 0x51d   : > { %v1529_v48 = vpop.permute.xlu1 %1528 }
 0x51e   : > { %v1480_v25 = vunpack.c.l.b16 %v1386_v28  ;;  %1544 = vmatpush.bf16.msrb.mxu3 %v1529_v48 }
 0x520   : > { %v1483_v30 = vpack.c.b16 %v1480_v25, %v1479_v29  ;;  %2114 = vrot.lane.b32.xlu2 %v4109_v54, %s3917_s15  ;;  %v4704_v25 = vld [vmem:[#allocation7 + $0x40] sm:$0xff] }
 0x522   : > { %3151 = vmatmul.msk.bf16.vlgmr.msrb.gmra.mxu2 %vm402_vm0, %v1483_v30  ;;  %1545 = vmatpush.bf16.msrb.mxu3 %v1527_v58 }
 0x525   : > { %3153 = vmatmul.msk.bf16.vlgmr.msrb.gmra.mxu3 %vm402_vm0, %v1524_v41  ;;  %v4680_v12 = vpop.permute.xlu1 %1635 }
 0x52d   : > { %v1597_v50 = vpop.permute.xlu0 %1596  ;;  %v1599_v52 = vpop.permute.xlu1 %1598 }
 0x52e   : > { %3157 = vmatmul.msk.bf16.vlgmr.msra.gmra.mxu1 %vm522_vm1, %v1597_v50 }
 0x535   : > { %v4683_v33 = vpop.permute.xlu1 %1637 }
 0x53d   : > { %v1681_v2 = vpop.permute.xlu1 %1680 }
 0x53e   : > { %v1692_v10 = vsel %vm522_vm1, %v1681_v2, 0  ;;  %3158 = vmatmul.msk.bf16.gmra.mxu1 %vm522_vm1, %v1599_v52 }
 0x53f   : > { %1700 = vmatpush.bf16.xpose.msra.mxu3 %v1692_v10  ;;  %v4687_v45 = vpop.f32.mrf.mxu0 }
 0x545   : > { %v1675_v63 = vpop.permute.xlu1 %1674 }
 0x547   : > { %v4689_v61 = vpop.f32.mrf.mxu1  ;;  %v4691_v14 = vpop.f32.mrf.mxu0 }
 0x54d   : > { %v1916_v34 = vpop.permute.xlu1 %1915 }
 0x54f   : > { %v4693_v7 = vpop.f32.mrf.mxu1 }
 0x553   : > { %v1341_v38 = vpop.xlane.xlu2 %1340 }
 0x554   : > { %3569 = vrcp.f32 %v1341_v38 }
 0x555   : > { %v4697_v43 = vpop.f32.mrf.mxu0  ;;  %v1959_v39 = vpop.permute.xlu1 %1958  ;;  %3571 = vrcp.f32 %v1329_v47 }
 0x556   : > { %1974 = vmatpush.bf16.msrb.mxu1 %v1959_v39  ;;  %v4715_v39 = vld [vmem:[#allocation7 + $0x48] sm:$0xff] }
 0x558   : > { %v1344_v1 = vpop.xlane.xlu0 %1343 }
 0x559   : > { %3573 = vrcp.f32 %v1344_v1 }
 0x55a   : > { %v3570_v35 = vpop.eup %3569 }
 0x55b   : > { %v1332_v19 = vpop.xlane.xlu2 %1331  ;;  %v3572_v3 = vpop.eup %3571  ;;  %v1375_v59 = vmul.f32 %v3570_v35, %v4629_v0 }
 0x55c   : > { %3575 = vrcp.f32 %v1332_v19  ;;  %v1371_v27 = vmul.f32 %v3572_v3, %v4590_v42 }
 0x55d   : > { %v4700_v5 = vpop.f32.mrf.mxu0  ;;  %v1391_v28 = vpack.c.bf16 %v1375_v59, %v1375_v59 }
 0x55e   : > { %v1387_v30 = vpack.c.bf16 %v1371_v27, %v1371_v27 }
 0x55f   : > { %v3574_v4 = vpop.eup %3573  ;;  %v1522_v58 = vunpack.c.l.b16 %v1391_v28  ;;  %v4728_v28 = vpop.permute.xlu1 %2071 }
 0x560   : > { %v1376_v15 = vmul.f32 %v3574_v4, %v4633_v40  ;;  %v1481_v50 = vunpack.c.l.b16 %v1387_v30 }
 0x562   : > { %v3576_v57 = vpop.eup %3575  ;;  %v1392_v48 = vpack.c.bf16 %v1376_v15, %v1376_v15 }
 0x563   : > { %v1679_v29 = vpop.permute.xlu2 %1678  ;;  %v1372_v32 = vmul.f32 %v3576_v57, %v4637_v8 }
 0x564   : > { %v1689_v36 = vsel %vm522_vm1, %v1679_v29, 0  ;;  %v1523_v0 = vunpack.c.l.b16 %v1392_v48 }
 0x565   : > { %v1586_v41 = vpop.f32.mrf.mxu0  ;;  %1701 = vmatpush.bf16.xpose.msra.mxu3 %v1689_v36  ;;  %v1388_v47 = vpack.c.bf16 %v1372_v32, %v1372_v32 }
 0x566   : > { %v4709_v42 = vadd.f32 %v1586_v41, %v4704_v25  ;;  %v1525_v40 = vpack.c.b16 %v1523_v0, %v1522_v58 }
 0x567   : > { %v1482_v52 = vunpack.c.l.b16 %v1388_v47 }
 0x568   : > { %3154 = vmatmul.msk.bf16.gmra.mxu3 %vm402_vm0, %v1525_v40  ;;  %v1713_v2 = vsel %vm402_vm0, %v4709_v42, -inf }
 0x569   : > { %1714 = vmax.xlane.f32.xlu1 %v1713_v2  ;;  %v1484_v8 = vpack.c.b16 %v1482_v52, %v1481_v50 }
 0x56b   : > { %3152 = vmatmul.msk.bf16.gmra.mxu2 %vm402_vm0, %v1484_v8  ;;  %v2076_v10 = vpop.permute.xlu2 %2075  ;;  %v1677_v38 = vpop.permute.xlu0 %1676  ;;  %v4755_v8 = vld [vmem:[#allocation7 + $0x58] sm:$0xff] }
 0x56c   : > { %v2087_v4 = vsel %vm522_vm1, %v2076_v10, 0 }
 0x56d   : > { %v1588_v1 = vpop.f32.mrf.mxu0 }
 0x56e   : > { %v4718_v35 = vadd.f32 %v1588_v1, %v4715_v39 }
 0x570   : > { %v1716_v19 = vsel %vm402_vm0, %v4718_v35, -inf }
 0x571   : > { %1717 = vmax.xlane.f32.xlu0 %v1716_v19 }
 0x573   : > { %v1957_v3 = vpop.permute.xlu2 %1956  ;;  %v1918_v59 = vpop.permute.xlu0 %1917 }
 0x574   : > { %1933 = vmatpush.bf16.msrb.mxu0 %v1918_v59  ;;  %1975 = vmatpush.bf16.msrb.mxu1 %v1957_v3 }
 0x575   : > { %v1591_v0 = vpop.f32.mrf.mxu0 }
 0x578   : > { %3161 = vmatmul.msk.bf16.vlgmr.msra.gmra.mxu3 %vm522_vm1, %v1675_v63  ;;  %1934 = vmatpush.bf16.msrb.mxu0 %v1916_v34  ;;  %v2113_v34 = vpop.permute.xlu1 %2112 }
 0x57b   : > { %v4724_v27 = vpop.permute.xlu2 %2069  ;;  %v2074_v15 = vpop.permute.xlu0 %2073  ;;  %3159 = vmatmul.msk.bf16.vlgmr.msra.gmra.mxu2 %vm522_vm1, %v4680_v12  ;;  %v2123_v12 = vsel %vm522_vm1, %v2113_v34, 0 }
 0x57c   : > { %2095 = vmatpush.bf16.xpose.msra.mxu0 %v2087_v4  ;;  %v2084_v57 = vsel %vm522_vm1, %v2074_v15, 0 }
 0x57d   : > { %v1593_v10 = vpop.f32.mrf.mxu0 }
 0x57e   : > { %v4762_v19 = vadd.f32 %v1593_v10, %v4755_v8 }
 0x580   : > { %v1722_v15 = vsel %vm402_vm0, %v4762_v19, -inf }
 0x583   : > { %v2115_v48 = vpop.permute.xlu2 %2114  ;;  %v2000_v29 = vpop.permute.xlu0 %1999 }
 0x584   : > { %2096 = vmatpush.bf16.xpose.msra.mxu0 %v2084_v57  ;;  %v2126_v32 = vsel %vm522_vm1, %v2115_v48, 0  ;;  %2015 = vmatpush.bf16.msrb.mxu2 %v2000_v29  ;;  %v502_v57 = vld [vmem:[#allocation7 + $0x50] sm:$0xff] }
 0x585   : > { %2134 = vmatpush.bf16.xpose.msra.mxu1 %v2126_v32  ;;  %v4771_v48 = vadd.f32 %v1591_v0, %v502_v57 }
 0x587   : > { %v1719_v34 = vsel %vm402_vm0, %v4771_v48, -inf }
 0x588   : > { %v4732_v63 = vpop.f32.mrf.mxu1  ;;  %3162 = vmatmul.msk.bf16.gmra.mxu3 %vm522_vm1, %v1677_v38 }
 0x58b   : > { %v1998_v30 = vpop.permute.xlu0 %1997  ;;  %3160 = vmatmul.msk.bf16.gmra.mxu2 %vm522_vm1, %v4683_v33 }
 0x58c   : > { %2016 = vmatpush.bf16.msrb.mxu2 %v1998_v30 }
 0x58d   : > { %2135 = vmatpush.bf16.xpose.msra.mxu1 %v2123_v12 }
 0x590   : > { %v4738_v36 = vpop.f32.mrf.mxu1 }
 0x5a5   : > { %v4742_v41 = vpop.f32.mrf.mxu2 }
 0x5a8   : > { %v4744_v47 = vpop.f32.mrf.mxu3 }
 0x5ab   : > { %v1625_v40 = vpop.f32.mrf.mxu1 }
 0x5ac   : > { %v4747_v50 = vadd.f32 %v1625_v40, %v4704_v25 }
 0x5ad   : > { %v4749_v52 = vpop.f32.mrf.mxu2 }
 0x5ae   : > { %v1725_v2 = vsel %vm402_vm0, %v4747_v50, -inf }
 0x5af   : > { %1726 = vmax.xlane.f32.xlu1 %v1725_v2 }
 0x5b0   : > { %v4757_v38 = vpop.f32.mrf.mxu3 }
 0x5b3   : > { %v1627_v3 = vpop.f32.mrf.mxu1 }
 0x5b4   : > { %v4765_v59 = vadd.f32 %v1627_v3, %v4715_v39 }
 0x5b6   : > { %v1728_v4 = vsel %vm402_vm0, %v4765_v59, -inf }
 0x5b7   : > { %1729 = vmax.xlane.f32.xlu2 %v1728_v4  ;;  %1723 = vmax.xlane.f32.xlu1 %v1722_v15 }
 0x5bb   : > { %v1630_v29 = vpop.f32.mrf.mxu1 }
 0x5bc   : > { %v4773_v32 = vadd.f32 %v1630_v29, %v502_v57 }
 0x5be   : > { %v1731_v30 = vsel %vm402_vm0, %v4773_v32, -inf }
 0x5bf   : > { %1720 = vmax.xlane.f32.xlu2 %v1719_v34  ;;  %1732 = vmax.xlane.f32.xlu0 %v1731_v30 }
 0x5c3   : > { %v1632_v12 = vpop.f32.mrf.mxu1 }
 0x5c4   : > { %v4780_v40 = vadd.f32 %v1632_v12, %v4755_v8 }
 0x5c6   : > { %v1734_v2 = vsel %vm402_vm0, %v4780_v40, -inf }
 0x5c7   : > { %1735 = vmax.xlane.f32.xlu1 %v1734_v2 }
 0x5dc   : > { %v1715_v3 = vpop.xlane.xlu1 %1714 }
 0x5dd   : > { %v1761_v29 = vsub.f32 %v4709_v42, %v1715_v3 }
 0x5df   : > { %v1777_v12 = vmul.f32 1.442695, %v1761_v29 }
 0x5e1   : > { %3577 = vpow2.f32 %v1777_v12 }
 0x5e7   : > { %v4807_v3 = vpop.eup %3577 }
 0x5e8   : > { %v1809_v12 = vsel %vm402_vm0, %v4807_v3, 0.0 }
 0x5eb   : > { %v4784_v0 = vpop.f32.mrf.mxu3 }
 0x5ee   : > { %v4786_v10 = vpop.f32.mrf.mxu2 }
 0x5f3   : > { %v4788_v4 = vpop.f32.mrf.mxu3 }
 0x5f6   : > { %v4793_v34 = vpop.f32.mrf.mxu2 }
 0x5fb   : > { %v1703_v1 = vpop.f32.mrf.mxu3 }
 0x5fc   : > { %v4798_v2 = vadd.f32 %v1703_v1, %v4704_v25 }
 0x5fe   : > { %v1664_v33 = vpop.f32.mrf.mxu2  ;;  %v1749_v58 = vsel %vm402_vm0, %v4798_v2, -inf }
 0x5ff   : > { %v4803_v26 = vadd.f32 %v1664_v33, %v4704_v25  ;;  %1750 = vmax.xlane.f32.xlu1 %v1749_v58 }
 0x601   : > { %v1737_v42 = vsel %vm402_vm0, %v4803_v26, -inf }
 0x602   : > { %1738 = vmax.xlane.f32.xlu2 %v1737_v42 }
 0x603   : > { %v1705_v29 = vpop.f32.mrf.mxu3 }
 0x604   : > { %v4810_v15 = vadd.f32 %v1705_v29, %v4715_v39 }
 0x606   : > { %v1666_v1 = vpop.f32.mrf.mxu2  ;;  %v1752_v58 = vsel %vm402_vm0, %v4810_v15, -inf }
 0x607   : > { %v4815_v30 = vadd.f32 %v1666_v1, %v4715_v39  ;;  %1810 = vadd.xlane.f32.xlu1 %v1809_v12 }
 0x609   : > { %v1740_v25 = vsel %vm402_vm0, %v4815_v30, -inf }
 0x60a   : > { %1741 = vmax.xlane.f32.xlu0 %v1740_v25  ;;  %1753 = vmax.xlane.f32.xlu2 %v1752_v58 }
 0x60b   : > { %v1708_v33 = vpop.f32.mrf.mxu3 }
 0x60c   : > { %v4821_v42 = vadd.f32 %v1708_v33, %v502_v57 }
 0x60e   : > { %v1669_v29 = vpop.f32.mrf.mxu2  ;;  %v1755_v44 = vsel %vm402_vm0, %v4821_v42, -inf }
 0x60f   : > { %v4823_v22 = vadd.f32 %v1669_v29, %v502_v57 }
 0x611   : > { %v1743_v39 = vsel %vm402_vm0, %v4823_v22, -inf }
 0x612   : > { %1756 = vmax.xlane.f32.xlu0 %v1755_v44  ;;  %1744 = vmax.xlane.f32.xlu2 %v1743_v39  ;;  %v1718_v44 = vpop.xlane.xlu0 %1717 }
 0x613   : > { %v1710_v58 = vpop.f32.mrf.mxu3 }
 0x614   : > { %v4835_v57 = vadd.f32 %v1710_v58, %v4755_v8 }
 0x616   : > { %v1671_v1 = vpop.f32.mrf.mxu2  ;;  %v1758_v33 = vsel %vm402_vm0, %v4835_v57, -inf }
 0x617   : > { %v4830_v12 = vadd.f32 %v1671_v1, %v4755_v8  ;;  %v1762_v1 = vsub.f32 %v4718_v35, %v1718_v44 }
 0x619   : > { %v1746_v25 = vsel %vm402_vm0, %v4830_v12, -inf  ;;  %v1779_v51 = vmul.f32 1.442695, %v1762_v1 }
 0x61a   : > { %1747 = vmax.xlane.f32.xlu2 %v1746_v25 }
 0x620   : > { %2108 = vrot.lane.b32.xlu1 %v4119_v13, %s3916_s7 }
 0x622   : > { %1759 = vmax.xlane.f32.xlu2 %v1758_v33  ;;  %v1727_v29 = vpop.xlane.xlu1 %1726 }
 0x623   : > { %v1765_v39 = vsub.f32 %v4747_v50, %v1727_v29 }
 0x625   : > { %v1785_v56 = vmul.f32 1.442695, %v1765_v39 }
 0x627   : > { %3579 = vpow2.f32 %v1785_v56 }
 0x628   : > { %3581 = vpow2.f32 %v1779_v51 }
 0x62a   : > { %v1730_v25 = vpop.xlane.xlu2 %1729  ;;  %v1724_v33 = vpop.xlane.xlu1 %1723 }
 0x62b   : > { %v1766_v8 = vsub.f32 %v4765_v59, %v1730_v25  ;;  %v1764_v56 = vsub.f32 %v4762_v19, %v1724_v33 }
 0x62d   : > { %v4843_v60 = vpop.eup %3579  ;;  %v1787_v20 = vmul.f32 1.442695, %v1766_v8  ;;  %v1783_v29 = vmul.f32 1.442695, %v1764_v56 }
 0x62e   : > { %v1821_v58 = vsel %vm402_vm0, %v4843_v60, 0.0  ;;  %v4848_v49 = vpop.eup %3581 }
 0x62f   : > { %1822 = vadd.xlane.f32.xlu2 %v1821_v58  ;;  %3583 = vpow2.f32 %v1787_v20  ;;  %v1812_v51 = vsel %vm402_vm0, %v4848_v49, 0.0 }
 0x632   : > { %v1721_v55 = vpop.xlane.xlu2 %1720  ;;  %v1733_v44 = vpop.xlane.xlu0 %1732 }
 0x633   : > { %v1763_v35 = vsub.f32 %v4771_v48, %v1721_v55  ;;  %v1767_v59 = vsub.f32 %v4773_v32, %v1733_v44 }
 0x635   : > { %v1781_v50 = vmul.f32 1.442695, %v1763_v35  ;;  %v4855_v39 = vpop.eup %3583  ;;  %v1789_v1 = vmul.f32 1.442695, %v1767_v59 }
 0x636   : > { %v1824_v20 = vsel %vm402_vm0, %v4855_v39, 0.0 }
 0x637   : > { %3585 = vpow2.f32 %v1781_v50  ;;  %1813 = vadd.xlane.f32.xlu2 %v1812_v51 }
 0x638   : > { %3587 = vpow2.f32 %v1783_v29 }
 0x639   : > { %3589 = vpow2.f32 %v1789_v1 }
 0x63a   : > { %v1736_v58 = vpop.xlane.xlu1 %1735 }
 0x63b   : > { %v1768_v33 = vsub.f32 %v4780_v40, %v1736_v58 }
 0x63d   : > { %v4857_v25 = vpop.eup %3585  ;;  %v1791_v35 = vmul.f32 1.442695, %v1768_v33 }
 0x63e   : > { %v1815_v55 = vsel %vm402_vm0, %v4857_v25, 0.0  ;;  %v4863_v19 = vpop.eup %3587 }
 0x63f   : > { %1816 = vadd.xlane.f32.xlu0 %v1815_v55  ;;  %1825 = vadd.xlane.f32.xlu2 %v1824_v20  ;;  %v4865_v48 = vpop.eup %3589  ;;  %v1818_v32 = vsel %vm402_vm0, %v4863_v19, 0.0  ;;  %3591 = vpow2.f32 %v1791_v35 }
 0x640   : > { %v1827_v8 = vsel %vm402_vm0, %v4865_v48, 0.0 }
 0x645   : > { %v4878_v1 = vpop.eup %3591 }
 0x646   : > { %v1830_v55 = vsel %vm402_vm0, %v4878_v1, 0.0 }
 0x647   : > { %1819 = vadd.xlane.f32.xlu2 %v1818_v32 }
 0x64a   : > { %1828 = vadd.xlane.f32.xlu1 %v1827_v8 }
 0x653   : > { %2151 = vrot.lane.b32.xlu0 %v4129_v18, %s3917_s15 }
 0x65f   : > { %2153 = vrot.lane.b32.xlu2 %v4117_v11, %s3917_s15 }
 0x672   : > { %v1751_v56 = vpop.xlane.xlu1 %1750 }
 0x673   : > { %v1773_v50 = vsub.f32 %v4798_v2, %v1751_v56 }
 0x675   : > { %v1801_v44 = vmul.f32 1.442695, %v1773_v50  ;;  %v1739_v51 = vpop.xlane.xlu2 %1738 }
 0x676   : > { %v1769_v59 = vsub.f32 %v4803_v26, %v1739_v51 }
 0x677   : > { %3593 = vpow2.f32 %v1801_v44 }
 0x678   : > { %v1793_v29 = vmul.f32 1.442695, %v1769_v59 }
 0x67a   : > { %3595 = vpow2.f32 %v1793_v29 }
 0x67d   : > { %v4882_v20 = vpop.eup %3593  ;;  %v1742_v40 = vpop.xlane.xlu0 %1741  ;;  %1831 = vadd.xlane.f32.xlu0 %v1830_v55 }
 0x67e   : > { %v1754_v32 = vpop.xlane.xlu2 %1753  ;;  %v1770_v8 = vsub.f32 %v4815_v30, %v1742_v40  ;;  %v1845_v26 = vsel %vm402_vm0, %v4882_v20, 0.0 }
 0x67f   : > { %v1774_v2 = vsub.f32 %v4810_v15, %v1754_v32  ;;  %1846 = vadd.xlane.f32.xlu1 %v1845_v26 }
 0x680   : > { %v1795_v58 = vmul.f32 1.442695, %v1770_v8  ;;  %v4888_v35 = vpop.eup %3595 }
 0x681   : > { %v1803_v33 = vmul.f32 1.442695, %v1774_v2  ;;  %v1833_v56 = vsel %vm402_vm0, %v4888_v35, 0.0 }
 0x682   : > { %3597 = vpow2.f32 %v1795_v58 }
 0x683   : > { %3599 = vpow2.f32 %v1803_v33  ;;  %v1811_v33 = vpop.xlane.xlu1 %1810 }
 0x685   : > { %1834 = vadd.xlane.f32.xlu0 %v1833_v56 }
 0x686   : > { %v1745_v50 = vpop.xlane.xlu2 %1744 }
 0x687   : > { %v1771_v44 = vsub.f32 %v4823_v22, %v1745_v50 }
 0x688   : > { %v4893_v30 = vpop.eup %3597 }
 0x689   : > { %v1797_v15 = vmul.f32 1.442695, %v1771_v44  ;;  %v4895_v51 = vpop.eup %3599  ;;  %v1836_v59 = vsel %vm402_vm0, %v4893_v30, 0.0 }
 0x68a   : > { %v1848_v29 = vsel %vm402_vm0, %v4895_v51, 0.0  ;;  %1837 = vadd.xlane.f32.xlu1 %v1836_v59 }
 0x68b   : > { %3601 = vpow2.f32 %v1797_v15  ;;  %1849 = vadd.xlane.f32.xlu2 %v1848_v29 }
 0x68e   : > { %v1748_v55 = vpop.xlane.xlu2 %1747 }
 0x68f   : > { %v1772_v40 = vsub.f32 %v4830_v12, %v1748_v55  ;;  %v1757_v12 = vpop.xlane.xlu0 %1756 }
 0x691   : > { %v1799_v32 = vmul.f32 1.442695, %v1772_v40  ;;  %v4902_v8 = vpop.eup %3601 }
 0x692   : > { %v1839_v22 = vsel %vm402_vm0, %v4902_v8, 0.0 }
 0x693   : > { %3603 = vpow2.f32 %v1799_v32  ;;  %1840 = vadd.xlane.f32.xlu2 %v1839_v22 }
 0x694   : > { %3605 = vrcp.f32 %v1811_v33 }
 0x696   : > { %v1760_v58 = vpop.xlane.xlu2 %1759 }
 0x699   : > { %v4906_v2 = vpop.eup %3603 }
 0x69a   : > { %v1842_v26 = vsel %vm402_vm0, %v4906_v2, 0.0  ;;  %v3606_v44 = vpop.eup %3605 }
 0x69b   : > { %1843 = vadd.xlane.f32.xlu0 %v1842_v26  ;;  %v1873_v15 = vmul.f32 %v3606_v44, %v4807_v3 }
 0x69d   : > { %v1889_v29 = vpack.c.bf16 %v1873_v15, %v1873_v15 }
 0x69f   : > { %v1909_v33 = vunpack.c.l.b16 %v1889_v29 }
 0x6a2   : > { %v1823_v56 = vpop.xlane.xlu2 %1822 }
 0x6a3   : > { %2040 = vrot.lane.b32.xlu1 %v4127_v17, %s3915_s11 }
 0x6aa   : > { %v1814_v50 = vpop.xlane.xlu2 %1813 }
 0x6ab   : > { %3607 = vrcp.f32 %v1814_v50  ;;  %2038 = vrot.lane.b32.xlu2 %v4115_v6, %s3915_s11  ;;  %2147 = vrot.lane.b32.xlu1 %v4129_v18, %s3916_s7  ;;  %s2953_s11 = scalar_lea.hbm %s5461_s6, %s3224_s19 }
 0x6ac   : > { %3609 = vrcp.f32 %v1823_v56 }
 0x6af   : > { %2110 = vrot.lane.b32.xlu0 %v4109_v54, %s3916_s7 }
 0x6b1   : > { %v3608_v59 = vpop.eup %3607 }
 0x6b2   : > { %v1874_v55 = vmul.f32 %v3608_v59, %v4848_v49  ;;  %v1817_v40 = vpop.xlane.xlu0 %1816  ;;  %v1826_v32 = vpop.xlane.xlu2 %1825 }
 0x6b3   : > { %2149 = vrot.lane.b32.xlu1 %v4117_v11, %s3916_s7  ;;  %v3610_v22 = vpop.eup %3609  ;;  %3611 = vrcp.f32 %v1826_v32 }
 0x6b4   : > { %v1890_v26 = vpack.c.bf16 %v1874_v55, %v1874_v55  ;;  %3613 = vrcp.f32 %v1817_v40  ;;  %v1877_v3 = vmul.f32 %v3610_v22, %v4843_v60  ;;  %v1776_v22 = vsub.f32 %v4835_v57, %v1760_v58 }
 0x6b6   : > { %v1910_v50 = vunpack.c.l.b16 %v1890_v26  ;;  %v1893_v49 = vpack.c.bf16 %v1877_v3, %v1877_v3  ;;  %v1807_v3 = vmul.f32 1.442695, %v1776_v22 }
 0x6b8   : > { %v1913_v56 = vpack.c.b16 %v1910_v50, %v1909_v33  ;;  %v1950_v29 = vunpack.c.l.b16 %v1893_v49 }
 0x6b9   : > { %v3612_v44 = vpop.eup %3611 }
 0x6ba   : > { %v1820_v62 = vpop.xlane.xlu2 %1819  ;;  %3163 = vmatmul.msk.bf16.vlgmr.msrb.gmra.mxu0 %vm402_vm0, %v1913_v56  ;;  %v3614_v15 = vpop.eup %3613  ;;  %v1878_v59 = vmul.f32 %v3612_v44, %v4855_v39 }
 0x6bb   : > { %3615 = vrcp.f32 %v1820_v62  ;;  %2192 = vrot.lane.b32.xlu1 %v4127_v17, %s3917_s15  ;;  %v1875_v40 = vmul.f32 %v3614_v15, %v4857_v25  ;;  %v1775_v25 = vsub.f32 %v4821_v42, %v1757_v12 }
 0x6bc   : > { %v1894_v55 = vpack.c.bf16 %v1878_v59, %v1878_v59  ;;  %3617 = vpow2.f32 %v1807_v3 }
 0x6bd   : > { %v1891_v56 = vpack.c.bf16 %v1875_v40, %v1875_v40  ;;  %v1805_v58 = vmul.f32 1.442695, %v1775_v25  ;;  %v2109_v40 = vpop.permute.xlu1 %2108 }
 0x6be   : > { %v1951_v32 = vunpack.c.l.b16 %v1894_v55 }
 0x6bf   : > { %v1911_v44 = vunpack.c.l.b16 %v1891_v56  ;;  %3619 = vpow2.f32 %v1805_v58 }
 0x6c0   : > { %v1954_v60 = vpack.c.b16 %v1951_v32, %v1950_v29 }
 0x6c1   : > { %v3616_v26 = vpop.eup %3615 }
 0x6c2   : > { %v2154_v33 = vpop.permute.xlu2 %2153  ;;  %v1876_v50 = vmul.f32 %v3616_v26, %v4863_v19  ;;  %3165 = vmatmul.msk.bf16.vlgmr.msrb.gmra.mxu1 %vm402_vm0, %v1954_v60  ;;  %v4939_v59 = vpop.eup %3617 }
 0x6c3   : > { %v2165_v62 = vsel %vm522_vm1, %v2154_v33, 0  ;;  %2190 = vrot.lane.b32.xlu1 %v4115_v6, %s3917_s15  ;;  %v1854_v42 = vsel %vm402_vm0, %v4939_v59, 0.0  ;;  %s2956_s15 = sshll.u32 %s2953_s11, 4  ;;  %s2957_s15 = int_to_ptr.hbm [resolvable:$true] %s2956_s15 }
 0x6c4   : > { %2173 = vmatpush.bf16.xpose.msra.mxu2 %v2165_v62  ;;  %v1892_v39 = vpack.c.bf16 %v1876_v50, %v1876_v50  ;;  %s3839_s25 = sshra.s32 %s2957_s15, 4  ;;  %s3840_s25 = int_to_ptr.hbm [resolvable:$true] %s3839_s25 }
 0x6c5   : > { %v2152_v49 = vpop.permute.xlu0 %2151  ;;  %v4943_v12 = vpop.eup %3619  ;;  %p3846_p11 = scmp.lt.s32.totalorder %s3840_s25, %s5461_s6 }
 0x6c6   : > { %v1912_v15 = vunpack.c.l.b16 %v1892_v39  ;;  %v2162_v19 = vsel %vm522_vm1, %v2152_v49, 0  ;;  %v1851_v55 = vsel %vm402_vm0, %v4943_v12, 0.0  ;;  %v1829_v29 = vpop.xlane.xlu1 %1828 }
 0x6c7   : > { %3621 = vrcp.f32 %v1829_v29 }
 0x6c8   : > { %v1914_v57 = vpack.c.b16 %v1912_v15, %v1911_v44 }
 0x6ca   : > { %3164 = vmatmul.msk.bf16.gmra.mxu0 %vm402_vm0, %v1914_v57 }
 0x6cb   : > { %2429 = vrot.lane.b32.xlu1 %v4107_v53, %s3918_s16 }
 0x6cc   : > { %2174 = vmatpush.bf16.xpose.msra.mxu2 %v2162_v19 }
 0x6cd   : > { %v3622_v32 = vpop.eup %3621 }
 0x6ce   : > { %v1879_v26 = vmul.f32 %v3622_v32, %v4865_v48 }
 0x6d0   : > { %v1895_v22 = vpack.c.bf16 %v1879_v26, %v1879_v26 }
 0x6d2   : > { %v1952_v56 = vunpack.c.l.b16 %v1895_v22 }
 0x6d4   : > { %1855 = vadd.xlane.f32.xlu2 %v1854_v42 }
 0x6d9   : > { %1852 = vadd.xlane.f32.xlu0 %v1851_v55 }
 0x6da   : > { %3171 = vmatmul.msk.bf16.vlgmr.msra.gmra.mxu0 %vm522_vm1, %v4724_v27 }
 0x6ea   : > { %3172 = vmatmul.msk.bf16.gmra.mxu0 %vm522_vm1, %v4728_v28 }
 0x6ec   : > { %2188 = vrot.lane.b32.xlu2 %v4127_v17, %s3916_s7 }
 0x6ed   : > { %2186 = vrot.lane.b32.xlu0 %v4115_v6, %s3916_s7  ;;  %s2954_s7 = sshll.u32 %s5335_s13, 4  ;;  %s2955_s7 = int_to_ptr.vmem [resolvable:$true] %s2954_s7 }
 0x6f0   : > { %v1832_v53 = vpop.xlane.xlu0 %1831 }
 0x6f1   : > { %3623 = vrcp.f32 %v1832_v53 }
 0x6f2   : > { %v1847_v27 = vpop.xlane.xlu1 %1846 }
 0x6f4   : > { %2427 = vrot.lane.b32.xlu2 %v4103_v23, %s3918_s16 }
 0x6f7   : > { %v3624_v60 = vpop.eup %3623 }
 0x6f8   : > { %v1880_v28 = vmul.f32 %v3624_v60, %v4878_v1  ;;  %v1835_v33 = vpop.xlane.xlu0 %1834 }
 0x6f9   : > { %3625 = vrcp.f32 %v1835_v33 }
 0x6fa   : > { %v1896_v50 = vpack.c.bf16 %v1880_v28, %v1880_v28 }
 0x6fc   : > { %v1953_v62 = vunpack.c.l.b16 %v1896_v50 }
 0x6fd   : > { %v1838_v39 = vpop.xlane.xlu1 %1837 }
 0x6fe   : > { %v1850_v25 = vpop.xlane.xlu2 %1849  ;;  %3627 = vrcp.f32 %v1838_v39  ;;  %v1955_v3 = vpack.c.b16 %v1953_v62, %v1952_v56 }
 0x6ff   : > { %v3626_v44 = vpop.eup %3625  ;;  %3629 = vrcp.f32 %v1850_v25 }
 0x700   : > { %3166 = vmatmul.msk.bf16.gmra.mxu1 %vm402_vm0, %v1955_v3  ;;  %v1881_v48 = vmul.f32 %v3626_v44, %v4888_v35  ;;  %3631 = vrcp.f32 %v1847_v27 }
 0x702   : > { %v1897_v15 = vpack.c.bf16 %v1881_v48, %v1881_v48 }
 0x704   : > { %v3628_v23 = vpop.eup %3627  ;;  %v1991_v58 = vunpack.c.l.b16 %v1897_v15 }
 0x705   : > { %v1882_v49 = vmul.f32 %v3628_v23, %v4893_v30  ;;  %v3630_v55 = vpop.eup %3629 }
 0x706   : > { %v1841_v1 = vpop.xlane.xlu2 %1840  ;;  %v3632_v29 = vpop.eup %3631  ;;  %v1886_v35 = vmul.f32 %v3630_v55, %v4895_v51 }
 0x707   : > { %v1898_v57 = vpack.c.bf16 %v1882_v49, %v1882_v49  ;;  %3633 = vrcp.f32 %v1841_v1  ;;  %v1885_v30 = vmul.f32 %v3632_v29, %v4882_v20 }
 0x708   : > { %v1902_v27 = vpack.c.bf16 %v1886_v35, %v1886_v35 }
 0x709   : > { %v1992_v19 = vunpack.c.l.b16 %v1898_v57  ;;  %v1901_v22 = vpack.c.bf16 %v1885_v30, %v1885_v30 }
 0x70a   : > { %v2033_v56 = vunpack.c.l.b16 %v1902_v27 }
 0x70b   : > { %v1995_v42 = vpack.c.b16 %v1992_v19, %v1991_v58  ;;  %v2032_v39 = vunpack.c.l.b16 %v1901_v22 }
 0x70d   : > { %3167 = vmatmul.msk.bf16.vlgmr.msrb.gmra.mxu2 %vm402_vm0, %v1995_v42  ;;  %v3634_v32 = vpop.eup %3633 }
 0x70e   : > { %v1844_v53 = vpop.xlane.xlu0 %1843  ;;  %v1883_v26 = vmul.f32 %v3634_v32, %v4902_v8  ;;  %v2039_v3 = vpop.permute.xlu2 %2038 }
 0x70f   : > { %3635 = vrcp.f32 %v1844_v53 }
 0x710   : > { %3173 = vmatmul.msk.bf16.vlgmr.msra.gmra.mxu1 %vm522_vm1, %v2109_v40  ;;  %v1899_v28 = vpack.c.bf16 %v1883_v26, %v1883_v26  ;;  %v2036_v40 = vpack.c.b16 %v2033_v56, %v2032_v39 }
 0x712   : > { %v1993_v25 = vunpack.c.l.b16 %v1899_v28 }
 0x715   : > { %v3636_v60 = vpop.eup %3635  ;;  %v2041_v50 = vpop.permute.xlu1 %2040 }
 0x716   : > { %v1884_v33 = vmul.f32 %v3636_v60, %v4906_v2  ;;  %2056 = vmatpush.bf16.msrb.mxu3 %v2041_v50  ;;  %v4991_v50 = vld [vmem:[#allocation7 + $0x60] sm:$0xff] }
 0x718   : > { %v1900_v62 = vpack.c.bf16 %v1884_v33, %v1884_v33 }
 0x71a   : > { %v1994_v51 = vunpack.c.l.b16 %v1900_v62  ;;  %2057 = vmatpush.bf16.msrb.mxu3 %v2039_v3 }
 0x71c   : > { %v1996_v44 = vpack.c.b16 %v1994_v51, %v1993_v25 }
 0x71d   : > { %3169 = vmatmul.msk.bf16.vlgmr.msrb.gmra.mxu3 %vm402_vm0, %v2036_v40  ;;  %v2148_v20 = vpop.permute.xlu1 %2147  ;;  %v4999_v40 = vld [vmem:[#allocation7 + $0x68] sm:$0xff] }
 0x71e   : > { %3168 = vmatmul.msk.bf16.gmra.mxu2 %vm402_vm0, %v1996_v44 }
 0x721   : > { %v2111_v8 = vpop.permute.xlu0 %2110 }
 0x722   : > { %3174 = vmatmul.msk.bf16.gmra.mxu1 %vm522_vm1, %v2111_v8  ;;  %v5003_v8 = vld [vmem:[#allocation7 + $0x70] sm:$0xff] }
 0x725   : > { %v2150_v2 = vpop.permute.xlu1 %2149 }
 0x72d   : > { %v2193_v48 = vpop.permute.xlu1 %2192 }
 0x72e   : > { %3175 = vmatmul.msk.bf16.vlgmr.msra.gmra.mxu2 %vm522_vm1, %v2148_v20  ;;  %v2204_v23 = vsel %vm522_vm1, %v2193_v48, 0 }
 0x72f   : > { %2212 = vmatpush.bf16.xpose.msra.mxu3 %v2204_v23 }
 0x735   : > { %v2191_v15 = vpop.permute.xlu1 %2190 }
 0x736   : > { %v2201_v49 = vsel %vm522_vm1, %v2191_v15, 0 }
 0x737   : > { %v4974_v1 = vpop.f32.mrf.mxu0  ;;  %2213 = vmatpush.bf16.xpose.msra.mxu3 %v2201_v49 }
 0x73d   : > { %v2430_v57 = vpop.permute.xlu1 %2429 }
 0x73e   : > { %3176 = vmatmul.msk.bf16.gmra.mxu2 %vm522_vm1, %v2150_v2  ;;  %2445 = vmatpush.bf16.msrb.mxu0 %v2430_v57 }
 0x73f   : > { %v4977_v58 = vpop.f32.mrf.mxu0  ;;  %v4979_v19 = vpop.f32.mrf.mxu1 }
 0x747   : > { %v1856_v42 = vpop.xlane.xlu2 %1855  ;;  %v4981_v55 = vpop.f32.mrf.mxu0 }
 0x748   : > { %3637 = vrcp.f32 %v1856_v42  ;;  %v4983_v29 = vpop.f32.mrf.mxu1 }
 0x74c   : > { %v1853_v32 = vpop.xlane.xlu0 %1852 }
 0x74d   : > { %3639 = vrcp.f32 %v1853_v32 }
 0x74e   : > { %v3638_v35 = vpop.eup %3637 }
 0x74f   : > { %v1888_v30 = vmul.f32 %v3638_v35, %v4939_v59  ;;  %v2189_v26 = vpop.permute.xlu2 %2188  ;;  %v4988_v27 = vpop.f32.mrf.mxu0 }
 0x751   : > { %v1904_v22 = vpack.c.bf16 %v1888_v30, %v1888_v30 }
 0x753   : > { %v3640_v60 = vpop.eup %3639  ;;  %v2035_v56 = vunpack.c.l.b16 %v1904_v22 }
 0x754   : > { %v1887_v28 = vmul.f32 %v3640_v60, %v4943_v12 }
 0x756   : > { %v1903_v33 = vpack.c.bf16 %v1887_v28, %v1887_v28 }
 0x757   : > { %v2428_v39 = vpop.permute.xlu2 %2427  ;;  %v2098_v25 = vpop.f32.mrf.mxu0 }
 0x758   : > { %v2034_v62 = vunpack.c.l.b16 %v1903_v33  ;;  %v4994_v3 = vadd.f32 %v2098_v25, %v4991_v50  ;;  %2446 = vmatpush.bf16.msrb.mxu0 %v2428_v39 }
 0x75a   : > { %v2037_v51 = vpack.c.b16 %v2035_v56, %v2034_v62  ;;  %v2225_v59 = vsel %vm402_vm0, %v4994_v3, -inf }
 0x75b   : > { %2226 = vmax.xlane.f32.xlu1 %v2225_v59 }
 0x75c   : > { %3170 = vmatmul.msk.bf16.gmra.mxu3 %vm402_vm0, %v2037_v51 }
 0x75f   : > { %v2100_v12 = vpop.f32.mrf.mxu0  ;;  %v2187_v23 = vpop.permute.xlu0 %2186 }
 0x760   : > { %v2101_v44 = vadd.f32 %v2100_v12, %v4999_v40  ;;  %v5043_v12 = vld [vmem:[#allocation7 + $0x78] sm:$0xff] }
 0x762   : > { %v2228_v20 = vsel %vm402_vm0, %v2101_v44, -inf }
 0x763   : > { %2229 = vmax.xlane.f32.xlu0 %v2228_v20 }
 0x767   : > { %v2103_v2 = vpop.f32.mrf.mxu0 }
 0x768   : > { %v5006_v48 = vadd.f32 %v2103_v2, %v5003_v8 }
 0x76a   : > { %v2231_v15 = vsel %vm402_vm0, %v5006_v48, -inf }
 0x76b   : > { %2232 = vmax.xlane.f32.xlu2 %v2231_v15 }
 0x76c   : > { %3177 = vmatmul.msk.bf16.vlgmr.msra.gmra.mxu3 %vm522_vm1, %v2187_v23 }
 0x76f   : > { %v2105_v20 = vpop.f32.mrf.mxu0 }
 0x770   : > { %v5046_v2 = vadd.f32 %v2105_v20, %v5043_v12 }
 0x77c   : > { %3178 = vmatmul.msk.bf16.gmra.mxu3 %vm522_vm1, %v2189_v26 }
 0x77d   : > { %v5012_v49 = vpop.f32.mrf.mxu1 }
 0x785   : > { %v5014_v57 = vpop.f32.mrf.mxu1 }
 0x78d   : > { %v2137_v32 = vpop.f32.mrf.mxu1 }
 0x78e   : > { %v5019_v35 = vadd.f32 %v2137_v32, %v4991_v50 }
 0x790   : > { %v5021_v30 = vpop.f32.mrf.mxu2  ;;  %v2237_v60 = vsel %vm402_vm0, %v5019_v35, -inf }
 0x791   : > { %2238 = vmax.xlane.f32.xlu1 %v2237_v60 }
 0x795   : > { %v2139_v22 = vpop.f32.mrf.mxu1 }
 0x796   : > { %v5026_v26 = vadd.f32 %v2139_v22, %v4999_v40 }
 0x798   : > { %v5028_v28 = vpop.f32.mrf.mxu2  ;;  %v2240_v33 = vsel %vm402_vm0, %v5026_v26, -inf }
 0x799   : > { %2241 = vmax.xlane.f32.xlu0 %v2240_v33 }
 0x79f   : > { %v2142_v62 = vpop.f32.mrf.mxu1 }
 0x7a0   : > { %v5035_v39 = vadd.f32 %v2142_v62, %v5003_v8  ;;  %v5039_v51 = vpop.f32.mrf.mxu3 }
 0x7a1   : > { %v5037_v25 = vpop.f32.mrf.mxu2  ;;  %5490 = vst [vmem:[#allocation29_spill] sm:$0xff] %v5039_v51 }
 0x7a2   : > { %v2243_v59 = vsel %vm402_vm0, %v5035_v39, -inf }
 0x7a3   : > { %2244 = vmax.xlane.f32.xlu1 %v2243_v59  ;;  %v2234_v59 = vsel %vm402_vm0, %v5046_v2, -inf }
 0x7a7   : > { %v2144_v23 = vpop.f32.mrf.mxu1 }
 0x7a8   : > { %v5049_v15 = vadd.f32 %v2144_v23, %v5043_v12  ;;  %v5053_v60 = vpop.f32.mrf.mxu3 }
 0x7a9   : > { %v5051_v32 = vpop.f32.mrf.mxu2  ;;  %5491 = vst [vmem:[#allocation30_spill] sm:$0xff] %v5053_v60 }
 0x7aa   : > { %v2246_v62 = vsel %vm402_vm0, %v5049_v15, -inf }
 0x7ab   : > { %2247 = vmax.xlane.f32.xlu2 %v2246_v62  ;;  %2235 = vmax.xlane.f32.xlu1 %v2234_v59 }
 0x7b1   : > { %v2176_v20 = vpop.f32.mrf.mxu2 }
 0x7b2   : > { %v5064_v23 = vadd.f32 %v2176_v20, %v4991_v50 }
 0x7b4   : > { %v2249_v56 = vsel %vm402_vm0, %v5064_v23, -inf }
 0x7b5   : > { %2250 = vmax.xlane.f32.xlu2 %v2249_v56 }
 0x7b9   : > { %v2178_v22 = vpop.f32.mrf.mxu2 }
 0x7c1   : > { %v2181_v42 = vpop.f32.mrf.mxu2 }
 0x7c9   : > { %v2183_v53 = vpop.f32.mrf.mxu2 }
 0x7ca   : > { %v5069_v33 = vadd.f32 %v2183_v53, %v5043_v12 }
 0x7cc   : > { %v2258_v16 = vsel %vm402_vm0, %v5069_v33, -inf }
 0x7cd   : > { %2259 = vmax.xlane.f32.xlu1 %v2258_v16 }
 0x7d6   : > { %v2230_v62 = vpop.xlane.xlu0 %2229 }
 0x7d7   : > { %v2274_v59 = vsub.f32 %v2101_v44, %v2230_v62  ;;  %v5089_v44 = vadd.f32 %v2178_v22, %v4999_v40 }
 0x7d9   : > { %v2291_v31 = vmul.f32 1.442695, %v2274_v59  ;;  %v2252_v62 = vsel %vm402_vm0, %v5089_v44, -inf }
 0x7db   : > { %3641 = vpow2.f32 %v2291_v31 }
 0x7df   : > { %v5073_v20 = vpop.f32.mrf.mxu3 }
 0x7e0   : > { %5492 = vst [vmem:[#allocation31_spill] sm:$0xff] %v5073_v20  ;;  %v5102_v20 = vadd.f32 %v2181_v42, %v5003_v8 }
 0x7e1   : > { %v5075_v21 = vpop.eup %3641 }
 0x7e2   : > { %v2324_v56 = vsel %vm402_vm0, %v5075_v21, 0.0 }
 0x7e3   : > { %2325 = vadd.xlane.f32.xlu1 %v2324_v56  ;;  %v2227_v56 = vpop.xlane.xlu1 %2226 }
 0x7e7   : > { %v5079_v9 = vpop.f32.mrf.mxu3 }
 0x7e8   : > { %5493 = vst [vmem:[#allocation32_spill] sm:$0xff] %v5079_v9 }
 0x7ef   : > { %v2215_v24 = vpop.f32.mrf.mxu3 }
 0x7f0   : > { %v5084_v16 = vadd.f32 %v2215_v24, %v4991_v50  ;;  %v2273_v24 = vsub.f32 %v4994_v3, %v2227_v56  ;;  %v2233_v3 = vpop.xlane.xlu2 %2232 }
 0x7f1   : > { %v2275_v42 = vsub.f32 %v5006_v48, %v2233_v3 }
 0x7f2   : > { %v2261_v31 = vsel %vm402_vm0, %v5084_v16, -inf  ;;  %v2289_v22 = vmul.f32 1.442695, %v2273_v24 }
 0x7f3   : > { %2262 = vmax.xlane.f32.xlu0 %v2261_v31 }
 0x7f4   : > { %3643 = vpow2.f32 %v2289_v22  ;;  %v2293_v22 = vmul.f32 1.442695, %v2275_v42 }
 0x7f7   : > { %v2217_v59 = vpop.f32.mrf.mxu3 }
 0x7f8   : > { %v5096_v53 = vadd.f32 %v2217_v59, %v4999_v40 }
 0x7fa   : > { %v2264_v50 = vsel %vm402_vm0, %v5096_v53, -inf  ;;  %v5108_v56 = vpop.eup %3643 }
 0x7fb   : > { %2253 = vmax.xlane.f32.xlu0 %v2252_v62 }
 0x7fc   : > { %2468 = vrot.lane.b32.xlu1 %v4119_v13, %s3918_s16  ;;  %v2255_v13 = vsel %vm402_vm0, %v5102_v20, -inf }
 0x7ff   : > { %v2220_v42 = vpop.f32.mrf.mxu3 }
 0x803   : > { %2265 = vmax.xlane.f32.xlu0 %v2264_v50 }
 0x804   : > { %v2239_v31 = vpop.xlane.xlu1 %2238 }
 0x805   : > { %v2277_v62 = vsub.f32 %v5019_v35, %v2239_v31 }
 0x807   : > { %v2297_v9 = vmul.f32 1.442695, %v2277_v62 }
 0x809   : > { %3645 = vpow2.f32 %v2297_v9  ;;  %v2321_v9 = vsel %vm402_vm0, %v5108_v56, 0.0 }
 0x80b   : > { %2256 = vmax.xlane.f32.xlu0 %v2255_v13 }
 0x80c   : > { %v2242_v40 = vpop.xlane.xlu0 %2241 }
 0x80d   : > { %v2278_v59 = vsub.f32 %v5026_v26, %v2242_v40 }
 0x80f   : > { %v5110_v24 = vpop.eup %3645  ;;  %v2299_v50 = vmul.f32 1.442695, %v2278_v59 }
 0x810   : > { %v2333_v35 = vsel %vm402_vm0, %v5110_v24, 0.0 }
 0x811   : > { %3647 = vpow2.f32 %v2299_v50  ;;  %2334 = vadd.xlane.f32.xlu2 %v2333_v35 }
 0x812   : > { %3649 = vpow2.f32 %v2293_v22 }
 0x813   : > { %2322 = vadd.xlane.f32.xlu0 %v2321_v9 }
 0x816   : > { %v2245_v31 = vpop.xlane.xlu1 %2244 }
 0x817   : > { %v2279_v26 = vsub.f32 %v5035_v39, %v2245_v31  ;;  %v5118_v62 = vpop.eup %3647  ;;  %v5132_v31 = vadd.f32 %v2220_v42, %v5003_v8 }
 0x818   : > { %v2336_v48 = vsel %vm402_vm0, %v5118_v62, 0.0  ;;  %v5122_v3 = vpop.eup %3649 }
 0x819   : > { %v2301_v13 = vmul.f32 1.442695, %v2279_v26  ;;  %v2327_v39 = vsel %vm402_vm0, %v5122_v3, 0.0 }
 0x81b   : > { %3651 = vpow2.f32 %v2301_v13  ;;  %2337 = vadd.xlane.f32.xlu0 %v2336_v48  ;;  %v2267_v48 = vsel %vm402_vm0, %v5132_v31, -inf }
 0x81e   : > { %v2236_v40 = vpop.xlane.xlu1 %2235  ;;  %v2248_v50 = vpop.xlane.xlu2 %2247 }
 0x81f   : > { %v2276_v59 = vsub.f32 %v5046_v2, %v2236_v40  ;;  %v2222_v40 = vpop.f32.mrf.mxu3 }
 0x821   : > { %v5125_v35 = vpop.eup %3651  ;;  %v2295_v9 = vmul.f32 1.442695, %v2276_v59 }
 0x822   : > { %v2339_v22 = vsel %vm402_vm0, %v5125_v35, 0.0 }
 0x823   : > { %2328 = vadd.xlane.f32.xlu0 %v2327_v39  ;;  %2340 = vadd.xlane.f32.xlu2 %v2339_v22  ;;  %3653 = vpow2.f32 %v2295_v9  ;;  %v5142_v9 = vadd.f32 %v2222_v40, %v5043_v12 }
 0x825   : > { %v2270_v8 = vsel %vm402_vm0, %v5142_v9, -inf }
 0x828   : > { %v2251_v26 = vpop.xlane.xlu2 %2250 }
 0x829   : > { %v2281_v2 = vsub.f32 %v5064_v23, %v2251_v26  ;;  %v5135_v13 = vpop.eup %3653 }
 0x82a   : > { %v2330_v51 = vsel %vm402_vm0, %v5135_v13, 0.0 }
 0x82b   : > { %v2305_v59 = vmul.f32 1.442695, %v2281_v2  ;;  %2268 = vmax.xlane.f32.xlu2 %v2267_v48  ;;  %2331 = vadd.xlane.f32.xlu0 %v2330_v51  ;;  %v2280_v51 = vsub.f32 %v5049_v15, %v2248_v50 }
 0x82d   : > { %3655 = vpow2.f32 %v2305_v59  ;;  %v2303_v12 = vmul.f32 1.442695, %v2280_v51 }
 0x82f   : > { %3657 = vpow2.f32 %v2303_v12 }
 0x833   : > { %v5146_v23 = vpop.eup %3655  ;;  %2271 = vmax.xlane.f32.xlu2 %v2270_v8 }
 0x834   : > { %v2345_v42 = vsel %vm402_vm0, %v5146_v23, 0.0 }
 0x835   : > { %2346 = vadd.xlane.f32.xlu1 %v2345_v42  ;;  %v5155_v39 = vpop.eup %3657 }
 0x836   : > { %v2342_v26 = vsel %vm402_vm0, %v5155_v39, 0.0 }
 0x83f   : > { %2470 = vrot.lane.b32.xlu0 %v4109_v54, %s3918_s16 }
 0x840   : > { %v2260_v54 = vpop.xlane.xlu1 %2259 }
 0x841   : > { %v2284_v15 = vsub.f32 %v5069_v33, %v2260_v54 }
 0x843   : > { %v2311_v51 = vmul.f32 1.442695, %v2284_v15 }
 0x84b   : > { %2511 = vrot.lane.b32.xlu2 %v4117_v11, %s3918_s16 }
 0x856   : > { %v2326_v12 = vpop.xlane.xlu1 %2325 }
 0x866   : > { %v2263_v22 = vpop.xlane.xlu0 %2262 }
 0x869   : > { %2343 = vadd.xlane.f32.xlu0 %v2342_v26 }
 0x86e   : > { %v2254_v2 = vpop.xlane.xlu0 %2253 }
 0x86f   : > { %v2282_v48 = vsub.f32 %v5089_v44, %v2254_v2 }
 0x871   : > { %v2307_v40 = vmul.f32 1.442695, %v2282_v48 }
 0x873   : > { %3659 = vpow2.f32 %v2307_v40 }
 0x876   : > { %v2266_v59 = vpop.xlane.xlu0 %2265 }
 0x877   : > { %v2286_v11 = vsub.f32 %v5096_v53, %v2266_v59 }
 0x879   : > { %v5162_v50 = vpop.eup %3659  ;;  %v2315_v8 = vmul.f32 1.442695, %v2286_v11 }
 0x87a   : > { %v2348_v42 = vsel %vm402_vm0, %v5162_v50, 0.0 }
 0x87b   : > { %3661 = vpow2.f32 %v2315_v8  ;;  %2349 = vadd.xlane.f32.xlu2 %v2348_v42 }
 0x87c   : > { %3663 = vpow2.f32 %v2311_v51 }
 0x87d   : > { %2509 = vrot.lane.b32.xlu0 %v4129_v18, %s3918_s16  ;;  %3665 = vrcp.f32 %v2326_v12 }
 0x87e   : > { %v2257_v44 = vpop.xlane.xlu0 %2256 }
 0x87f   : > { %v2283_v26 = vsub.f32 %v5102_v20, %v2257_v44 }
 0x881   : > { %v5169_v53 = vpop.eup %3661  ;;  %v2309_v33 = vmul.f32 1.442695, %v2283_v26 }
 0x882   : > { %v2360_v2 = vsel %vm402_vm0, %v5169_v53, 0.0  ;;  %v5173_v48 = vpop.eup %3663 }
 0x883   : > { %3667 = vpow2.f32 %v2309_v33  ;;  %2361 = vadd.xlane.f32.xlu1 %v2360_v2  ;;  %v3666_v54 = vpop.eup %3665  ;;  %v2354_v11 = vsel %vm402_vm0, %v5173_v48, 0.0 }
 0x884   : > { %v2386_v18 = vmul.f32 %v3666_v54, %v5075_v21  ;;  %v2335_v42 = vpop.xlane.xlu2 %2334  ;;  %v2285_v21 = vsub.f32 %v5084_v16, %v2263_v22 }
 0x886   : > { %v2323_v40 = vpop.xlane.xlu0 %2322  ;;  %v2402_v8 = vpack.c.bf16 %v2386_v18, %v2386_v18  ;;  %v2313_v60 = vmul.f32 1.442695, %v2285_v21 }
 0x887   : > { %3669 = vrcp.f32 %v2323_v40 }
 0x888   : > { %v2422_v26 = vunpack.c.l.b16 %v2402_v8 }
 0x889   : > { %v5175_v59 = vpop.eup %3667 }
 0x88a   : > { %v2351_v20 = vsel %vm402_vm0, %v5175_v59, 0.0 }
 0x88b   : > { %2352 = vadd.xlane.f32.xlu2 %v2351_v20  ;;  %2355 = vadd.xlane.f32.xlu1 %v2354_v11 }
 0x88d   : > { %v3670_v15 = vpop.eup %3669 }
 0x88e   : > { %v2385_v51 = vmul.f32 %v3670_v15, %v5108_v56  ;;  %v2338_v12 = vpop.xlane.xlu0 %2337 }
 0x890   : > { %v2401_v44 = vpack.c.bf16 %v2385_v51, %v2385_v51 }
 0x892   : > { %v2421_v33 = vunpack.c.l.b16 %v2401_v44 }
 0x894   : > { %v2425_v2 = vpack.c.b16 %v2422_v26, %v2421_v33 }
 0x896   : > { %v2329_v40 = vpop.xlane.xlu0 %2328  ;;  %v2341_v54 = vpop.xlane.xlu2 %2340  ;;  %3179 = vmatmul.msk.bf16.vlgmr.msrb.gmra.mxu0 %vm402_vm0, %v2425_v2 }
 0x897   : > { %3671 = vrcp.f32 %v2329_v40 }
 0x898   : > { %3673 = vpow2.f32 %v2313_v60 }
 0x89d   : > { %v3672_v18 = vpop.eup %3671 }
 0x89e   : > { %v2269_v20 = vpop.xlane.xlu2 %2268  ;;  %v2332_v11 = vpop.xlane.xlu0 %2331  ;;  %v2387_v56 = vmul.f32 %v3672_v18, %v5122_v3  ;;  %v3332_v3 = vpack.i.bf16 %v4977_v58, %v4974_v1 }
 0x89f   : > { %3675 = vrcp.f32 %v2332_v11  ;;  %v5188_v15 = vpop.eup %3673 }
 0x8a0   : > { %3677 = vrcp.f32 %v2338_v12  ;;  %v2357_v8 = vsel %vm402_vm0, %v5188_v15, 0.0  ;;  %v2403_v12 = vpack.c.bf16 %v2387_v56, %v2387_v56 }
 0x8a1   : > { %3679 = vrcp.f32 %v2335_v42 }
 0x8a3   : > { %2550 = vrot.lane.b32.xlu2 %v4115_v6, %s3918_s16 }
 0x8a4   : > { %2552 = vrot.lane.b32.xlu1 %v4127_v17, %s3918_s16  ;;  %v2423_v17 = vunpack.c.l.b16 %v2403_v12  ;;  %v3347_v12 = vpack.i.bf16 %v4988_v27, %v4981_v55  ;;  %s2941_s16 = scalar_lea.sflag [#allocation4], %s4076_s18 }
 0x8a5   : > { %v3676_v16 = vpop.eup %3675 }
 0x8a6   : > { %v2272_v22 = vpop.xlane.xlu2 %2271  ;;  %v2388_v51 = vmul.f32 %v3676_v16, %v5135_v13  ;;  %v3678_v6 = vpop.eup %3677 }
 0x8a7   : > { %v2288_v60 = vsub.f32 %v5142_v9, %v2272_v22  ;;  %2358 = vadd.xlane.f32.xlu0 %v2357_v8  ;;  %v3680_v33 = vpop.eup %3679  ;;  %v2390_v42 = vmul.f32 %v3678_v6, %v5118_v62  ;;  %v2469_v16 = vpop.permute.xlu1 %2468  ;;  %v3327_v8 = vpack.i.bf16 %v4691_v14, %v4687_v45 }
 0x8a8   : > { %v2404_v26 = vpack.c.bf16 %v2388_v51, %v2388_v51  ;;  %v2389_v13 = vmul.f32 %v3680_v33, %v5110_v24  ;;  %v2287_v24 = vsub.f32 %v5132_v31, %v2269_v20  ;;  %v5494_v31 = vpack.i.bf16 %v4693_v7, %v4689_v61 }
 0x8a9   : > { %v2319_v44 = vmul.f32 1.442695, %v2288_v60  ;;  %v2406_v40 = vpack.c.bf16 %v2390_v42, %v2390_v42  ;;  %v5495_v20 = vpack.i.bf16 %v4738_v36, %v4732_v63  ;;  %v5496_v61 = vpack.i.bf16 %v4983_v29, %v4979_v19 }
 0x8aa   : > { %v2424_v9 = vunpack.c.l.b16 %v2404_v26  ;;  %v2405_v58 = vpack.c.bf16 %v2389_v13, %v2389_v13  ;;  %v2317_v60 = vmul.f32 1.442695, %v2287_v24 }
 0x8ab   : > { %3681 = vpow2.f32 %v2319_v44  ;;  %3333 = vrot.lane.b32.xlu2 %v3332_v3, %s3919_s20  ;;  %v2463_v56 = vunpack.c.l.b16 %v2406_v40 }
 0x8ac   : > { %v2426_v2 = vpack.c.b16 %v2424_v9, %v2423_v17  ;;  %v2462_v62 = vunpack.c.l.b16 %v2405_v58  ;;  %3683 = vpow2.f32 %v2317_v60 }
 0x8ad   : > { %3685 = vrcp.f32 %v2341_v54 }
 0x8ae   : > { %v2512_v21 = vpop.permute.xlu2 %2511  ;;  %3180 = vmatmul.msk.bf16.gmra.mxu0 %vm402_vm0, %v2426_v2  ;;  %v2466_v22 = vpack.c.b16 %v2463_v56, %v2462_v62 }
 0x8af   : > { %2527 = vmatpush.bf16.msrb.mxu2 %v2512_v21  ;;  %v2347_v26 = vpop.xlane.xlu1 %2346 }
 0x8b1   : > { %v5202_v1 = vpop.eup %3681  ;;  %v2471_v11 = vpop.permute.xlu0 %2470 }
 0x8b2   : > { %v2366_v18 = vsel %vm402_vm0, %v5202_v1, 0.0  ;;  %2486 = vmatpush.bf16.msrb.mxu1 %v2471_v11  ;;  %v5211_v51 = vpop.eup %3683 }
 0x8b3   : > { %2367 = vadd.xlane.f32.xlu0 %v2366_v18  ;;  %v2363_v6 = vsel %vm402_vm0, %v5211_v51, 0.0  ;;  %v3686_v14 = vpop.eup %3685 }
 0x8b4   : > { %v2391_v55 = vmul.f32 %v3686_v14, %v5125_v35 }
 0x8b6   : > { %2487 = vmatpush.bf16.msrb.mxu1 %v2469_v16  ;;  %v2407_v3 = vpack.c.bf16 %v2391_v55, %v2391_v55 }
 0x8b8   : > { %v2464_v7 = vunpack.c.l.b16 %v2407_v3  ;;  %v3342_v3 = vpack.i.bf16 %v4700_v5, %v4697_v43 }
 0x8b9   : > { %3181 = vmatmul.msk.bf16.vlgmr.msrb.gmra.mxu1 %vm402_vm0, %v2466_v22 }
 0x8c7   : > { %3328 = vrot.lane.b32.xlu0 %v3327_v8, %s3920_s27 }
 0x8ce   : > { %2364 = vadd.xlane.f32.xlu1 %v2363_v6 }
 0x8cf   : > { %3348 = vrot.lane.b32.xlu0 %v3347_v12, %s3919_s20 }
 0x8d7   : > { %3358 = vrot.lane.b32.xlu0 %v5494_v31, %s3920_s27 }
 0x8dc   : > { %v2344_v45 = vpop.xlane.xlu0 %2343 }
 0x8dd   : > { %3687 = vrcp.f32 %v2344_v45 }
 0x8de   : > { %3689 = vrcp.f32 %v2347_v26 }
 0x8df   : > { %3373 = vrot.lane.b32.xlu0 %v5495_v20, %s3920_s27 }
 0x8e3   : > { %v3688_v27 = vpop.eup %3687 }
 0x8e4   : > { %v2392_v44 = vmul.f32 %v3688_v27, %v5155_v39  ;;  %v3690_v36 = vpop.eup %3689 }
 0x8e5   : > { %v2393_v39 = vmul.f32 %v3690_v36, %v5146_v23 }
 0x8e6   : > { %v2408_v33 = vpack.c.bf16 %v2392_v44, %v2392_v44 }
 0x8e7   : > { %3363 = vrot.lane.b32.xlu1 %v5496_v61, %s3919_s20  ;;  %v2409_v42 = vpack.c.bf16 %v2393_v39, %v2393_v39 }
 0x8e8   : > { %v2465_v54 = vunpack.c.l.b16 %v2408_v33 }
 0x8e9   : > { %v2503_v29 = vunpack.c.l.b16 %v2409_v42 }
 0x8ea   : > { %v2467_v17 = vpack.c.b16 %v2465_v54, %v2464_v7 }
 0x8ec   : > { %3182 = vmatmul.msk.bf16.gmra.mxu1 %vm402_vm0, %v2467_v17 }
 0x8ee   : > { %v2350_v63 = vpop.xlane.xlu2 %2349 }
 0x8ef   : > { %3691 = vrcp.f32 %v2350_v63  ;;  %v2510_v35 = vpop.permute.xlu0 %2509 }
 0x8f0   : > { %2528 = vmatpush.bf16.msrb.mxu2 %v2510_v35 }
 0x8f5   : > { %v3692_v9 = vpop.eup %3691 }
 0x8f6   : > { %v2394_v2 = vmul.f32 %v3692_v9, %v5162_v50  ;;  %v2362_v13 = vpop.xlane.xlu1 %2361 }
 0x8f8   : > { %v2410_v19 = vpack.c.bf16 %v2394_v2, %v2394_v2  ;;  %v5497_v2 = vpack.i.bf16 %v5014_v57, %v5012_v49  ;;  %v3221_v49 = vld [vmem:[#allocation8] sm:$0xff]  ;;  %v5500_v57 = vpack.i.bf16 %v4757_v38, %v4744_v47 }
 0x8fa   : > { %v2504_v21 = vunpack.c.l.b16 %v2410_v19 }
 0x8fc   : > { %v2507_v40 = vpack.c.b16 %v2504_v21, %v2503_v29 }
 0x8fe   : > { %v2353_v58 = vpop.xlane.xlu2 %2352  ;;  %3183 = vmatmul.msk.bf16.vlgmr.msrb.gmra.mxu2 %vm402_vm0, %v2507_v40  ;;  %v2356_v11 = vpop.xlane.xlu1 %2355  ;;  %v5498_v40 = vpack.i.bf16 %v4749_v52, %v4742_v41 }
 0x8ff   : > { %3693 = vrcp.f32 %v2353_v58  ;;  %v5501_v58 = vpack.i.bf16 %v4788_v4, %v4784_v0 }
 0x900   : > { %3695 = vrcp.f32 %v2356_v11 }
 0x901   : > { %3697 = vrcp.f32 %v2362_v13 }
 0x905   : > { %v3694_v18 = vpop.eup %3693 }
 0x906   : > { %v3696_v56 = vpop.eup %3695  ;;  %v2395_v16 = vmul.f32 %v3694_v18, %v5175_v59  ;;  %v2551_v6 = vpop.permute.xlu2 %2550 }
 0x907   : > { %v2396_v23 = vmul.f32 %v3696_v56, %v5173_v48  ;;  %v3698_v14 = vpop.eup %3697 }
 0x908   : > { %v2411_v62 = vpack.c.bf16 %v2395_v16, %v2395_v16  ;;  %v2398_v48 = vmul.f32 %v3698_v14, %v5169_v53 }
 0x909   : > { %v2412_v22 = vpack.c.bf16 %v2396_v23, %v2396_v23 }
 0x90a   : > { %v2505_v50 = vunpack.c.l.b16 %v2411_v62  ;;  %v2414_v55 = vpack.c.bf16 %v2398_v48, %v2398_v48  ;;  %v5504_v48 = vld [vmem:[#allocation30_spill] sm:$0xff] }
 0x90b   : > { %v2506_v24 = vunpack.c.l.b16 %v2412_v22 }
 0x90c   : > { %v2545_v26 = vunpack.c.l.b16 %v2414_v55  ;;  %v5507_v55 = vld [vmem:[#allocation24_spill] sm:$0xff] }
 0x90d   : > { %v2508_v60 = vpack.c.b16 %v2506_v24, %v2505_v50 }
 0x90e   : > { %v3334_v52 = vpop.permute.xlu2 %3333 }
 0x90f   : > { %3184 = vmatmul.msk.bf16.gmra.mxu2 %vm402_vm0, %v2508_v60  ;;  %v3336_v38 = vunpack.i.h.bf16 %v3334_v52  ;;  %v3335_v23 = vunpack.i.l.bf16 %v3334_v52 }
 0x913   : > { %v2448_v8 = vpop.f32.mrf.mxu0 }
 0x916   : > { %v2553_v12 = vpop.permute.xlu1 %2552 }
 0x917   : > { %2568 = vmatpush.bf16.msrb.mxu3 %v2553_v12  ;;  %v5503_v12 = vpack.i.bf16 %v5051_v32, %v5037_v25 }
 0x91a   : > { %v2359_v31 = vpop.xlane.xlu0 %2358 }
 0x91b   : > { %v2450_v45 = vpop.f32.mrf.mxu0  ;;  %2569 = vmatpush.bf16.msrb.mxu3 %v2551_v6  ;;  %3699 = vrcp.f32 %v2359_v31 }
 0x91c   : > { %v3337_v59 = vpack.i.bf16 %v2450_v45, %v2448_v8 }
 0x91e   : > { %3338 = vrot.lane.b32.xlu2 %v3337_v59, %s3921_s8 }
 0x921   : > { %v3700_v20 = vpop.eup %3699 }
 0x922   : > { %v2397_v27 = vmul.f32 %v3700_v20, %v5188_v15  ;;  %v5505_v20 = vld [vmem:[#allocation29_spill] sm:$0xff] }
 0x924   : > { %v2413_v44 = vpack.c.bf16 %v2397_v27, %v2397_v27 }
 0x926   : > { %3343 = vrot.lane.b32.xlu2 %v3342_v3, %s3920_s27  ;;  %v2544_v33 = vunpack.c.l.b16 %v2413_v44  ;;  %v2368_v63 = vpop.xlane.xlu0 %2367  ;;  %v5508_v3 = vld [vmem:[#allocation23_spill] sm:$0xff] }
 0x927   : > { %3701 = vrcp.f32 %v2368_v63 }
 0x928   : > { %v2548_v61 = vpack.c.b16 %v2545_v26, %v2544_v33 }
 0x92a   : > { %3185 = vmatmul.msk.bf16.vlgmr.msrb.gmra.mxu3 %vm402_vm0, %v2548_v61 }
 0x92b   : > { %v2453_v7 = vpop.f32.mrf.mxu0 }
 0x92d   : > { %v3702_v43 = vpop.eup %3701 }
 0x92e   : > { %v2400_v5 = vmul.f32 %v3702_v43, %v5202_v1  ;;  %v3222_v1 = vld [vmem:[#allocation8 + $0x8] sm:$0xff] }
 0x92f   : > { %2881 = vmatpush.bf16.msra.mxu0 %v3222_v1 }
 0x930   : > { %v2416_v9 = vpack.c.bf16 %v2400_v5, %v2400_v5 }
 0x932   : > { %v2547_v19 = vunpack.c.l.b16 %v2416_v9 }
 0x933   : > { %v2455_v54 = vpop.f32.mrf.mxu0  ;;  %2882 = vmatpush.bf16.msra.mxu0 %v3221_v49 }
 0x934   : > { %v3352_v17 = vpack.i.bf16 %v2455_v54, %v2453_v7 }
 0x936   : > { %3353 = vrot.lane.b32.xlu2 %v3352_v17, %s3921_s8  ;;  %v2489_v53 = vpop.f32.mrf.mxu1 }
 0x939   : > { %v3329_v11 = vpop.permute.xlu0 %3328 }
 0x93a   : > { %v3331_v56 = vunpack.i.h.bf16 %v3329_v11  ;;  %v3330_v16 = vunpack.i.l.bf16 %v3329_v11 }
 0x93c   : > { %v2773_v47 = vsel %vm522_vm1, %v4469_v46, %v3330_v16  ;;  %v5502_v46 = vpack.i.bf16 %v5028_v28, %v5021_v30  ;;  %v5506_v30 = vpack.i.bf16 %v5504_v48, %v5505_v20 }
 0x93d   : > { %v2790_v22 = vsel %vm2789_vm2, %v2773_v47, %v3335_v23 }
 0x93e   : > { %v2491_v15 = vpop.f32.mrf.mxu1 }
 0x93f   : > { %v3367_v36 = vpack.i.bf16 %v2491_v15, %v2489_v53 }
 0x941   : > { %v2365_v35 = vpop.xlane.xlu1 %2364  ;;  %3368 = vrot.lane.b32.xlu2 %v3367_v36, %s3921_s8  ;;  %v3349_v28 = vpop.permute.xlu0 %3348  ;;  %v5509_v36 = vld [vmem:[#allocation32_spill] sm:$0xff] }
 0x942   : > { %3703 = vrcp.f32 %v2365_v35  ;;  %v3351_v32 = vunpack.i.h.bf16 %v3349_v28  ;;  %v3350_v44 = vunpack.i.l.bf16 %v3349_v28  ;;  %v5510_v35 = vld [vmem:[#allocation31_spill] sm:$0xff] }
 0x943   : > { %v5511_v43 = vpack.i.bf16 %v5509_v36, %v5510_v35  ;;  %v5332_v28 = vld [vmem:[%s5460_s5] ss:$0 sm:$0xff] }
 0x948   : > { %v3704_v39 = vpop.eup %3703 }
 0x949   : > { %v2399_v42 = vmul.f32 %v3704_v39, %v5211_v51  ;;  %3378 = vrot.lane.b32.xlu2 %v5497_v2, %s3919_s20  ;;  %v5499_v51 = vpack.i.bf16 %v4793_v34, %v4786_v10  ;;  %v2774_v34 = vsel %vm522_vm1, %v4473_v37, %v3331_v56  ;;  %v3359_v5 = vpop.permute.xlu0 %3358 }
 0x94a   : > { %v2791_v50 = vsel %vm2789_vm2, %v2774_v34, %v3336_v38  ;;  %v3361_v2 = vunpack.i.h.bf16 %v3359_v5 }
 0x94b   : > { %v2415_v13 = vpack.c.bf16 %v2399_v42, %v2399_v42 }
 0x94d   : > { %v2546_v29 = vunpack.c.l.b16 %v2415_v13  ;;  %v3360_v13 = vunpack.i.l.bf16 %v3359_v5 }
 0x94f   : > { %v2549_v21 = vpack.c.b16 %v2547_v19, %v2546_v29 }
 0x951   : > { %3186 = vmatmul.msk.bf16.gmra.mxu3 %vm402_vm0, %v2549_v21  ;;  %3388 = vrot.lane.b32.xlu2 %v5498_v40, %s3920_s27 }
 0x959   : > { %3403 = vrot.lane.b32.xlu2 %v5499_v51, %s3920_s27  ;;  %v3364_v39 = vpop.permute.xlu1 %3363  ;;  %v5512_v51 = vld [vmem:[#allocation18_spill] sm:$0xff] }
 0x95a   : > { %v3366_v29 = vunpack.i.h.bf16 %v3364_v39  ;;  %v3365_v21 = vunpack.i.l.bf16 %v3364_v39  ;;  %v2778_v49 = vsel %vm522_vm1, %v5512_v51, %v3361_v2 }
 0x961   : > { %3418 = vrot.lane.b32.xlu2 %v5500_v57, %s3920_s27  ;;  %v5513_v57 = vld [vmem:[#allocation16_spill] sm:$0xff] }
 0x969   : > { %3433 = vrot.lane.b32.xlu2 %v5501_v58, %s3920_s27  ;;  %v2494_v41 = vpop.f32.mrf.mxu1  ;;  %v2777_v58 = vsel %vm522_vm1, %v5513_v57, %v3360_v13 }
 0x96a   : > { %v2794_v52 = vsel %vm2789_vm2, %v2777_v58, %v3365_v21 }
 0x971   : > { %v2496_v18 = vpop.f32.mrf.mxu1 }
 0x972   : > { %v3382_v10 = vpack.i.bf16 %v2496_v18, %v2494_v41  ;;  %v2795_v41 = vsel %vm2789_vm2, %v2778_v49, %v3366_v29  ;;  %v5519_v49 = vld [vmem:[#allocation19_spill] sm:$0xff] }
 0x974   : > { %3383 = vrot.lane.b32.xlu0 %v3382_v10, %s3921_s8 }
 0x978   : > { %v3339_v0 = vpop.permute.xlu2 %3338 }
 0x979   : > { %v3341_v4 = vunpack.i.h.bf16 %v3339_v0  ;;  %v3340_v62 = vunpack.i.l.bf16 %v3339_v0  ;;  %v3374_v0 = vpop.permute.xlu0 %3373 }
 0x97b   : > { %v2808_v24 = vsel %vm2806_vm3, %v2791_v50, %v3341_v4  ;;  %v2807_v60 = vsel %vm2806_vm3, %v2790_v22, %v3340_v62  ;;  %v3376_v62 = vunpack.i.h.bf16 %v3374_v0  ;;  %v3375_v22 = vunpack.i.l.bf16 %v3374_v0 }
 0x97c   : > { %v2823_v8 = vpack.c.bf16 %v2808_v24, %v2807_v60  ;;  %3393 = vrot.lane.b32.xlu0 %v5502_v46, %s3919_s20 }
 0x97e   : > { %3195 = vmatmul.msk.bf16.vlgmr.msra.gmra.mxu0 %vm402_vm0, %v2823_v8  ;;  %v5514_v8 = vld [vmem:[#allocation22_spill] sm:$0xff] }
 0x97f   : > { %v2780_v46 = vsel %vm522_vm1, %v5514_v8, %v3376_v62 }
 0x980   : > { %v3344_v6 = vpop.permute.xlu2 %3343 }
 0x981   : > { %v2530_v37 = vpop.f32.mrf.mxu2  ;;  %v3346_v14 = vunpack.i.h.bf16 %v3344_v6  ;;  %v3345_v59 = vunpack.i.l.bf16 %v3344_v6 }
 0x983   : > { %v2776_v27 = vsel %vm522_vm1, %v5507_v55, %v3346_v14  ;;  %v2775_v25 = vsel %vm522_vm1, %v5508_v3, %v3345_v59 }
 0x984   : > { %3408 = vrot.lane.b32.xlu0 %v5503_v12, %s3919_s20  ;;  %v2792_v54 = vsel %vm2789_vm2, %v2775_v25, %v3350_v44  ;;  %v2793_v17 = vsel %vm2789_vm2, %v2776_v27, %v3351_v32 }
 0x989   : > { %v2532_v31 = vpop.f32.mrf.mxu2 }
 0x98a   : > { %v3397_v45 = vpack.i.bf16 %v2532_v31, %v2530_v37  ;;  %v5515_v37 = vld [vmem:[#allocation20_spill] sm:$0xff] }
 0x98b   : > { %v2779_v12 = vsel %vm522_vm1, %v5515_v37, %v3375_v22 }
 0x98c   : > { %3398 = vrot.lane.b32.xlu1 %v3397_v45, %s3921_s8  ;;  %3423 = vrot.lane.b32.xlu0 %v5506_v30, %s3919_s20 }
 0x990   : > { %v3354_v26 = vpop.permute.xlu2 %3353 }
 0x991   : > { %v3356_v33 = vunpack.i.h.bf16 %v3354_v26  ;;  %v3355_v61 = vunpack.i.l.bf16 %v3354_v26 }
 0x992   : > { %v2535_v7 = vpop.f32.mrf.mxu2 }
 0x993   : > { %v2810_v53 = vsel %vm2806_vm3, %v2793_v17, %v3356_v33  ;;  %v2809_v63 = vsel %vm2806_vm3, %v2792_v54, %v3355_v61  ;;  %v5516_v61 = vld [vmem:[#allocation17_spill] sm:$0xff]  ;;  %v5517_v54 = vld [vmem:[#allocation15_spill] sm:$0xff] }
 0x994   : > { %v2824_v15 = vpack.c.bf16 %v2810_v53, %v2809_v63  ;;  %3438 = vrot.lane.b32.xlu0 %v5511_v43, %s3919_s20  ;;  %s3841_s20 = scalar_lea.hbm %s3840_s25, 128 }
 0x995   : > { %p3842_p1 = scmp.ne.s32.totalorder %s3840_s25, %s3841_s20  ;;  %p3847_p9 = scmp.lt.s32.totalorder %s3845_s9, %s3841_s20 }
 0x996   : > { %3196 = vmatmul.msk.bf16.gmra.mxu0 %vm402_vm0, %v2824_v15 }
 0x997   : > { %p3843_p4 = pnand %p3842_p1, %p4046_p3  ;;  %p3848_p2 = por %p3847_p9, %p3846_p11 }
 0x999   : > { %p3844_p8 = pneg %p3843_p4 }
 0x99a   : > { %v2537_v9 = vpop.f32.mrf.mxu2 }
 0x99b   : > { %v3412_v42 = vpack.i.bf16 %v2537_v9, %v2535_v7  ;;  %v3369_v19 = vpop.permute.xlu2 %3368  ;;  %p3849_p10 = pnand %p3848_p2, %p3844_p8 }
 0x99c   : > { %v3371_v40 = vunpack.i.h.bf16 %v3369_v19  ;;  %v3370_v1 = vunpack.i.l.bf16 %v3369_v19 }
 0x99d   : > { %3413 = vrot.lane.b32.xlu1 %v3412_v42, %s3921_s8 }
 0x99e   : > { %v2811_v11 = vsel %vm2806_vm3, %v2794_v52, %v3370_v1  ;;  %v2812_v18 = vsel %vm2806_vm3, %v2795_v41, %v3371_v40  ;;  %v5518_v1 = vld [vmem:[#allocation21_spill] sm:$0xff] }
 0x99f   : > { %v2825_v56 = vpack.c.bf16 %v2812_v18, %v2811_v11 }
 0x9a3   : > { %v3379_v4 = vpop.permute.xlu2 %3378 }
 0x9a4   : > { %v3381_v50 = vunpack.i.h.bf16 %v3379_v4  ;;  %v3380_v24 = vunpack.i.l.bf16 %v3379_v4 }
 0x9a6   : > { %3197 = vmatmul.msk.bf16.gmra.mxu0 %vm402_vm0, %v2825_v56  ;;  %v2797_v45 = vsel %vm2789_vm2, %v2780_v46, %v3381_v50  ;;  %v2796_v14 = vsel %vm2789_vm2, %v2779_v12, %v3380_v24  ;;  %v5520_v46 = vld [vmem:[#allocation26_spill] sm:$0xff]  ;;  %v5521_v12 = vld [vmem:[#allocation25_spill] sm:$0xff] }
 0x9ab   : > { %v3389_v30 = vpop.permute.xlu2 %3388 }
 0x9ac   : > { %v3391_v27 = vunpack.i.h.bf16 %v3389_v30  ;;  %v3390_v3 = vunpack.i.l.bf16 %v3389_v30 }
 0x9ad   : > { %v2571_v16 = vpop.f32.mrf.mxu3 }
 0x9ae   : > { %v2782_v7 = vsel %vm522_vm1, %v5516_v61, %v3391_v27  ;;  %v2781_v17 = vsel %vm522_vm1, %v5517_v54, %v3390_v3 }
 0x9b3   : > { %v3404_v42 = vpop.permute.xlu2 %3403 }
 0x9b4   : > { %v3406_v13 = vunpack.i.h.bf16 %v3404_v42  ;;  %v3405_v19 = vunpack.i.l.bf16 %v3404_v42 }
 0x9b5   : > { %v2573_v10 = vpop.f32.mrf.mxu3 }
 0x9b6   : > { %v3427_v34 = vpack.i.bf16 %v2573_v10, %v2571_v16  ;;  %v2784_v51 = vsel %vm522_vm1, %v5518_v1, %v3406_v13  ;;  %v2783_v57 = vsel %vm522_vm1, %v5519_v49, %v3405_v19 }
 0x9b8   : > { %3428 = vrot.lane.b32.xlu1 %v3427_v34, %s3921_s8 }
 0x9bb   : > { %v3419_v0 = vpop.permute.xlu2 %3418 }
 0x9bc   : > { %v3421_v22 = vunpack.i.h.bf16 %v3419_v0  ;;  %v3420_v50 = vunpack.i.l.bf16 %v3419_v0 }
 0x9be   : > { %v2786_v37 = vsel %vm522_vm1, %v5520_v46, %v3421_v22 }
 0x9c3   : > { %v3434_v3 = vpop.permute.xlu2 %3433 }
 0x9d4   : > { %v2576_v47 = vpop.f32.mrf.mxu3 }
 0x9dc   : > { %v2578_v38 = vpop.f32.mrf.mxu3 }
 0x9dd   : > { %v3442_v23 = vpack.i.bf16 %v2578_v38, %v2576_v47 }
 0x9df   : > { %3443 = vrot.lane.b32.xlu1 %v3442_v23, %s3921_s8 }
 0x9e6   : > { %v3384_v60 = vpop.permute.xlu0 %3383 }
 0x9e7   : > { %v3386_v6 = vunpack.i.h.bf16 %v3384_v60  ;;  %v3385_v31 = vunpack.i.l.bf16 %v3384_v60 }
 0x9e9   : > { %v2814_v59 = vsel %vm2806_vm3, %v2797_v45, %v3386_v6  ;;  %v2813_v48 = vsel %vm2806_vm3, %v2796_v14, %v3385_v31  ;;  %v2785_v6 = vsel %vm522_vm1, %v5521_v12, %v3420_v50 }
 0x9ea   : > { %v2826_v20 = vpack.c.bf16 %v2814_v59, %v2813_v48 }
 0x9ec   : > { %3198 = vmatmul.msk.bf16.gmra.mxu0 %vm402_vm0, %v2826_v20 }
 0x9ee   : > { %v3394_v55 = vpop.permute.xlu0 %3393 }
 0x9ef   : > { %v3396_v32 = vunpack.i.h.bf16 %v3394_v55  ;;  %v3395_v44 = vunpack.i.l.bf16 %v3394_v55 }
 0x9f1   : > { %v2799_v15 = vsel %vm2789_vm2, %v2782_v7, %v3396_v32  ;;  %v2798_v36 = vsel %vm2789_vm2, %v2781_v17, %v3395_v44  ;;  %v3436_v32 = vunpack.i.h.bf16 %v3434_v3  ;;  %v3435_v44 = vunpack.i.l.bf16 %v3434_v3  ;;  %v5522_v7 = vld [vmem:[#allocation28_spill] sm:$0xff]  ;;  %v5523_v17 = vld [vmem:[#allocation27_spill] sm:$0xff] }
 0x9f3   : > { %v2788_v54 = vsel %vm522_vm1, %v5522_v7, %v3436_v32 }
 0x9f6   : > { %v3409_v2 = vpop.permute.xlu0 %3408 }
 0x9f7   : > { %v3411_v29 = vunpack.i.h.bf16 %v3409_v2  ;;  %v3410_v21 = vunpack.i.l.bf16 %v3409_v2 }
 0x9f9   : > { %v2801_v52 = vsel %vm2789_vm2, %v2784_v51, %v3411_v29  ;;  %v2800_v11 = vsel %vm2789_vm2, %v2783_v57, %v3410_v21 }
 0x9fb   : > { %v2884_v25 = vpop.f32.mrf.mxu0 }
 0x9fc   : > { %v2885_v26 = vadd.f32 %v5332_v28, %v2884_v25 }
 0x9fe   : > { %2924 = vst.msk [vmem:[%s5335_s13] sm:$0xff] %vm402_vm0, %v2885_v26  ;;  %v3399_v33 = vpop.permute.xlu1 %3398  ;;  %v3424_v62 = vpop.permute.xlu0 %3423 }
 0x9ff   : > { %v3401_v53 = vunpack.i.h.bf16 %v3399_v33  ;;  %v3400_v63 = vunpack.i.l.bf16 %v3399_v33  ;;  %v3426_v24 = vunpack.i.h.bf16 %v3424_v62  ;;  %v3425_v60 = vunpack.i.l.bf16 %v3424_v62 }
 0xa01   : > { %v2816_v35 = vsel %vm2806_vm3, %v2799_v15, %v3401_v53  ;;  %v2815_v43 = vsel %vm2806_vm3, %v2798_v36, %v3400_v63  ;;  %v2803_v59 = vsel %vm2789_vm2, %v2786_v37, %v3426_v24  ;;  %v2802_v48 = vsel %vm2789_vm2, %v2785_v6, %v3425_v60 }
 0xa02   : > { %v2827_v5 = vpack.c.bf16 %v2816_v35, %v2815_v43  ;;  %v2787_v53 = vsel %vm522_vm1, %v5523_v17, %v3435_v44 }
 0xa03   : > { %v2886_v39 = vpop.f32.mrf.mxu0 }
 0xa04   : > { %v2887_v9 = vadd.f32 %v5332_v28, %v2886_v39  ;;  %3199 = vmatmul.msk.bf16.gmra.mxu0 %vm402_vm0, %v2827_v5 }
 0xa06   : > { %2925 = vst.msk [vmem:[%s5335_s13 + $0x8] sm:$0xff] %vm402_vm0, %v2887_v9  ;;  %v3439_v25 = vpop.permute.xlu0 %3438 }
 0xa07   : > { %v3441_v26 = vunpack.i.h.bf16 %v3439_v25  ;;  %v3440_v33 = vunpack.i.l.bf16 %v3439_v25 }
 0xa09   : > { %v2805_v36 = vsel %vm2789_vm2, %v2788_v54, %v3441_v26  ;;  %v2804_v35 = vsel %vm2789_vm2, %v2787_v53, %v3440_v33 }
 0xa0f   : > { %v3414_v40 = vpop.permute.xlu1 %3413 }
 0xa10   : > { %v3416_v58 = vunpack.i.h.bf16 %v3414_v40  ;;  %v3415_v41 = vunpack.i.l.bf16 %v3414_v40 }
 0xa12   : > { %v2818_v18 = vsel %vm2806_vm3, %v2801_v52, %v3416_v58  ;;  %v2817_v56 = vsel %vm2806_vm3, %v2800_v11, %v3415_v41 }
 0xa13   : > { %v2828_v16 = vpack.c.bf16 %v2818_v18, %v2817_v56  ;;  %v2889_v10 = vpop.f32.mrf.mxu0 }
 0xa14   : > { %v2890_v34 = vadd.f32 %v5332_v28, %v2889_v10 }
 0xa15   : > { %3200 = vmatmul.msk.bf16.gmra.mxu0 %vm402_vm0, %v2828_v16 }
 0xa16   : > { %2926 = vst.msk [vmem:[%s5335_s13 + $0x10] sm:$0xff] %vm402_vm0, %v2890_v34 }
 0xa1b   : > { %v2891_v47 = vpop.f32.mrf.mxu0 }
 0xa1c   : > { %v2892_v38 = vadd.f32 %v5332_v28, %v2891_v47 }
 0xa1e   : > { %2927 = vst.msk [vmem:[%s5335_s13 + $0x18] sm:$0xff] %vm402_vm0, %v2892_v38 }
 0xa23   : > { %v2894_v23 = vpop.f32.mrf.mxu0 }
 0xa24   : > { %v2895_v4 = vadd.f32 %v5332_v28, %v2894_v23 }
 0xa26   : > { %2928 = vst.msk [vmem:[%s5335_s13 + $0x20] sm:$0xff] %vm402_vm0, %v2895_v4 }
 0xa2a   : > { %v3429_v8 = vpop.permute.xlu1 %3428 }
 0xa2b   : > { %v3431_v31 = vunpack.i.h.bf16 %v3429_v8  ;;  %v3430_v45 = vunpack.i.l.bf16 %v3429_v8  ;;  %v2896_v14 = vpop.f32.mrf.mxu0 }
 0xa2c   : > { %v2897_v20 = vadd.f32 %v5332_v28, %v2896_v14 }
 0xa2d   : > { %v2820_v30 = vsel %vm2806_vm3, %v2803_v59, %v3431_v31  ;;  %v2819_v55 = vsel %vm2806_vm3, %v2802_v48, %v3430_v45 }
 0xa2e   : > { %v2829_v27 = vpack.c.bf16 %v2820_v30, %v2819_v55  ;;  %2929 = vst.msk [vmem:[%s5335_s13 + $0x28] sm:$0xff] %vm402_vm0, %v2897_v20 }
 0xa30   : > { %3201 = vmatmul.msk.bf16.gmra.mxu0 %vm402_vm0, %v2829_v27 }
 0xa51   : > { %v3444_v61 = vpop.permute.xlu1 %3443 }
 0xa52   : > { %v3446_v63 = vunpack.i.h.bf16 %v3444_v61  ;;  %v3445_v15 = vunpack.i.l.bf16 %v3444_v61 }
 0xa54   : > { %v2822_v43 = vsel %vm2806_vm3, %v2805_v36, %v3446_v63  ;;  %v2821_v5 = vsel %vm2806_vm3, %v2804_v35, %v3445_v15 }
 0xa55   : > { %v2830_v39 = vpack.c.bf16 %v2822_v43, %v2821_v5 }
 0xa57   : > { %3202 = vmatmul.msk.bf16.gmra.mxu0 %vm402_vm0, %v2830_v39 }
 0xa69   : > { %v2899_v9 = vpop.f32.mrf.mxu0 }
 0xa6a   : > { %v2900_v42 = vadd.f32 %v5332_v28, %v2899_v9 }
 0xa6c   : > { %2930 = vst.msk [vmem:[%s5335_s13 + $0x30] sm:$0xff] %vm402_vm0, %v2900_v42 }
 0xa71   : > { %v2901_v2 = vpop.f32.mrf.mxu0 }
 0xa72   : > { %v2902_v13 = vadd.f32 %v5332_v28, %v2901_v2 }
 0xa74   : > { %2931 = vst.msk [vmem:[%s5335_s13 + $0x38] sm:$0xff] %vm402_vm0, %v2902_v13 }
 0xa81   : > { %v2904_v19 = vpop.f32.mrf.mxu0 }
 0xa82   : > { %v2905_v29 = vadd.f32 %v5332_v28, %v2904_v19 }
 0xa84   : > { %2932 = vst.msk [vmem:[%s5335_s13 + $0x40] sm:$0xff] %vm402_vm0, %v2905_v29 }
 0xa89   : > { %v2906_v21 = vpop.f32.mrf.mxu0 }
 0xa8a   : > { %v2907_v40 = vadd.f32 %v5332_v28, %v2906_v21 }
 0xa8c   : > { %2933 = vst.msk [vmem:[%s5335_s13 + $0x48] sm:$0xff] %vm402_vm0, %v2907_v40 }
 0xa92   : > { %v2909_v1 = vpop.f32.mrf.mxu0 }
 0xa93   : > { %v2910_v51 = vadd.f32 %v5332_v28, %v2909_v1 }
 0xa95   : > { %2934 = vst.msk [vmem:[%s5335_s13 + $0x50] sm:$0xff] %vm402_vm0, %v2910_v51 }
 0xa9a   : > { %v2911_v49 = vpop.f32.mrf.mxu0 }
 0xa9b   : > { %v2912_v57 = vadd.f32 %v5332_v28, %v2911_v49 }
 0xa9d   : > { %2935 = vst.msk [vmem:[%s5335_s13 + $0x58] sm:$0xff] %vm402_vm0, %v2912_v57 }
 0xaad   : > { %v2914_v58 = vpop.f32.mrf.mxu0 }
 0xaae   : > { %v2915_v41 = vadd.f32 %v5332_v28, %v2914_v58 }
 0xab0   : > { %2936 = vst.msk [vmem:[%s5335_s13 + $0x60] sm:$0xff] %vm402_vm0, %v2915_v41 }
 0xab5   : > { %v2916_v52 = vpop.f32.mrf.mxu0 }
 0xab6   : > { %v2917_v11 = vadd.f32 %v5332_v28, %v2916_v52 }
 0xab8   : > { %2937 = vst.msk [vmem:[%s5335_s13 + $0x68] sm:$0xff] %vm402_vm0, %v2917_v11 }
 0xad4   : > { %v2919_v18 = vpop.f32.mrf.mxu0 }
 0xad5   : > { %v2920_v56 = vadd.f32 %v5332_v28, %v2919_v18 }
 0xad7   : > { %2938 = vst.msk [vmem:[%s5335_s13 + $0x70] sm:$0xff] %vm402_vm0, %v2920_v56 }
 0xadc   : > { %v2921_v16 = vpop.f32.mrf.mxu0 }
 0xadd   : > { %v2922_v10 = vadd.f32 %v5332_v28, %v2921_v16 }
 0xadf   : > { %2939 = vst.msk [vmem:[%s5335_s13 + $0x78] sm:$0xff] %vm402_vm0, %v2922_v10 }
 0xae0   : > { %3852 = shalt.err (!%p3849_p10)
}
 0xae1   : > { %s3922_s18 = smov 128  }
 0xae2   : > { %3245 = dma.vmem_to_hbm [thread:$0]  (%p4046_p3), %s2955_s7, 2048, %s2957_s15, %s2941_s16, %s3922_s18, %s3922_s18, %s3920_s27  }
 0xae3 PF: > { %s2971_s13 = sand.u32 1, %s3887_s21   ;;  %p5524_p12 = scmp.ge.s32.totalorder %s3899_s24, 2 }
 0xae4   : > { %s2972_s26 = scalar_lea.sflag [#allocation4], %s2971_s13 }
 0xae5   : > { %p3262_p13 = pnand %p5524_p12, %p3993_p6 }
 0xae7   : > { %p3263_p0 = pneg %p3262_p13 }
 0xae9   : > { %3882 = dma.done.wait (%p3263_p0), %s2972_s26, 2048  }
 0xaea   : > { %3884 = vsyncadd (%p3263_p0), %s2972_s26, 4294965248  ;;  %p21_p5 = scmp.ge.s32.totalorder %s4033_s10, 4   ;;  %s5525_s21 = smov %s3891_s22 }
 0xaeb   : > { %s5526_s22 = smov %s3895_s23  ;;  %s5527_s23 = smov %s4042_s14 }
 0xaec   : > { %s5528_s24 = smov %s4033_s10  ;;  %23 = sbr.rel (!%p21_p5) target bundleno = 7 (0x7), region = 101 }
 0xaf1   :  { %2978 = vsyncpa [#allocation3], 1 }
 0xaf2   :  { %2980 = vsyncpa [#allocation3 + $0x1], 1 }
 0xaf3   :  { %2981 = vsyncpa [#allocation6], 1 }
 0xaf4   :  { %2982 = vsyncpa [#allocation9], 1 }
 0xaf5   :  { %2983 = vsyncpa [#allocation4], 1 }
 0xaf6   :  { %2985 = vsyncpa [#allocation4 + $0x1], 1 }

</bundles_post_ra>
